<compile_context>
chip_gen: v7x
topology: tpu7x:2x2x1
jax: 0.10.0
libtpu: 0.0.40
codegen_flags: <defaults>
</compile_context>

<pallas_src>
import functools

import jax
import jax.numpy as jnp
from jax.experimental import pallas as pl
from jax.experimental.pallas import tpu as pltpu


def _round_up(x, m):
    return ((x + m - 1) // m) * m


# ----------------------------------------------------------------------------
# Pallas kernel (single fused invocation, everything resident in VMEM)
# ----------------------------------------------------------------------------
def _lstm_cell(pre_t, h, c, whh_ref, HP):
    """One LSTM step.  pre_t = x_t @ W_ih + b (precomputed, staged in VMEM scratch).
    Gate order (i, f, g, o); each gate occupies a full lane-aligned HP-wide block."""
    g = pre_t + jnp.dot(h, whh_ref[...], preferred_element_type=jnp.float32)
    i = jax.nn.sigmoid(g[:, 0 * HP:1 * HP])
    f = jax.nn.sigmoid(g[:, 1 * HP:2 * HP])
    gg = jnp.tanh(g[:, 2 * HP:3 * HP])
    o = jax.nn.sigmoid(g[:, 3 * HP:4 * HP])
    c_new = f * c + i * gg
    h_new = o * jnp.tanh(c_new)
    return h_new, c_new


def _seq2seq_kernel(src_ref, dst_ref,
                    enc_tab_ref, enc_whh_ref, enc_b_ref,
                    dec_tab_ref, dec_whh_ref, dec_b_ref,
                    pw_ref, pb_ref,
                    out_ref,
                    pre_sc, hs_sc,
                    *, Tsrc, Tdst, BP):
    HP = enc_whh_ref.shape[0]
    V1P = enc_tab_ref.shape[0]
    V2P = dec_tab_ref.shape[0]

    # ---- encoder: embedding lookup + input projection as one one-hot MXU matmul ----
    src_idx = src_ref[...]                                          # (Tsrc*BP, 1) int32
    oh1 = (src_idx == jax.lax.broadcasted_iota(
        jnp.int32, (Tsrc * BP, V1P), 1)).astype(jnp.bfloat16)
    pre_sc[pl.ds(0, Tsrc * BP), :] = (
        jnp.dot(oh1, enc_tab_ref[...], preferred_element_type=jnp.float32)
        + enc_b_ref[...])

    h = jnp.zeros((BP, HP), jnp.float32)          # zero initial (h0, c0)
    c = jnp.zeros((BP, HP), jnp.float32)
    for t in range(Tsrc):                         # static unroll; T is small
        pre_t = pre_sc[pl.ds(t * BP, BP), :]      # aligned (8, 4*HP) load from scratch
        h, c = _lstm_cell(pre_t, h, c, enc_whh_ref, HP)
    # The encoder sequence output is never consumed by the model; only (h, c) flows on
    # (and it stays in vregs — no HBM round-trip).

    # ---- decoder ---------------------------------------------------------------
    dst_idx = dst_ref[...]                                          # (Tdst*BP, 1) int32
    oh2 = (dst_idx == jax.lax.broadcasted_iota(
        jnp.int32, (Tdst * BP, V2P), 1)).astype(jnp.bfloat16)
    pre_sc[pl.ds(0, Tdst * BP), :] = (
        jnp.dot(oh2, dec_tab_ref[...], preferred_element_type=jnp.float32)
        + dec_b_ref[...])

    for t in range(Tdst):
        pre_t = pre_sc[pl.ds(t * BP, BP), :]
        h, c = _lstm_cell(pre_t, h, c, dec_whh_ref, HP)
        hs_sc[pl.ds(t * BP, BP), :] = h           # whole aligned (8,128) tile store

    # ---- prediction epilogue: Linear(hsz, nc) + LogSoftmax, batched over T*BP ------
    z = jnp.dot(hs_sc[...].astype(jnp.bfloat16), pw_ref[...],
                preferred_element_type=jnp.float32) + pb_ref[...]
    m = jnp.max(z, axis=-1, keepdims=True)
    lse = jnp.log(jnp.sum(jnp.exp(z - m), axis=-1, keepdims=True)) + m
    out_ref[...] = z - lse


# ----------------------------------------------------------------------------
# pallas_call wrapper (no grid: the whole problem fits comfortably in VMEM)
# ----------------------------------------------------------------------------
def _seq2seq_forward(src2d, dst2d, enc_tab, enc_whh, enc_b,
                     dec_tab, dec_whh, dec_b, pw, pb, *, Tsrc, Tdst, BP):
    HP = enc_whh.shape[0]
    NCP = pw.shape[1]
    V1P = enc_tab.shape[0]
    V2P = dec_tab.shape[0]
    Tmax = max(Tsrc, Tdst)
    kern = functools.partial(_seq2seq_kernel, Tsrc=Tsrc, Tdst=Tdst, BP=BP)

    flops = (2 * Tsrc * BP * V1P * 4 * HP             # encoder fused embed + proj
             + 2 * Tdst * BP * V2P * 4 * HP           # decoder fused embed + proj
             + 2 * (Tsrc + Tdst) * BP * HP * 4 * HP   # recurrent h @ Whh
             + 2 * Tdst * BP * HP * NCP)              # prediction epilogue
    transcendentals = ((Tsrc + Tdst) * BP * 5 * HP    # sigmoid/tanh in the cell
                       + Tdst * BP * (NCP + 1))       # exp + log in log-softmax
    bytes_accessed = sum(int(x.size) * x.dtype.itemsize for x in
                         (src2d, dst2d, enc_tab, enc_whh, enc_b,
                          dec_tab, dec_whh, dec_b, pw, pb)) + Tdst * BP * NCP * 4

    return pl.pallas_call(
        kern,
        out_shape=jax.ShapeDtypeStruct((Tdst * BP, NCP), jnp.float32),
        scratch_shapes=[pltpu.VMEM((Tmax * BP, 4 * HP), jnp.float32),   # pre_sc
                        pltpu.VMEM((Tdst * BP, HP), jnp.float32)],      # hs_sc
        compiler_params=pltpu.CompilerParams(vmem_limit_bytes=32 * 1024 * 1024),
        cost_estimate=pl.CostEstimate(flops=int(flops),
                                      transcendentals=int(transcendentals),
                                      bytes_accessed=int(bytes_accessed)),
    )(src2d, dst2d, enc_tab, enc_whh, enc_b, dec_tab, dec_whh, dec_b, pw, pb)


# ----------------------------------------------------------------------------
# Seq2Seq model (glue in plain JAX, the whole hot path is one Pallas kernel)
# ----------------------------------------------------------------------------
class Seq2SeqModelPallas:
    def __init__(self, vsz1, dsz1, vsz2, hsz, key):
        dsz2 = hsz                          # decoder RNN input size == hsz in PyTorch
        self.nc = vsz2 + 1
        self.hsz = hsz
        self.HP = _round_up(hsz, 128)       # lane-aligned hidden: each gate = 128 lanes
        self.NCP = _round_up(self.nc, 128)  # lane-dense class dim
        self.V1P = _round_up(vsz1 + 1, 128)
        self.V2P = _round_up(vsz2 + 1, 128)

        keys = jax.random.split(key, 12)
        scale = 1.0 / jnp.sqrt(jnp.float32(hsz))

        def u(k, shape):
            return jax.random.uniform(k, shape, jnp.float32, -scale, scale)

        def pad_gate_cols(w):
            # (R, 4*hsz) -> (R, 4*HP); each gate's hsz real cols at the start of its block
            R = w.shape[0]
            out = jnp.zeros((R, 4 * self.HP), jnp.float32)
            for g in range(4):
                out = out.at[:, g * self.HP: g * self.HP + hsz].set(
                    w[:, g * hsz:(g + 1) * hsz])
            return out

        def pad_rows(w, RP):
            return jnp.zeros((RP, w.shape[1]), w.dtype).at[:w.shape[0]].set(w)

        # embeddings (row 0 is the padding_idx row -> zeros)
        e_in = 0.1 * jax.random.normal(keys[0], (vsz1 + 1, dsz1), jnp.float32)
        e_in = e_in.at[0].set(0.0)
        e_out = 0.1 * jax.random.normal(keys[1], (vsz2 + 1, dsz2), jnp.float32)
        e_out = e_out.at[0].set(0.0)

        # encoder LSTM (insz=dsz1, hidden=hsz); weights stored pre-transposed (in, 4*HP)
        enc_wih = pad_gate_cols(u(keys[2], (dsz1, 4 * hsz)))
        self.enc_whh = pad_rows(pad_gate_cols(u(keys[3], (hsz, 4 * hsz))), self.HP)
        self.enc_b = pad_gate_cols(
            (u(keys[4], (4 * hsz,)) + u(keys[5], (4 * hsz,))).reshape(1, -1))

        # decoder LSTM (insz=hsz, hidden=hsz)
        dec_wih = pad_gate_cols(u(keys[6], (hsz, 4 * hsz)))
        self.dec_whh = pad_rows(pad_gate_cols(u(keys[7], (hsz, 4 * hsz))), self.HP)
        self.dec_b = pad_gate_cols(
            (u(keys[8], (4 * hsz,)) + u(keys[9], (4 * hsz,))).reshape(1, -1))

        # Fused "embedding + input projection" tables: one_hot(tok) @ tab == embed[tok] @ Wih.
        # Precomputed once in f32, stored bf16 (MXU operands only).
        self.enc_tab = pad_rows(jnp.dot(e_in, enc_wih), self.V1P).astype(jnp.bfloat16)
        self.dec_tab = pad_rows(jnp.dot(e_out, dec_wih), self.V2P).astype(jnp.bfloat16)

        # preds = Linear(hsz, nc) as (HP, NCP) bf16; padded class biases = -1e30 so the
        # padded columns vanish from the softmax normalizer.
        pw = u(keys[10], (hsz, self.nc))
        self.pred_w = (jnp.zeros((self.HP, self.NCP), jnp.float32)
                       .at[:hsz, :self.nc].set(pw)).astype(jnp.bfloat16)
        pb = u(keys[11], (self.nc,))
        self.pred_b = jnp.full((1, self.NCP), -1e30, jnp.float32).at[0, :self.nc].set(pb)

    def __call__(self, inputs):
        src_bt, dst_bt = inputs
        B, Tsrc = src_bt.shape
        _, Tdst = dst_bt.shape
        BP = _round_up(B, 8)              # pad batch to a sublane multiple (token 0 rows)
        src_p = jnp.zeros((BP, Tsrc), jnp.int32).at[:B].set(src_bt)
        dst_p = jnp.zeros((BP, Tdst), jnp.int32).at[:B].set(dst_bt)
        src2d = jnp.transpose(src_p, (1, 0)).reshape(Tsrc * BP, 1)   # time-major tokens
        dst2d = jnp.transpose(dst_p, (1, 0)).reshape(Tdst * BP, 1)
        logp = _seq2seq_forward(src2d, dst2d,
                                self.enc_tab, self.enc_whh, self.enc_b,
                                self.dec_tab, self.dec_whh, self.dec_b,
                                self.pred_w, self.pred_b,
                                Tsrc=Tsrc, Tdst=Tdst, BP=BP)          # (Tdst*BP, NCP)
        pred = logp.reshape(Tdst, BP, self.NCP)
        pred = jnp.transpose(pred, (1, 0, 2))[:B, :, :self.nc]        # batch-first, unpad
        return pred


if __name__ == "__main__":
    B, Tsrc, Tdst = 2, 8, 8
    vsz1, dsz1 = 50, 16
    vsz2, hsz = 30, 32

    key = jax.random.PRNGKey(0)
    k_model, k_src, k_dst = jax.random.split(key, 3)

    model = Seq2SeqModelPallas(vsz1, dsz1, vsz2, hsz, k_model)

    src = jax.random.randint(k_src, (B, Tsrc), 1, vsz1 + 1, dtype=jnp.int32)
    dst = jax.random.randint(k_dst, (B, Tdst), 1, vsz2 + 1, dtype=jnp.int32)

    fwd = jax.jit(lambda s, d: model((s, d)))
    out = jax.block_until_ready(fwd(src, dst))

    assert out.shape == (B, Tdst, vsz2 + 1), out.shape
    assert out.dtype == jnp.float32
    # log-softmax sanity: each row sums to ~1 in prob space (padded classes contribute 0)
    assert bool(jnp.all(jnp.abs(jnp.sum(jnp.exp(out), axis=-1) - 1.0) < 1e-4))
    print("KERNEL_OK")
</pallas_src>

<mosaic_0001>
module attributes {stable_mosaic.version = 11 : i64} {
  func.func @_seq2seq_kernel(%arg0: memref<64x1xi32, #tpu.memory_space<vmem>>, %arg1: memref<64x1xi32, #tpu.memory_space<vmem>>, %arg2: memref<128x512xbf16, #tpu.memory_space<vmem>>, %arg3: memref<128x512xf32, #tpu.memory_space<vmem>>, %arg4: memref<1x512xf32, #tpu.memory_space<vmem>>, %arg5: memref<128x512xbf16, #tpu.memory_space<vmem>>, %arg6: memref<128x512xf32, #tpu.memory_space<vmem>>, %arg7: memref<1x512xf32, #tpu.memory_space<vmem>>, %arg8: memref<128x128xbf16, #tpu.memory_space<vmem>>, %arg9: memref<1x128xf32, #tpu.memory_space<vmem>>, %arg10: memref<64x128xf32, #tpu.memory_space<vmem>>, %arg11: memref<64x512xf32, #tpu.memory_space<vmem>>, %arg12: memref<64x128xf32, #tpu.memory_space<vmem>>) attributes {dimension_semantics = [], scalar_prefetch = 0 : i64, scratch_operands = 2 : i64, tpu.core_type = #tpu.core_type<tc>} {
    %c0 = arith.constant 0 : index
    %c0_0 = arith.constant 0 : index
    %0 = vector.load %arg0[%c0, %c0_0] : memref<64x1xi32, #tpu.memory_space<vmem>>, vector<64x1xi32>
    %1 = tpu.iota {dimensions = array<i32: 1>} : vector<64x128xi32>
    %2 = vector.broadcast %0 : vector<64x1xi32> to vector<64x128xi32>
    %3 = arith.cmpi eq, %2, %1 : vector<64x128xi32>
    %4 = arith.extui %3 : vector<64x128xi1> to vector<64x128xi32>
    %5 = arith.sitofp %4 : vector<64x128xi32> to vector<64x128xf32>
    %6 = arith.truncf %5 : vector<64x128xf32> to vector<64x128xbf16>
    %c0_1 = arith.constant 0 : index
    %c0_2 = arith.constant 0 : index
    %7 = vector.load %arg2[%c0_1, %c0_2] : memref<128x512xbf16, #tpu.memory_space<vmem>>, vector<128x512xbf16>
    %cst = arith.constant dense<0.000000e+00> : vector<64x512xf32>
    %8 = tpu.matmul %6, %7, %cst {dimension_numbers = #tpu.dot_dimension_numbers<[1], [0], [0], [1], [0, 0, 1, 1], [], []>} : vector<64x128xbf16>, vector<128x512xbf16>, vector<64x512xf32> -> vector<64x512xf32>
    %c0_3 = arith.constant 0 : index
    %c0_4 = arith.constant 0 : index
    %9 = vector.load %arg4[%c0_3, %c0_4] : memref<1x512xf32, #tpu.memory_space<vmem>>, vector<1x512xf32>
    %10 = vector.broadcast %9 : vector<1x512xf32> to vector<64x512xf32>
    %11 = arith.addf %8, %10 : vector<64x512xf32>
    %c0_5 = arith.constant 0 : index
    %c0_6 = arith.constant 0 : index
    %12 = vector.load %arg11[%c0_5, %c0_6] : memref<64x512xf32, #tpu.memory_space<vmem>>, vector<64x512xf32>
    tpu.vector_store %arg11[%c0_5, %c0_6], %11 {strides = array<i32>} : memref<64x512xf32, #tpu.memory_space<vmem>>, vector<64x512xf32>,
    %cst_7 = arith.constant 0.000000e+00 : f32
    %13 = vector.broadcast %cst_7 : f32 to vector<8x128xf32>
    %cst_8 = arith.constant 0.000000e+00 : f32
    %14 = vector.broadcast %cst_8 : f32 to vector<8x128xf32>
    %c0_9 = arith.constant 0 : index
    %c0_10 = arith.constant 0 : index
    %15 = vector.load %arg11[%c0_9, %c0_10] : memref<64x512xf32, #tpu.memory_space<vmem>>, vector<8x512xf32>
    %c0_11 = arith.constant 0 : index
    %c0_12 = arith.constant 0 : index
    %16 = vector.load %arg3[%c0_11, %c0_12] : memref<128x512xf32, #tpu.memory_space<vmem>>, vector<128x512xf32>
    %cst_13 = arith.constant dense<0.000000e+00> : vector<8x512xf32>
    %17 = tpu.matmul %13, %16, %cst_13 {dimension_numbers = #tpu.dot_dimension_numbers<[1], [0], [0], [1], [0, 0, 1, 1], [], []>} : vector<8x128xf32>, vector<128x512xf32>, vector<8x512xf32> -> vector<8x512xf32>
    %18 = arith.addf %15, %17 : vector<8x512xf32>
    %19 = vector.extract_strided_slice %18 {offsets = [0, 0], sizes = [8, 128], strides = [1, 1]} : vector<8x512xf32> to vector<8x128xf32>
    %20 = arith.negf %19 : vector<8x128xf32>
    %21 = math.exp %20 : vector<8x128xf32>
    %cst_14 = arith.constant 1.000000e+00 : f32
    %22 = vector.broadcast %cst_14 : f32 to vector<8x128xf32>
    %23 = arith.addf %22, %21 : vector<8x128xf32>
    %24 = arith.divf %22, %23 : vector<8x128xf32>
    %25 = vector.extract_strided_slice %18 {offsets = [0, 128], sizes = [8, 128], strides = [1, 1]} : vector<8x512xf32> to vector<8x128xf32>
    %26 = arith.negf %25 : vector<8x128xf32>
    %27 = math.exp %26 : vector<8x128xf32>
    %cst_15 = arith.constant 1.000000e+00 : f32
    %28 = vector.broadcast %cst_15 : f32 to vector<8x128xf32>
    %29 = arith.addf %28, %27 : vector<8x128xf32>
    %30 = arith.divf %28, %29 : vector<8x128xf32>
    %31 = vector.extract_strided_slice %18 {offsets = [0, 256], sizes = [8, 128], strides = [1, 1]} : vector<8x512xf32> to vector<8x128xf32>
    %32 = math.tanh %31 : vector<8x128xf32>
    %33 = vector.extract_strided_slice %18 {offsets = [0, 384], sizes = [8, 128], strides = [1, 1]} : vector<8x512xf32> to vector<8x128xf32>
    %34 = arith.negf %33 : vector<8x128xf32>
    %35 = math.exp %34 : vector<8x128xf32>
    %cst_16 = arith.constant 1.000000e+00 : f32
    %36 = vector.broadcast %cst_16 : f32 to vector<8x128xf32>
    %37 = arith.addf %36, %35 : vector<8x128xf32>
    %38 = arith.divf %36, %37 : vector<8x128xf32>
    %39 = arith.mulf %30, %14 : vector<8x128xf32>
    %40 = arith.mulf %24, %32 : vector<8x128xf32>
    %41 = arith.addf %39, %40 : vector<8x128xf32>
    %42 = math.tanh %41 : vector<8x128xf32>
    %43 = arith.mulf %38, %42 : vector<8x128xf32>
    %c8 = arith.constant 8 : index
    %c0_17 = arith.constant 0 : index
    %44 = vector.load %arg11[%c8, %c0_17] : memref<64x512xf32, #tpu.memory_space<vmem>>, vector<8x512xf32>
    %c0_18 = arith.constant 0 : index
    %c0_19 = arith.constant 0 : index
    %45 = vector.load %arg3[%c0_18, %c0_19] : memref<128x512xf32, #tpu.memory_space<vmem>>, vector<128x512xf32>
    %cst_20 = arith.constant dense<0.000000e+00> : vector<8x512xf32>
    %46 = tpu.matmul %43, %45, %cst_20 {dimension_numbers = #tpu.dot_dimension_numbers<[1], [0], [0], [1], [0, 0, 1, 1], [], []>} : vector<8x128xf32>, vector<128x512xf32>, vector<8x512xf32> -> vector<8x512xf32>
    %47 = arith.addf %44, %46 : vector<8x512xf32>
    %48 = vector.extract_strided_slice %47 {offsets = [0, 0], sizes = [8, 128], strides = [1, 1]} : vector<8x512xf32> to vector<8x128xf32>
    %49 = arith.negf %48 : vector<8x128xf32>
    %50 = math.exp %49 : vector<8x128xf32>
    %cst_21 = arith.constant 1.000000e+00 : f32
    %51 = vector.broadcast %cst_21 : f32 to vector<8x128xf32>
    %52 = arith.addf %51, %50 : vector<8x128xf32>
    %53 = arith.divf %51, %52 : vector<8x128xf32>
    %54 = vector.extract_strided_slice %47 {offsets = [0, 128], sizes = [8, 128], strides = [1, 1]} : vector<8x512xf32> to vector<8x128xf32>
    %55 = arith.negf %54 : vector<8x128xf32>
    %56 = math.exp %55 : vector<8x128xf32>
    %cst_22 = arith.constant 1.000000e+00 : f32
    %57 = vector.broadcast %cst_22 : f32 to vector<8x128xf32>
    %58 = arith.addf %57, %56 : vector<8x128xf32>
    %59 = arith.divf %57, %58 : vector<8x128xf32>
    %60 = vector.extract_strided_slice %47 {offsets = [0, 256], sizes = [8, 128], strides = [1, 1]} : vector<8x512xf32> to vector<8x128xf32>
    %61 = math.tanh %60 : vector<8x128xf32>
    %62 = vector.extract_strided_slice %47 {offsets = [0, 384], sizes = [8, 128], strides = [1, 1]} : vector<8x512xf32> to vector<8x128xf32>
    %63 = arith.negf %62 : vector<8x128xf32>
    %64 = math.exp %63 : vector<8x128xf32>
    %cst_23 = arith.constant 1.000000e+00 : f32
    %65 = vector.broadcast %cst_23 : f32 to vector<8x128xf32>
    %66 = arith.addf %65, %64 : vector<8x128xf32>
    %67 = arith.divf %65, %66 : vector<8x128xf32>
    %68 = arith.mulf %59, %41 : vector<8x128xf32>
    %69 = arith.mulf %53, %61 : vector<8x128xf32>
    %70 = arith.addf %68, %69 : vector<8x128xf32>
    %71 = math.tanh %70 : vector<8x128xf32>
    %72 = arith.mulf %67, %71 : vector<8x128xf32>
    %c16 = arith.constant 16 : index
    %c0_24 = arith.constant 0 : index
    %73 = vector.load %arg11[%c16, %c0_24] : memref<64x512xf32, #tpu.memory_space<vmem>>, vector<8x512xf32>
    %c0_25 = arith.constant 0 : index
    %c0_26 = arith.constant 0 : index
    %74 = vector.load %arg3[%c0_25, %c0_26] : memref<128x512xf32, #tpu.memory_space<vmem>>, vector<128x512xf32>
    %cst_27 = arith.constant dense<0.000000e+00> : vector<8x512xf32>
    %75 = tpu.matmul %72, %74, %cst_27 {dimension_numbers = #tpu.dot_dimension_numbers<[1], [0], [0], [1], [0, 0, 1, 1], [], []>} : vector<8x128xf32>, vector<128x512xf32>, vector<8x512xf32> -> vector<8x512xf32>
    %76 = arith.addf %73, %75 : vector<8x512xf32>
    %77 = vector.extract_strided_slice %76 {offsets = [0, 0], sizes = [8, 128], strides = [1, 1]} : vector<8x512xf32> to vector<8x128xf32>
    %78 = arith.negf %77 : vector<8x128xf32>
    %79 = math.exp %78 : vector<8x128xf32>
    %cst_28 = arith.constant 1.000000e+00 : f32
    %80 = vector.broadcast %cst_28 : f32 to vector<8x128xf32>
    %81 = arith.addf %80, %79 : vector<8x128xf32>
    %82 = arith.divf %80, %81 : vector<8x128xf32>
    %83 = vector.extract_strided_slice %76 {offsets = [0, 128], sizes = [8, 128], strides = [1, 1]} : vector<8x512xf32> to vector<8x128xf32>
    %84 = arith.negf %83 : vector<8x128xf32>
    %85 = math.exp %84 : vector<8x128xf32>
    %cst_29 = arith.constant 1.000000e+00 : f32
    %86 = vector.broadcast %cst_29 : f32 to vector<8x128xf32>
    %87 = arith.addf %86, %85 : vector<8x128xf32>
    %88 = arith.divf %86, %87 : vector<8x128xf32>
    %89 = vector.extract_strided_slice %76 {offsets = [0, 256], sizes = [8, 128], strides = [1, 1]} : vector<8x512xf32> to vector<8x128xf32>
    %90 = math.tanh %89 : vector<8x128xf32>
    %91 = vector.extract_strided_slice %76 {offsets = [0, 384], sizes = [8, 128], strides = [1, 1]} : vector<8x512xf32> to vector<8x128xf32>
    %92 = arith.negf %91 : vector<8x128xf32>
    %93 = math.exp %92 : vector<8x128xf32>
    %cst_30 = arith.constant 1.000000e+00 : f32
    %94 = vector.broadcast %cst_30 : f32 to vector<8x128xf32>
    %95 = arith.addf %94, %93 : vector<8x128xf32>
    %96 = arith.divf %94, %95 : vector<8x128xf32>
    %97 = arith.mulf %88, %70 : vector<8x128xf32>
    %98 = arith.mulf %82, %90 : vector<8x128xf32>
    %99 = arith.addf %97, %98 : vector<8x128xf32>
    %100 = math.tanh %99 : vector<8x128xf32>
    %101 = arith.mulf %96, %100 : vector<8x128xf32>
    %c24 = arith.constant 24 : index
    %c0_31 = arith.constant 0 : index
    %102 = vector.load %arg11[%c24, %c0_31] : memref<64x512xf32, #tpu.memory_space<vmem>>, vector<8x512xf32>
    %c0_32 = arith.constant 0 : index
    %c0_33 = arith.constant 0 : index
    %103 = vector.load %arg3[%c0_32, %c0_33] : memref<128x512xf32, #tpu.memory_space<vmem>>, vector<128x512xf32>
    %cst_34 = arith.constant dense<0.000000e+00> : vector<8x512xf32>
    %104 = tpu.matmul %101, %103, %cst_34 {dimension_numbers = #tpu.dot_dimension_numbers<[1], [0], [0], [1], [0, 0, 1, 1], [], []>} : vector<8x128xf32>, vector<128x512xf32>, vector<8x512xf32> -> vector<8x512xf32>
    %105 = arith.addf %102, %104 : vector<8x512xf32>
    %106 = vector.extract_strided_slice %105 {offsets = [0, 0], sizes = [8, 128], strides = [1, 1]} : vector<8x512xf32> to vector<8x128xf32>
    %107 = arith.negf %106 : vector<8x128xf32>
    %108 = math.exp %107 : vector<8x128xf32>
    %cst_35 = arith.constant 1.000000e+00 : f32
    %109 = vector.broadcast %cst_35 : f32 to vector<8x128xf32>
    %110 = arith.addf %109, %108 : vector<8x128xf32>
    %111 = arith.divf %109, %110 : vector<8x128xf32>
    %112 = vector.extract_strided_slice %105 {offsets = [0, 128], sizes = [8, 128], strides = [1, 1]} : vector<8x512xf32> to vector<8x128xf32>
    %113 = arith.negf %112 : vector<8x128xf32>
    %114 = math.exp %113 : vector<8x128xf32>
    %cst_36 = arith.constant 1.000000e+00 : f32
    %115 = vector.broadcast %cst_36 : f32 to vector<8x128xf32>
    %116 = arith.addf %115, %114 : vector<8x128xf32>
    %117 = arith.divf %115, %116 : vector<8x128xf32>
    %118 = vector.extract_strided_slice %105 {offsets = [0, 256], sizes = [8, 128], strides = [1, 1]} : vector<8x512xf32> to vector<8x128xf32>
    %119 = math.tanh %118 : vector<8x128xf32>
    %120 = vector.extract_strided_slice %105 {offsets = [0, 384], sizes = [8, 128], strides = [1, 1]} : vector<8x512xf32> to vector<8x128xf32>
    %121 = arith.negf %120 : vector<8x128xf32>
    %122 = math.exp %121 : vector<8x128xf32>
    %cst_37 = arith.constant 1.000000e+00 : f32
    %123 = vector.broadcast %cst_37 : f32 to vector<8x128xf32>
    %124 = arith.addf %123, %122 : vector<8x128xf32>
    %125 = arith.divf %123, %124 : vector<8x128xf32>
    %126 = arith.mulf %117, %99 : vector<8x128xf32>
    %127 = arith.mulf %111, %119 : vector<8x128xf32>
    %128 = arith.addf %126, %127 : vector<8x128xf32>
    %129 = math.tanh %128 : vector<8x128xf32>
    %130 = arith.mulf %125, %129 : vector<8x128xf32>
    %c32 = arith.constant 32 : index
    %c0_38 = arith.constant 0 : index
    %131 = vector.load %arg11[%c32, %c0_38] : memref<64x512xf32, #tpu.memory_space<vmem>>, vector<8x512xf32>
    %c0_39 = arith.constant 0 : index
    %c0_40 = arith.constant 0 : index
    %132 = vector.load %arg3[%c0_39, %c0_40] : memref<128x512xf32, #tpu.memory_space<vmem>>, vector<128x512xf32>
    %cst_41 = arith.constant dense<0.000000e+00> : vector<8x512xf32>
    %133 = tpu.matmul %130, %132, %cst_41 {dimension_numbers = #tpu.dot_dimension_numbers<[1], [0], [0], [1], [0, 0, 1, 1], [], []>} : vector<8x128xf32>, vector<128x512xf32>, vector<8x512xf32> -> vector<8x512xf32>
    %134 = arith.addf %131, %133 : vector<8x512xf32>
    %135 = vector.extract_strided_slice %134 {offsets = [0, 0], sizes = [8, 128], strides = [1, 1]} : vector<8x512xf32> to vector<8x128xf32>
    %136 = arith.negf %135 : vector<8x128xf32>
    %137 = math.exp %136 : vector<8x128xf32>
    %cst_42 = arith.constant 1.000000e+00 : f32
    %138 = vector.broadcast %cst_42 : f32 to vector<8x128xf32>
    %139 = arith.addf %138, %137 : vector<8x128xf32>
    %140 = arith.divf %138, %139 : vector<8x128xf32>
    %141 = vector.extract_strided_slice %134 {offsets = [0, 128], sizes = [8, 128], strides = [1, 1]} : vector<8x512xf32> to vector<8x128xf32>
    %142 = arith.negf %141 : vector<8x128xf32>
    %143 = math.exp %142 : vector<8x128xf32>
    %cst_43 = arith.constant 1.000000e+00 : f32
    %144 = vector.broadcast %cst_43 : f32 to vector<8x128xf32>
    %145 = arith.addf %144, %143 : vector<8x128xf32>
    %146 = arith.divf %144, %145 : vector<8x128xf32>
    %147 = vector.extract_strided_slice %134 {offsets = [0, 256], sizes = [8, 128], strides = [1, 1]} : vector<8x512xf32> to vector<8x128xf32>
    %148 = math.tanh %147 : vector<8x128xf32>
    %149 = vector.extract_strided_slice %134 {offsets = [0, 384], sizes = [8, 128], strides = [1, 1]} : vector<8x512xf32> to vector<8x128xf32>
    %150 = arith.negf %149 : vector<8x128xf32>
    %151 = math.exp %150 : vector<8x128xf32>
    %cst_44 = arith.constant 1.000000e+00 : f32
    %152 = vector.broadcast %cst_44 : f32 to vector<8x128xf32>
    %153 = arith.addf %152, %151 : vector<8x128xf32>
    %154 = arith.divf %152, %153 : vector<8x128xf32>
    %155 = arith.mulf %146, %128 : vector<8x128xf32>
    %156 = arith.mulf %140, %148 : vector<8x128xf32>
    %157 = arith.addf %155, %156 : vector<8x128xf32>
    %158 = math.tanh %157 : vector<8x128xf32>
    %159 = arith.mulf %154, %158 : vector<8x128xf32>
    %c40 = arith.constant 40 : index
    %c0_45 = arith.constant 0 : index
    %160 = vector.load %arg11[%c40, %c0_45] : memref<64x512xf32, #tpu.memory_space<vmem>>, vector<8x512xf32>
    %c0_46 = arith.constant 0 : index
    %c0_47 = arith.constant 0 : index
    %161 = vector.load %arg3[%c0_46, %c0_47] : memref<128x512xf32, #tpu.memory_space<vmem>>, vector<128x512xf32>
    %cst_48 = arith.constant dense<0.000000e+00> : vector<8x512xf32>
    %162 = tpu.matmul %159, %161, %cst_48 {dimension_numbers = #tpu.dot_dimension_numbers<[1], [0], [0], [1], [0, 0, 1, 1], [], []>} : vector<8x128xf32>, vector<128x512xf32>, vector<8x512xf32> -> vector<8x512xf32>
    %163 = arith.addf %160, %162 : vector<8x512xf32>
    %164 = vector.extract_strided_slice %163 {offsets = [0, 0], sizes = [8, 128], strides = [1, 1]} : vector<8x512xf32> to vector<8x128xf32>
    %165 = arith.negf %164 : vector<8x128xf32>
    %166 = math.exp %165 : vector<8x128xf32>
    %cst_49 = arith.constant 1.000000e+00 : f32
    %167 = vector.broadcast %cst_49 : f32 to vector<8x128xf32>
    %168 = arith.addf %167, %166 : vector<8x128xf32>
    %169 = arith.divf %167, %168 : vector<8x128xf32>
    %170 = vector.extract_strided_slice %163 {offsets = [0, 128], sizes = [8, 128], strides = [1, 1]} : vector<8x512xf32> to vector<8x128xf32>
    %171 = arith.negf %170 : vector<8x128xf32>
    %172 = math.exp %171 : vector<8x128xf32>
    %cst_50 = arith.constant 1.000000e+00 : f32
    %173 = vector.broadcast %cst_50 : f32 to vector<8x128xf32>
    %174 = arith.addf %173, %172 : vector<8x128xf32>
    %175 = arith.divf %173, %174 : vector<8x128xf32>
    %176 = vector.extract_strided_slice %163 {offsets = [0, 256], sizes = [8, 128], strides = [1, 1]} : vector<8x512xf32> to vector<8x128xf32>
    %177 = math.tanh %176 : vector<8x128xf32>
    %178 = vector.extract_strided_slice %163 {offsets = [0, 384], sizes = [8, 128], strides = [1, 1]} : vector<8x512xf32> to vector<8x128xf32>
    %179 = arith.negf %178 : vector<8x128xf32>
    %180 = math.exp %179 : vector<8x128xf32>
    %cst_51 = arith.constant 1.000000e+00 : f32
    %181 = vector.broadcast %cst_51 : f32 to vector<8x128xf32>
    %182 = arith.addf %181, %180 : vector<8x128xf32>
    %183 = arith.divf %181, %182 : vector<8x128xf32>
    %184 = arith.mulf %175, %157 : vector<8x128xf32>
    %185 = arith.mulf %169, %177 : vector<8x128xf32>
    %186 = arith.addf %184, %185 : vector<8x128xf32>
    %187 = math.tanh %186 : vector<8x128xf32>
    %188 = arith.mulf %183, %187 : vector<8x128xf32>
    %c48 = arith.constant 48 : index
    %c0_52 = arith.constant 0 : index
    %189 = vector.load %arg11[%c48, %c0_52] : memref<64x512xf32, #tpu.memory_space<vmem>>, vector<8x512xf32>
    %c0_53 = arith.constant 0 : index
    %c0_54 = arith.constant 0 : index
    %190 = vector.load %arg3[%c0_53, %c0_54] : memref<128x512xf32, #tpu.memory_space<vmem>>, vector<128x512xf32>
    %cst_55 = arith.constant dense<0.000000e+00> : vector<8x512xf32>
    %191 = tpu.matmul %188, %190, %cst_55 {dimension_numbers = #tpu.dot_dimension_numbers<[1], [0], [0], [1], [0, 0, 1, 1], [], []>} : vector<8x128xf32>, vector<128x512xf32>, vector<8x512xf32> -> vector<8x512xf32>
    %192 = arith.addf %189, %191 : vector<8x512xf32>
    %193 = vector.extract_strided_slice %192 {offsets = [0, 0], sizes = [8, 128], strides = [1, 1]} : vector<8x512xf32> to vector<8x128xf32>
    %194 = arith.negf %193 : vector<8x128xf32>
    %195 = math.exp %194 : vector<8x128xf32>
    %cst_56 = arith.constant 1.000000e+00 : f32
    %196 = vector.broadcast %cst_56 : f32 to vector<8x128xf32>
    %197 = arith.addf %196, %195 : vector<8x128xf32>
    %198 = arith.divf %196, %197 : vector<8x128xf32>
    %199 = vector.extract_strided_slice %192 {offsets = [0, 128], sizes = [8, 128], strides = [1, 1]} : vector<8x512xf32> to vector<8x128xf32>
    %200 = arith.negf %199 : vector<8x128xf32>
    %201 = math.exp %200 : vector<8x128xf32>
    %cst_57 = arith.constant 1.000000e+00 : f32
    %202 = vector.broadcast %cst_57 : f32 to vector<8x128xf32>
    %203 = arith.addf %202, %201 : vector<8x128xf32>
    %204 = arith.divf %202, %203 : vector<8x128xf32>
    %205 = vector.extract_strided_slice %192 {offsets = [0, 256], sizes = [8, 128], strides = [1, 1]} : vector<8x512xf32> to vector<8x128xf32>
    %206 = math.tanh %205 : vector<8x128xf32>
    %207 = vector.extract_strided_slice %192 {offsets = [0, 384], sizes = [8, 128], strides = [1, 1]} : vector<8x512xf32> to vector<8x128xf32>
    %208 = arith.negf %207 : vector<8x128xf32>
    %209 = math.exp %208 : vector<8x128xf32>
    %cst_58 = arith.constant 1.000000e+00 : f32
    %210 = vector.broadcast %cst_58 : f32 to vector<8x128xf32>
    %211 = arith.addf %210, %209 : vector<8x128xf32>
    %212 = arith.divf %210, %211 : vector<8x128xf32>
    %213 = arith.mulf %204, %186 : vector<8x128xf32>
    %214 = arith.mulf %198, %206 : vector<8x128xf32>
    %215 = arith.addf %213, %214 : vector<8x128xf32>
    %216 = math.tanh %215 : vector<8x128xf32>
    %217 = arith.mulf %212, %216 : vector<8x128xf32>
    %c56 = arith.constant 56 : index
    %c0_59 = arith.constant 0 : index
    %218 = vector.load %arg11[%c56, %c0_59] : memref<64x512xf32, #tpu.memory_space<vmem>>, vector<8x512xf32>
    %c0_60 = arith.constant 0 : index
    %c0_61 = arith.constant 0 : index
    %219 = vector.load %arg3[%c0_60, %c0_61] : memref<128x512xf32, #tpu.memory_space<vmem>>, vector<128x512xf32>
    %cst_62 = arith.constant dense<0.000000e+00> : vector<8x512xf32>
    %220 = tpu.matmul %217, %219, %cst_62 {dimension_numbers = #tpu.dot_dimension_numbers<[1], [0], [0], [1], [0, 0, 1, 1], [], []>} : vector<8x128xf32>, vector<128x512xf32>, vector<8x512xf32> -> vector<8x512xf32>
    %221 = arith.addf %218, %220 : vector<8x512xf32>
    %222 = vector.extract_strided_slice %221 {offsets = [0, 0], sizes = [8, 128], strides = [1, 1]} : vector<8x512xf32> to vector<8x128xf32>
    %223 = arith.negf %222 : vector<8x128xf32>
    %224 = math.exp %223 : vector<8x128xf32>
    %cst_63 = arith.constant 1.000000e+00 : f32
    %225 = vector.broadcast %cst_63 : f32 to vector<8x128xf32>
    %226 = arith.addf %225, %224 : vector<8x128xf32>
    %227 = arith.divf %225, %226 : vector<8x128xf32>
    %228 = vector.extract_strided_slice %221 {offsets = [0, 128], sizes = [8, 128], strides = [1, 1]} : vector<8x512xf32> to vector<8x128xf32>
    %229 = arith.negf %228 : vector<8x128xf32>
    %230 = math.exp %229 : vector<8x128xf32>
    %cst_64 = arith.constant 1.000000e+00 : f32
    %231 = vector.broadcast %cst_64 : f32 to vector<8x128xf32>
    %232 = arith.addf %231, %230 : vector<8x128xf32>
    %233 = arith.divf %231, %232 : vector<8x128xf32>
    %234 = vector.extract_strided_slice %221 {offsets = [0, 256], sizes = [8, 128], strides = [1, 1]} : vector<8x512xf32> to vector<8x128xf32>
    %235 = math.tanh %234 : vector<8x128xf32>
    %236 = vector.extract_strided_slice %221 {offsets = [0, 384], sizes = [8, 128], strides = [1, 1]} : vector<8x512xf32> to vector<8x128xf32>
    %237 = arith.negf %236 : vector<8x128xf32>
    %238 = math.exp %237 : vector<8x128xf32>
    %cst_65 = arith.constant 1.000000e+00 : f32
    %239 = vector.broadcast %cst_65 : f32 to vector<8x128xf32>
    %240 = arith.addf %239, %238 : vector<8x128xf32>
    %241 = arith.divf %239, %240 : vector<8x128xf32>
    %242 = arith.mulf %233, %215 : vector<8x128xf32>
    %243 = arith.mulf %227, %235 : vector<8x128xf32>
    %244 = arith.addf %242, %243 : vector<8x128xf32>
    %245 = math.tanh %244 : vector<8x128xf32>
    %246 = arith.mulf %241, %245 : vector<8x128xf32>
    %c0_66 = arith.constant 0 : index
    %c0_67 = arith.constant 0 : index
    %247 = vector.load %arg1[%c0_66, %c0_67] : memref<64x1xi32, #tpu.memory_space<vmem>>, vector<64x1xi32>
    %248 = tpu.iota {dimensions = array<i32: 1>} : vector<64x128xi32>
    %249 = vector.broadcast %247 : vector<64x1xi32> to vector<64x128xi32>
    %250 = arith.cmpi eq, %249, %248 : vector<64x128xi32>
    %251 = arith.extui %250 : vector<64x128xi1> to vector<64x128xi32>
    %252 = arith.sitofp %251 : vector<64x128xi32> to vector<64x128xf32>
    %253 = arith.truncf %252 : vector<64x128xf32> to vector<64x128xbf16>
    %c0_68 = arith.constant 0 : index
    %c0_69 = arith.constant 0 : index
    %254 = vector.load %arg5[%c0_68, %c0_69] : memref<128x512xbf16, #tpu.memory_space<vmem>>, vector<128x512xbf16>
    %cst_70 = arith.constant dense<0.000000e+00> : vector<64x512xf32>
    %255 = tpu.matmul %253, %254, %cst_70 {dimension_numbers = #tpu.dot_dimension_numbers<[1], [0], [0], [1], [0, 0, 1, 1], [], []>} : vector<64x128xbf16>, vector<128x512xbf16>, vector<64x512xf32> -> vector<64x512xf32>
    %c0_71 = arith.constant 0 : index
    %c0_72 = arith.constant 0 : index
    %256 = vector.load %arg7[%c0_71, %c0_72] : memref<1x512xf32, #tpu.memory_space<vmem>>, vector<1x512xf32>
    %257 = vector.broadcast %256 : vector<1x512xf32> to vector<64x512xf32>
    %258 = arith.addf %255, %257 : vector<64x512xf32>
    %c0_73 = arith.constant 0 : index
    %c0_74 = arith.constant 0 : index
    %259 = vector.load %arg11[%c0_73, %c0_74] : memref<64x512xf32, #tpu.memory_space<vmem>>, vector<64x512xf32>
    tpu.vector_store %arg11[%c0_73, %c0_74], %258 {strides = array<i32>} : memref<64x512xf32, #tpu.memory_space<vmem>>, vector<64x512xf32>,
    %c0_75 = arith.constant 0 : index
    %c0_76 = arith.constant 0 : index
    %260 = vector.load %arg11[%c0_75, %c0_76] : memref<64x512xf32, #tpu.memory_space<vmem>>, vector<8x512xf32>
    %c0_77 = arith.constant 0 : index
    %c0_78 = arith.constant 0 : index
    %261 = vector.load %arg6[%c0_77, %c0_78] : memref<128x512xf32, #tpu.memory_space<vmem>>, vector<128x512xf32>
    %cst_79 = arith.constant dense<0.000000e+00> : vector<8x512xf32>
    %262 = tpu.matmul %246, %261, %cst_79 {dimension_numbers = #tpu.dot_dimension_numbers<[1], [0], [0], [1], [0, 0, 1, 1], [], []>} : vector<8x128xf32>, vector<128x512xf32>, vector<8x512xf32> -> vector<8x512xf32>
    %263 = arith.addf %260, %262 : vector<8x512xf32>
    %264 = vector.extract_strided_slice %263 {offsets = [0, 0], sizes = [8, 128], strides = [1, 1]} : vector<8x512xf32> to vector<8x128xf32>
    %265 = arith.negf %264 : vector<8x128xf32>
    %266 = math.exp %265 : vector<8x128xf32>
    %cst_80 = arith.constant 1.000000e+00 : f32
    %267 = vector.broadcast %cst_80 : f32 to vector<8x128xf32>
    %268 = arith.addf %267, %266 : vector<8x128xf32>
    %269 = arith.divf %267, %268 : vector<8x128xf32>
    %270 = vector.extract_strided_slice %263 {offsets = [0, 128], sizes = [8, 128], strides = [1, 1]} : vector<8x512xf32> to vector<8x128xf32>
    %271 = arith.negf %270 : vector<8x128xf32>
    %272 = math.exp %271 : vector<8x128xf32>
    %cst_81 = arith.constant 1.000000e+00 : f32
    %273 = vector.broadcast %cst_81 : f32 to vector<8x128xf32>
    %274 = arith.addf %273, %272 : vector<8x128xf32>
    %275 = arith.divf %273, %274 : vector<8x128xf32>
    %276 = vector.extract_strided_slice %263 {offsets = [0, 256], sizes = [8, 128], strides = [1, 1]} : vector<8x512xf32> to vector<8x128xf32>
    %277 = math.tanh %276 : vector<8x128xf32>
    %278 = vector.extract_strided_slice %263 {offsets = [0, 384], sizes = [8, 128], strides = [1, 1]} : vector<8x512xf32> to vector<8x128xf32>
    %279 = arith.negf %278 : vector<8x128xf32>
    %280 = math.exp %279 : vector<8x128xf32>
    %cst_82 = arith.constant 1.000000e+00 : f32
    %281 = vector.broadcast %cst_82 : f32 to vector<8x128xf32>
    %282 = arith.addf %281, %280 : vector<8x128xf32>
    %283 = arith.divf %281, %282 : vector<8x128xf32>
    %284 = arith.mulf %275, %244 : vector<8x128xf32>
    %285 = arith.mulf %269, %277 : vector<8x128xf32>
    %286 = arith.addf %284, %285 : vector<8x128xf32>
    %287 = math.tanh %286 : vector<8x128xf32>
    %288 = arith.mulf %283, %287 : vector<8x128xf32>
    %c0_83 = arith.constant 0 : index
    %c0_84 = arith.constant 0 : index
    %289 = vector.load %arg12[%c0_83, %c0_84] : memref<64x128xf32, #tpu.memory_space<vmem>>, vector<8x128xf32>
    tpu.vector_store %arg12[%c0_83, %c0_84], %288 {strides = array<i32>} : memref<64x128xf32, #tpu.memory_space<vmem>>, vector<8x128xf32>,
    %c8_85 = arith.constant 8 : index
    %c0_86 = arith.constant 0 : index
    %290 = vector.load %arg11[%c8_85, %c0_86] : memref<64x512xf32, #tpu.memory_space<vmem>>, vector<8x512xf32>
    %c0_87 = arith.constant 0 : index
    %c0_88 = arith.constant 0 : index
    %291 = vector.load %arg6[%c0_87, %c0_88] : memref<128x512xf32, #tpu.memory_space<vmem>>, vector<128x512xf32>
    %cst_89 = arith.constant dense<0.000000e+00> : vector<8x512xf32>
    %292 = tpu.matmul %288, %291, %cst_89 {dimension_numbers = #tpu.dot_dimension_numbers<[1], [0], [0], [1], [0, 0, 1, 1], [], []>} : vector<8x128xf32>, vector<128x512xf32>, vector<8x512xf32> -> vector<8x512xf32>
    %293 = arith.addf %290, %292 : vector<8x512xf32>
    %294 = vector.extract_strided_slice %293 {offsets = [0, 0], sizes = [8, 128], strides = [1, 1]} : vector<8x512xf32> to vector<8x128xf32>
    %295 = arith.negf %294 : vector<8x128xf32>
    %296 = math.exp %295 : vector<8x128xf32>
    %cst_90 = arith.constant 1.000000e+00 : f32
    %297 = vector.broadcast %cst_90 : f32 to vector<8x128xf32>
    %298 = arith.addf %297, %296 : vector<8x128xf32>
    %299 = arith.divf %297, %298 : vector<8x128xf32>
    %300 = vector.extract_strided_slice %293 {offsets = [0, 128], sizes = [8, 128], strides = [1, 1]} : vector<8x512xf32> to vector<8x128xf32>
    %301 = arith.negf %300 : vector<8x128xf32>
    %302 = math.exp %301 : vector<8x128xf32>
    %cst_91 = arith.constant 1.000000e+00 : f32
    %303 = vector.broadcast %cst_91 : f32 to vector<8x128xf32>
    %304 = arith.addf %303, %302 : vector<8x128xf32>
    %305 = arith.divf %303, %304 : vector<8x128xf32>
    %306 = vector.extract_strided_slice %293 {offsets = [0, 256], sizes = [8, 128], strides = [1, 1]} : vector<8x512xf32> to vector<8x128xf32>
    %307 = math.tanh %306 : vector<8x128xf32>
    %308 = vector.extract_strided_slice %293 {offsets = [0, 384], sizes = [8, 128], strides = [1, 1]} : vector<8x512xf32> to vector<8x128xf32>
    %309 = arith.negf %308 : vector<8x128xf32>
    %310 = math.exp %309 : vector<8x128xf32>
    %cst_92 = arith.constant 1.000000e+00 : f32
    %311 = vector.broadcast %cst_92 : f32 to vector<8x128xf32>
    %312 = arith.addf %311, %310 : vector<8x128xf32>
    %313 = arith.divf %311, %312 : vector<8x128xf32>
    %314 = arith.mulf %305, %286 : vector<8x128xf32>
    %315 = arith.mulf %299, %307 : vector<8x128xf32>
    %316 = arith.addf %314, %315 : vector<8x128xf32>
    %317 = math.tanh %316 : vector<8x128xf32>
    %318 = arith.mulf %313, %317 : vector<8x128xf32>
    %c8_93 = arith.constant 8 : index
    %c0_94 = arith.constant 0 : index
    %319 = vector.load %arg12[%c8_93, %c0_94] : memref<64x128xf32, #tpu.memory_space<vmem>>, vector<8x128xf32>
    tpu.vector_store %arg12[%c8_93, %c0_94], %318 {strides = array<i32>} : memref<64x128xf32, #tpu.memory_space<vmem>>, vector<8x128xf32>,
    %c16_95 = arith.constant 16 : index
    %c0_96 = arith.constant 0 : index
    %320 = vector.load %arg11[%c16_95, %c0_96] : memref<64x512xf32, #tpu.memory_space<vmem>>, vector<8x512xf32>
    %c0_97 = arith.constant 0 : index
    %c0_98 = arith.constant 0 : index
    %321 = vector.load %arg6[%c0_97, %c0_98] : memref<128x512xf32, #tpu.memory_space<vmem>>, vector<128x512xf32>
    %cst_99 = arith.constant dense<0.000000e+00> : vector<8x512xf32>
    %322 = tpu.matmul %318, %321, %cst_99 {dimension_numbers = #tpu.dot_dimension_numbers<[1], [0], [0], [1], [0, 0, 1, 1], [], []>} : vector<8x128xf32>, vector<128x512xf32>, vector<8x512xf32> -> vector<8x512xf32>
    %323 = arith.addf %320, %322 : vector<8x512xf32>
    %324 = vector.extract_strided_slice %323 {offsets = [0, 0], sizes = [8, 128], strides = [1, 1]} : vector<8x512xf32> to vector<8x128xf32>
    %325 = arith.negf %324 : vector<8x128xf32>
    %326 = math.exp %325 : vector<8x128xf32>
    %cst_100 = arith.constant 1.000000e+00 : f32
    %327 = vector.broadcast %cst_100 : f32 to vector<8x128xf32>
    %328 = arith.addf %327, %326 : vector<8x128xf32>
    %329 = arith.divf %327, %328 : vector<8x128xf32>
    %330 = vector.extract_strided_slice %323 {offsets = [0, 128], sizes = [8, 128], strides = [1, 1]} : vector<8x512xf32> to vector<8x128xf32>
    %331 = arith.negf %330 : vector<8x128xf32>
    %332 = math.exp %331 : vector<8x128xf32>
    %cst_101 = arith.constant 1.000000e+00 : f32
    %333 = vector.broadcast %cst_101 : f32 to vector<8x128xf32>
    %334 = arith.addf %333, %332 : vector<8x128xf32>
    %335 = arith.divf %333, %334 : vector<8x128xf32>
    %336 = vector.extract_strided_slice %323 {offsets = [0, 256], sizes = [8, 128], strides = [1, 1]} : vector<8x512xf32> to vector<8x128xf32>
    %337 = math.tanh %336 : vector<8x128xf32>
    %338 = vector.extract_strided_slice %323 {offsets = [0, 384], sizes = [8, 128], strides = [1, 1]} : vector<8x512xf32> to vector<8x128xf32>
    %339 = arith.negf %338 : vector<8x128xf32>
    %340 = math.exp %339 : vector<8x128xf32>
    %cst_102 = arith.constant 1.000000e+00 : f32
    %341 = vector.broadcast %cst_102 : f32 to vector<8x128xf32>
    %342 = arith.addf %341, %340 : vector<8x128xf32>
    %343 = arith.divf %341, %342 : vector<8x128xf32>
    %344 = arith.mulf %335, %316 : vector<8x128xf32>
    %345 = arith.mulf %329, %337 : vector<8x128xf32>
    %346 = arith.addf %344, %345 : vector<8x128xf32>
    %347 = math.tanh %346 : vector<8x128xf32>
    %348 = arith.mulf %343, %347 : vector<8x128xf32>
    %c16_103 = arith.constant 16 : index
    %c0_104 = arith.constant 0 : index
    %349 = vector.load %arg12[%c16_103, %c0_104] : memref<64x128xf32, #tpu.memory_space<vmem>>, vector<8x128xf32>
    tpu.vector_store %arg12[%c16_103, %c0_104], %348 {strides = array<i32>} : memref<64x128xf32, #tpu.memory_space<vmem>>, vector<8x128xf32>,
    %c24_105 = arith.constant 24 : index
    %c0_106 = arith.constant 0 : index
    %350 = vector.load %arg11[%c24_105, %c0_106] : memref<64x512xf32, #tpu.memory_space<vmem>>, vector<8x512xf32>
    %c0_107 = arith.constant 0 : index
    %c0_108 = arith.constant 0 : index
    %351 = vector.load %arg6[%c0_107, %c0_108] : memref<128x512xf32, #tpu.memory_space<vmem>>, vector<128x512xf32>
    %cst_109 = arith.constant dense<0.000000e+00> : vector<8x512xf32>
    %352 = tpu.matmul %348, %351, %cst_109 {dimension_numbers = #tpu.dot_dimension_numbers<[1], [0], [0], [1], [0, 0, 1, 1], [], []>} : vector<8x128xf32>, vector<128x512xf32>, vector<8x512xf32> -> vector<8x512xf32>
    %353 = arith.addf %350, %352 : vector<8x512xf32>
    %354 = vector.extract_strided_slice %353 {offsets = [0, 0], sizes = [8, 128], strides = [1, 1]} : vector<8x512xf32> to vector<8x128xf32>
    %355 = arith.negf %354 : vector<8x128xf32>
    %356 = math.exp %355 : vector<8x128xf32>
    %cst_110 = arith.constant 1.000000e+00 : f32
    %357 = vector.broadcast %cst_110 : f32 to vector<8x128xf32>
    %358 = arith.addf %357, %356 : vector<8x128xf32>
    %359 = arith.divf %357, %358 : vector<8x128xf32>
    %360 = vector.extract_strided_slice %353 {offsets = [0, 128], sizes = [8, 128], strides = [1, 1]} : vector<8x512xf32> to vector<8x128xf32>
    %361 = arith.negf %360 : vector<8x128xf32>
    %362 = math.exp %361 : vector<8x128xf32>
    %cst_111 = arith.constant 1.000000e+00 : f32
    %363 = vector.broadcast %cst_111 : f32 to vector<8x128xf32>
    %364 = arith.addf %363, %362 : vector<8x128xf32>
    %365 = arith.divf %363, %364 : vector<8x128xf32>
    %366 = vector.extract_strided_slice %353 {offsets = [0, 256], sizes = [8, 128], strides = [1, 1]} : vector<8x512xf32> to vector<8x128xf32>
    %367 = math.tanh %366 : vector<8x128xf32>
    %368 = vector.extract_strided_slice %353 {offsets = [0, 384], sizes = [8, 128], strides = [1, 1]} : vector<8x512xf32> to vector<8x128xf32>
    %369 = arith.negf %368 : vector<8x128xf32>
    %370 = math.exp %369 : vector<8x128xf32>
    %cst_112 = arith.constant 1.000000e+00 : f32
    %371 = vector.broadcast %cst_112 : f32 to vector<8x128xf32>
    %372 = arith.addf %371, %370 : vector<8x128xf32>
    %373 = arith.divf %371, %372 : vector<8x128xf32>
    %374 = arith.mulf %365, %346 : vector<8x128xf32>
    %375 = arith.mulf %359, %367 : vector<8x128xf32>
    %376 = arith.addf %374, %375 : vector<8x128xf32>
    %377 = math.tanh %376 : vector<8x128xf32>
    %378 = arith.mulf %373, %377 : vector<8x128xf32>
    %c24_113 = arith.constant 24 : index
    %c0_114 = arith.constant 0 : index
    %379 = vector.load %arg12[%c24_113, %c0_114] : memref<64x128xf32, #tpu.memory_space<vmem>>, vector<8x128xf32>
    tpu.vector_store %arg12[%c24_113, %c0_114], %378 {strides = array<i32>} : memref<64x128xf32, #tpu.memory_space<vmem>>, vector<8x128xf32>,
    %c32_115 = arith.constant 32 : index
    %c0_116 = arith.constant 0 : index
    %380 = vector.load %arg11[%c32_115, %c0_116] : memref<64x512xf32, #tpu.memory_space<vmem>>, vector<8x512xf32>
    %c0_117 = arith.constant 0 : index
    %c0_118 = arith.constant 0 : index
    %381 = vector.load %arg6[%c0_117, %c0_118] : memref<128x512xf32, #tpu.memory_space<vmem>>, vector<128x512xf32>
    %cst_119 = arith.constant dense<0.000000e+00> : vector<8x512xf32>
    %382 = tpu.matmul %378, %381, %cst_119 {dimension_numbers = #tpu.dot_dimension_numbers<[1], [0], [0], [1], [0, 0, 1, 1], [], []>} : vector<8x128xf32>, vector<128x512xf32>, vector<8x512xf32> -> vector<8x512xf32>
    %383 = arith.addf %380, %382 : vector<8x512xf32>
    %384 = vector.extract_strided_slice %383 {offsets = [0, 0], sizes = [8, 128], strides = [1, 1]} : vector<8x512xf32> to vector<8x128xf32>
    %385 = arith.negf %384 : vector<8x128xf32>
    %386 = math.exp %385 : vector<8x128xf32>
    %cst_120 = arith.constant 1.000000e+00 : f32
    %387 = vector.broadcast %cst_120 : f32 to vector<8x128xf32>
    %388 = arith.addf %387, %386 : vector<8x128xf32>
    %389 = arith.divf %387, %388 : vector<8x128xf32>
    %390 = vector.extract_strided_slice %383 {offsets = [0, 128], sizes = [8, 128], strides = [1, 1]} : vector<8x512xf32> to vector<8x128xf32>
    %391 = arith.negf %390 : vector<8x128xf32>
    %392 = math.exp %391 : vector<8x128xf32>
    %cst_121 = arith.constant 1.000000e+00 : f32
    %393 = vector.broadcast %cst_121 : f32 to vector<8x128xf32>
    %394 = arith.addf %393, %392 : vector<8x128xf32>
    %395 = arith.divf %393, %394 : vector<8x128xf32>
    %396 = vector.extract_strided_slice %383 {offsets = [0, 256], sizes = [8, 128], strides = [1, 1]} : vector<8x512xf32> to vector<8x128xf32>
    %397 = math.tanh %396 : vector<8x128xf32>
    %398 = vector.extract_strided_slice %383 {offsets = [0, 384], sizes = [8, 128], strides = [1, 1]} : vector<8x512xf32> to vector<8x128xf32>
    %399 = arith.negf %398 : vector<8x128xf32>
    %400 = math.exp %399 : vector<8x128xf32>
    %cst_122 = arith.constant 1.000000e+00 : f32
    %401 = vector.broadcast %cst_122 : f32 to vector<8x128xf32>
    %402 = arith.addf %401, %400 : vector<8x128xf32>
    %403 = arith.divf %401, %402 : vector<8x128xf32>
    %404 = arith.mulf %395, %376 : vector<8x128xf32>
    %405 = arith.mulf %389, %397 : vector<8x128xf32>
    %406 = arith.addf %404, %405 : vector<8x128xf32>
    %407 = math.tanh %406 : vector<8x128xf32>
    %408 = arith.mulf %403, %407 : vector<8x128xf32>
    %c32_123 = arith.constant 32 : index
    %c0_124 = arith.constant 0 : index
    %409 = vector.load %arg12[%c32_123, %c0_124] : memref<64x128xf32, #tpu.memory_space<vmem>>, vector<8x128xf32>
    tpu.vector_store %arg12[%c32_123, %c0_124], %408 {strides = array<i32>} : memref<64x128xf32, #tpu.memory_space<vmem>>, vector<8x128xf32>,
    %c40_125 = arith.constant 40 : index
    %c0_126 = arith.constant 0 : index
    %410 = vector.load %arg11[%c40_125, %c0_126] : memref<64x512xf32, #tpu.memory_space<vmem>>, vector<8x512xf32>
    %c0_127 = arith.constant 0 : index
    %c0_128 = arith.constant 0 : index
    %411 = vector.load %arg6[%c0_127, %c0_128] : memref<128x512xf32, #tpu.memory_space<vmem>>, vector<128x512xf32>
    %cst_129 = arith.constant dense<0.000000e+00> : vector<8x512xf32>
    %412 = tpu.matmul %408, %411, %cst_129 {dimension_numbers = #tpu.dot_dimension_numbers<[1], [0], [0], [1], [0, 0, 1, 1], [], []>} : vector<8x128xf32>, vector<128x512xf32>, vector<8x512xf32> -> vector<8x512xf32>
    %413 = arith.addf %410, %412 : vector<8x512xf32>
    %414 = vector.extract_strided_slice %413 {offsets = [0, 0], sizes = [8, 128], strides = [1, 1]} : vector<8x512xf32> to vector<8x128xf32>
    %415 = arith.negf %414 : vector<8x128xf32>
    %416 = math.exp %415 : vector<8x128xf32>
    %cst_130 = arith.constant 1.000000e+00 : f32
    %417 = vector.broadcast %cst_130 : f32 to vector<8x128xf32>
    %418 = arith.addf %417, %416 : vector<8x128xf32>
    %419 = arith.divf %417, %418 : vector<8x128xf32>
    %420 = vector.extract_strided_slice %413 {offsets = [0, 128], sizes = [8, 128], strides = [1, 1]} : vector<8x512xf32> to vector<8x128xf32>
    %421 = arith.negf %420 : vector<8x128xf32>
    %422 = math.exp %421 : vector<8x128xf32>
    %cst_131 = arith.constant 1.000000e+00 : f32
    %423 = vector.broadcast %cst_131 : f32 to vector<8x128xf32>
    %424 = arith.addf %423, %422 : vector<8x128xf32>
    %425 = arith.divf %423, %424 : vector<8x128xf32>
    %426 = vector.extract_strided_slice %413 {offsets = [0, 256], sizes = [8, 128], strides = [1, 1]} : vector<8x512xf32> to vector<8x128xf32>
    %427 = math.tanh %426 : vector<8x128xf32>
    %428 = vector.extract_strided_slice %413 {offsets = [0, 384], sizes = [8, 128], strides = [1, 1]} : vector<8x512xf32> to vector<8x128xf32>
    %429 = arith.negf %428 : vector<8x128xf32>
    %430 = math.exp %429 : vector<8x128xf32>
    %cst_132 = arith.constant 1.000000e+00 : f32
    %431 = vector.broadcast %cst_132 : f32 to vector<8x128xf32>
    %432 = arith.addf %431, %430 : vector<8x128xf32>
    %433 = arith.divf %431, %432 : vector<8x128xf32>
    %434 = arith.mulf %425, %406 : vector<8x128xf32>
    %435 = arith.mulf %419, %427 : vector<8x128xf32>
    %436 = arith.addf %434, %435 : vector<8x128xf32>
    %437 = math.tanh %436 : vector<8x128xf32>
    %438 = arith.mulf %433, %437 : vector<8x128xf32>
    %c40_133 = arith.constant 40 : index
    %c0_134 = arith.constant 0 : index
    %439 = vector.load %arg12[%c40_133, %c0_134] : memref<64x128xf32, #tpu.memory_space<vmem>>, vector<8x128xf32>
    tpu.vector_store %arg12[%c40_133, %c0_134], %438 {strides = array<i32>} : memref<64x128xf32, #tpu.memory_space<vmem>>, vector<8x128xf32>,
    %c48_135 = arith.constant 48 : index
    %c0_136 = arith.constant 0 : index
    %440 = vector.load %arg11[%c48_135, %c0_136] : memref<64x512xf32, #tpu.memory_space<vmem>>, vector<8x512xf32>
    %c0_137 = arith.constant 0 : index
    %c0_138 = arith.constant 0 : index
    %441 = vector.load %arg6[%c0_137, %c0_138] : memref<128x512xf32, #tpu.memory_space<vmem>>, vector<128x512xf32>
    %cst_139 = arith.constant dense<0.000000e+00> : vector<8x512xf32>
    %442 = tpu.matmul %438, %441, %cst_139 {dimension_numbers = #tpu.dot_dimension_numbers<[1], [0], [0], [1], [0, 0, 1, 1], [], []>} : vector<8x128xf32>, vector<128x512xf32>, vector<8x512xf32> -> vector<8x512xf32>
    %443 = arith.addf %440, %442 : vector<8x512xf32>
    %444 = vector.extract_strided_slice %443 {offsets = [0, 0], sizes = [8, 128], strides = [1, 1]} : vector<8x512xf32> to vector<8x128xf32>
    %445 = arith.negf %444 : vector<8x128xf32>
    %446 = math.exp %445 : vector<8x128xf32>
    %cst_140 = arith.constant 1.000000e+00 : f32
    %447 = vector.broadcast %cst_140 : f32 to vector<8x128xf32>
    %448 = arith.addf %447, %446 : vector<8x128xf32>
    %449 = arith.divf %447, %448 : vector<8x128xf32>
    %450 = vector.extract_strided_slice %443 {offsets = [0, 128], sizes = [8, 128], strides = [1, 1]} : vector<8x512xf32> to vector<8x128xf32>
    %451 = arith.negf %450 : vector<8x128xf32>
    %452 = math.exp %451 : vector<8x128xf32>
    %cst_141 = arith.constant 1.000000e+00 : f32
    %453 = vector.broadcast %cst_141 : f32 to vector<8x128xf32>
    %454 = arith.addf %453, %452 : vector<8x128xf32>
    %455 = arith.divf %453, %454 : vector<8x128xf32>
    %456 = vector.extract_strided_slice %443 {offsets = [0, 256], sizes = [8, 128], strides = [1, 1]} : vector<8x512xf32> to vector<8x128xf32>
    %457 = math.tanh %456 : vector<8x128xf32>
    %458 = vector.extract_strided_slice %443 {offsets = [0, 384], sizes = [8, 128], strides = [1, 1]} : vector<8x512xf32> to vector<8x128xf32>
    %459 = arith.negf %458 : vector<8x128xf32>
    %460 = math.exp %459 : vector<8x128xf32>
    %cst_142 = arith.constant 1.000000e+00 : f32
    %461 = vector.broadcast %cst_142 : f32 to vector<8x128xf32>
    %462 = arith.addf %461, %460 : vector<8x128xf32>
    %463 = arith.divf %461, %462 : vector<8x128xf32>
    %464 = arith.mulf %455, %436 : vector<8x128xf32>
    %465 = arith.mulf %449, %457 : vector<8x128xf32>
    %466 = arith.addf %464, %465 : vector<8x128xf32>
    %467 = math.tanh %466 : vector<8x128xf32>
    %468 = arith.mulf %463, %467 : vector<8x128xf32>
    %c48_143 = arith.constant 48 : index
    %c0_144 = arith.constant 0 : index
    %469 = vector.load %arg12[%c48_143, %c0_144] : memref<64x128xf32, #tpu.memory_space<vmem>>, vector<8x128xf32>
    tpu.vector_store %arg12[%c48_143, %c0_144], %468 {strides = array<i32>} : memref<64x128xf32, #tpu.memory_space<vmem>>, vector<8x128xf32>,
    %c56_145 = arith.constant 56 : index
    %c0_146 = arith.constant 0 : index
    %470 = vector.load %arg11[%c56_145, %c0_146] : memref<64x512xf32, #tpu.memory_space<vmem>>, vector<8x512xf32>
    %c0_147 = arith.constant 0 : index
    %c0_148 = arith.constant 0 : index
    %471 = vector.load %arg6[%c0_147, %c0_148] : memref<128x512xf32, #tpu.memory_space<vmem>>, vector<128x512xf32>
    %cst_149 = arith.constant dense<0.000000e+00> : vector<8x512xf32>
    %472 = tpu.matmul %468, %471, %cst_149 {dimension_numbers = #tpu.dot_dimension_numbers<[1], [0], [0], [1], [0, 0, 1, 1], [], []>} : vector<8x128xf32>, vector<128x512xf32>, vector<8x512xf32> -> vector<8x512xf32>
    %473 = arith.addf %470, %472 : vector<8x512xf32>
    %474 = vector.extract_strided_slice %473 {offsets = [0, 0], sizes = [8, 128], strides = [1, 1]} : vector<8x512xf32> to vector<8x128xf32>
    %475 = arith.negf %474 : vector<8x128xf32>
    %476 = math.exp %475 : vector<8x128xf32>
    %cst_150 = arith.constant 1.000000e+00 : f32
    %477 = vector.broadcast %cst_150 : f32 to vector<8x128xf32>
    %478 = arith.addf %477, %476 : vector<8x128xf32>
    %479 = arith.divf %477, %478 : vector<8x128xf32>
    %480 = vector.extract_strided_slice %473 {offsets = [0, 128], sizes = [8, 128], strides = [1, 1]} : vector<8x512xf32> to vector<8x128xf32>
    %481 = arith.negf %480 : vector<8x128xf32>
    %482 = math.exp %481 : vector<8x128xf32>
    %cst_151 = arith.constant 1.000000e+00 : f32
    %483 = vector.broadcast %cst_151 : f32 to vector<8x128xf32>
    %484 = arith.addf %483, %482 : vector<8x128xf32>
    %485 = arith.divf %483, %484 : vector<8x128xf32>
    %486 = vector.extract_strided_slice %473 {offsets = [0, 256], sizes = [8, 128], strides = [1, 1]} : vector<8x512xf32> to vector<8x128xf32>
    %487 = math.tanh %486 : vector<8x128xf32>
    %488 = vector.extract_strided_slice %473 {offsets = [0, 384], sizes = [8, 128], strides = [1, 1]} : vector<8x512xf32> to vector<8x128xf32>
    %489 = arith.negf %488 : vector<8x128xf32>
    %490 = math.exp %489 : vector<8x128xf32>
    %cst_152 = arith.constant 1.000000e+00 : f32
    %491 = vector.broadcast %cst_152 : f32 to vector<8x128xf32>
    %492 = arith.addf %491, %490 : vector<8x128xf32>
    %493 = arith.divf %491, %492 : vector<8x128xf32>
    %494 = arith.mulf %485, %466 : vector<8x128xf32>
    %495 = arith.mulf %479, %487 : vector<8x128xf32>
    %496 = arith.addf %494, %495 : vector<8x128xf32>
    %497 = math.tanh %496 : vector<8x128xf32>
    %498 = arith.mulf %493, %497 : vector<8x128xf32>
    %c56_153 = arith.constant 56 : index
    %c0_154 = arith.constant 0 : index
    %499 = vector.load %arg12[%c56_153, %c0_154] : memref<64x128xf32, #tpu.memory_space<vmem>>, vector<8x128xf32>
    tpu.vector_store %arg12[%c56_153, %c0_154], %498 {strides = array<i32>} : memref<64x128xf32, #tpu.memory_space<vmem>>, vector<8x128xf32>,
    %c0_155 = arith.constant 0 : index
    %c0_156 = arith.constant 0 : index
    %500 = vector.load %arg12[%c0_155, %c0_156] : memref<64x128xf32, #tpu.memory_space<vmem>>, vector<64x128xf32>
    %501 = arith.truncf %500 : vector<64x128xf32> to vector<64x128xbf16>
    %c0_157 = arith.constant 0 : index
    %c0_158 = arith.constant 0 : index
    %502 = vector.load %arg8[%c0_157, %c0_158] : memref<128x128xbf16, #tpu.memory_space<vmem>>, vector<128x128xbf16>
    %cst_159 = arith.constant dense<0.000000e+00> : vector<64x128xf32>
    %503 = tpu.matmul %501, %502, %cst_159 {dimension_numbers = #tpu.dot_dimension_numbers<[1], [0], [0], [1], [0, 0, 1, 1], [], []>} : vector<64x128xbf16>, vector<128x128xbf16>, vector<64x128xf32> -> vector<64x128xf32>
    %c0_160 = arith.constant 0 : index
    %c0_161 = arith.constant 0 : index
    %504 = vector.load %arg9[%c0_160, %c0_161] : memref<1x128xf32, #tpu.memory_space<vmem>>, vector<1x128xf32>
    %505 = vector.broadcast %504 : vector<1x128xf32> to vector<64x128xf32>
    %506 = arith.addf %503, %505 : vector<64x128xf32>
    %cst_162 = arith.constant dense<0xFF800000> : vector<64xf32>
    %507 = vector.multi_reduction <maximumf>, %506, %cst_162 [1] : vector<64x128xf32> to vector<64xf32>
    %508 = vector.shape_cast %507 : vector<64xf32> to vector<64x1xf32>
    %509 = vector.broadcast %508 : vector<64x1xf32> to vector<64x128xf32>
    %510 = arith.subf %506, %509 : vector<64x128xf32>
    %511 = math.exp %510 : vector<64x128xf32>
    %cst_163 = arith.constant dense<0.000000e+00> : vector<64xf32>
    %512 = vector.multi_reduction <add>, %511, %cst_163 [1] : vector<64x128xf32> to vector<64xf32>
    %513 = vector.shape_cast %512 : vector<64xf32> to vector<64x1xf32>
    %514 = math.log %513 : vector<64x1xf32>
    %515 = arith.addf %514, %508 : vector<64x1xf32>
    %516 = vector.broadcast %515 : vector<64x1xf32> to vector<64x128xf32>
    %517 = arith.subf %506, %516 : vector<64x128xf32>
    %c0_164 = arith.constant 0 : index
    %c0_165 = arith.constant 0 : index
    %518 = vector.load %arg10[%c0_164, %c0_165] : memref<64x128xf32, #tpu.memory_space<vmem>>, vector<64x128xf32>
    tpu.vector_store %arg10[%c0_164, %c0_165], %517 {strides = array<i32>} : memref<64x128xf32, #tpu.memory_space<vmem>>, vector<64x128xf32>,
    return
  }
}

</mosaic_0001>

<bundles_post_ra>
// kernel: _lambda_.1
= control target key start
LH: loop header
LB: loop body
LE: loop exit
PB: predicated region body
PF: predicated region fallthrough
CT: control target
= control target key end

     0   :  { %v8503_v0 = vmov 0   ;;  %v8505_v30 = vmov 0.0   ;;  %s8488_s0 = inlined_call_operand.vmem [shape: s32[64,1], index: 0, kind: input, shape index: {}]   ;;  %s8489_s2 = inlined_call_operand.vmem [shape: bf16[128,512], index: 2, kind: input, shape index: {}]   ;;  %s8490_s3 = inlined_call_operand.vmem [shape: f32[128,512], index: 3, kind: input, shape index: {}]   ;;  %s8491_s1 = inlined_call_operand.vmem [shape: s32[64,1], index: 1, kind: input, shape index: {}]   ;;  %s8492_s4 = inlined_call_operand.vmem [shape: f32[1,512], index: 4, kind: input, shape index: {}]   ;;  %s8493_s5 = inlined_call_operand.vmem [shape: bf16[128,512], index: 5, kind: input, shape index: {}]   ;;  %s8494_s6 = inlined_call_operand.vmem [shape: f32[128,512], index: 6, kind: input, shape index: {}]   ;;  %s8495_s7 = inlined_call_operand.vmem [shape: f32[1,512], index: 7, kind: input, shape index: {}]   ;;  %s8496_s8 = inlined_call_operand.vmem [shape: bf16[128,128], index: 8, kind: input, shape index: {}]   ;;  %s8497_s9 = inlined_call_operand.vmem [shape: f32[1,128], index: 9, kind: input, shape index: {}]   ;;  %s8498_s10 = inlined_call_operand.vmem [shape: f32[64,128], index: 10, kind: output, shape index: {}]  }
   0x1   :  { %5791 = vset.pattern.permute.xlu1 %v8503_v0  ;;  %5790 = vset.pattern.permute.xlu0 %v8503_v0  ;;  %v38_v1 = vld [vmem:[%s8488_s0 + $0x10] sm:$0xff]  ;;  %v36_v2 = vld [vmem:[%s8488_s0] sm:$0xff]  ;;  %v39_v3 = vld [vmem:[%s8488_s0 + $0x18] sm:$0xff] }
   0x2   :  { %53 = vperm.xlu1 %5791, %v38_v1   ;;  %47 = vperm.xlu0 %5790, %v36_v2   ;;  %v37_v4 = vld [vmem:[%s8488_s0 + $0x8] sm:$0xff]  ;;  %v40_v6 = vld [vmem:[%s8488_s0 + $0x20] sm:$0xff]  ;;  %v43_v11 = vld [vmem:[%s8488_s0 + $0x38] sm:$0xff] }
   0x3   :  { %344 = vmatprep.mubr.bf16.mxu1 %v8503_v0  ;;  %v41_v5 = vld [vmem:[%s8488_s0 + $0x28] sm:$0xff]  ;;  %v5792_v7 = vld [vmem:[%s8489_s2 + $0x4] ss:$16 sps:$4 sm:$0xff]   ;;  %v5794_v8 = vld [vmem:[%s8489_s2] ss:$16 sps:$4 sm:$0xff]   ;;  %622 = vmatprep.mubr.f32.mxu0 %v8505_v30 }
   0x4   :  { %v495_v9 = vld [vmem:[%s8490_s3 + $0x8] sm:$0xff]  ;;  %312 = vmatprep.subr.bf16.mxu1 %v5792_v7  ;;  %v5795_v13 = vld [vmem:[%s8489_s2 + $0x24] ss:$16 sps:$4 sm:$0xff]   ;;  %v5797_v20 = vld [vmem:[%s8489_s2 + $0x20] ss:$16 sps:$4 sm:$0xff]  }
   0x5   :  { %v499_v10 = vld [vmem:[%s8490_s3 + $0x28] sm:$0xff]  ;;  %v494_v14 = vld [vmem:[%s8490_s3] sm:$0xff]  ;;  %v42_v16 = vld [vmem:[%s8488_s0 + $0x30] sm:$0xff]  ;;  %313 = vmatpush1.bf16.msra.mxu1 %v5794_v8 }
   0x6   :  { %56 = vperm.xlu1 %5791, %v39_v3   ;;  %50 = vperm.xlu0 %5790, %v37_v4   ;;  %v6278_v12 = vpack.c.bf16 %v499_v10, %v495_v9  ;;  %v498_v15 = vld [vmem:[%s8490_s3 + $0x20] sm:$0xff]  ;;  %v503_v18 = vld [vmem:[%s8490_s3 + $0x48] sm:$0xff]  ;;  %v1949_v39 = vld [vmem:[%s8491_s1 + $0x18] sm:$0xff] }
   0x7   :  { %v6292_v17 = vpack.c.bf16 %v498_v15, %v494_v14  ;;  %v507_v19 = vld [vmem:[%s8490_s3 + $0x68] sm:$0xff]  ;;  %314 = vmatprep.subr.bf16.mxu1 %v5795_v13  ;;  %v5798_v22 = vld [vmem:[%s8489_s2 + $0x44] ss:$16 sps:$4 sm:$0xff]   ;;  %v5800_v31 = vld [vmem:[%s8489_s2 + $0x40] ss:$16 sps:$4 sm:$0xff]  }
   0x8   :  { %4764 = vmatprep.subr.bf16.mxu0 %v6278_v12  ;;  %v6304_v21 = vpack.c.bf16 %v507_v19, %v503_v18  ;;  %v502_v23 = vld [vmem:[%s8490_s3 + $0x40] sm:$0xff]  ;;  %v1947_v25 = vld [vmem:[%s8491_s1 + $0x8] sm:$0xff]  ;;  %v1948_v43 = vld [vmem:[%s8491_s1 + $0x10] sm:$0xff] }
   0x9   :  { %4766 = vmatpush1.bf16.msra.mxu0 %v6292_v17  ;;  %v506_v24 = vld [vmem:[%s8490_s3 + $0x60] sm:$0xff]  ;;  %v511_v28 = vld [vmem:[%s8490_s3 + $0x88] sm:$0xff]  ;;  %315 = vmatpush1.bf16.msra.mxu1 %v5797_v20  ;;  %v1953_v59 = vld [vmem:[%s8491_s1 + $0x38] sm:$0xff] }
   0xa   :  { %62 = vperm.xlu1 %5791, %v41_v5   ;;  %59 = vperm.xlu0 %5790, %v40_v6   ;;  %v1946_v26 = vld [vmem:[%s8491_s1] sm:$0xff]  ;;  %v6323_v27 = vpack.c.bf16 %v506_v24, %v502_v23  ;;  %v515_v29 = vld [vmem:[%s8490_s3 + $0xa8] sm:$0xff]  ;;  %v1952_v63 = vld [vmem:[%s8491_s1 + $0x30] sm:$0xff]  ;;  %v44_v23 = vlaneseq }
   0xb   :  { %4768 = vmatprep.subr.bf16.mxu0 %v6304_v21  ;;  %v6335_v32 = vpack.c.bf16 %v515_v29, %v511_v28  ;;  %v510_v33 = vld [vmem:[%s8490_s3 + $0x80] sm:$0xff]  ;;  %v519_v36 = vld [vmem:[%s8490_s3 + $0xc8] sm:$0xff]  ;;  %316 = vmatprep.subr.bf16.mxu1 %v5798_v22 }
   0xc   :  { %v5801_v34 = vld [vmem:[%s8489_s2 + $0x64] ss:$16 sps:$4 sm:$0xff]   ;;  %v523_v38 = vld [vmem:[%s8490_s3 + $0xe8] sm:$0xff]  ;;  %v5803_v46 = vld [vmem:[%s8489_s2 + $0x60] ss:$16 sps:$4 sm:$0xff]  }
   0xd   :  { %v514_v35 = vld [vmem:[%s8490_s3 + $0xa0] sm:$0xff]  ;;  %4770 = vmatpush1.bf16.msra.mxu0 %v6323_v27  ;;  %v6359_v40 = vpack.c.bf16 %v523_v38, %v519_v36  ;;  %v527_v44 = vld [vmem:[%s8490_s3 + $0x108] sm:$0xff]  ;;  %317 = vmatpush1.bf16.msra.mxu1 %v5800_v31 }
   0xe   :  { %68 = vperm.xlu1 %5791, %v43_v11   ;;  %65 = vperm.xlu0 %5790, %v42_v16   ;;  %v6350_v37 = vpack.c.bf16 %v514_v35, %v510_v33  ;;  %v518_v41 = vld [vmem:[%s8490_s3 + $0xc0] sm:$0xff]  ;;  %v531_v45 = vld [vmem:[%s8490_s3 + $0x128] sm:$0xff]  ;;  %v520_v33 = vld [vmem:[%s8490_s3 + $0xd0] sm:$0xff] }
   0xf   :  { %4772 = vmatprep.subr.bf16.mxu0 %v6335_v32  ;;  %v522_v42 = vld [vmem:[%s8490_s3 + $0xe0] sm:$0xff]  ;;  %318 = vmatprep.subr.bf16.mxu1 %v5801_v34  ;;  %v6386_v49 = vpack.c.bf16 %v531_v45, %v527_v44  ;;  %v535_v52 = vld [vmem:[%s8490_s3 + $0x148] sm:$0xff]  ;;  %v8501_v34 = vmov 1.0|1.0  }
  0x10   :  { %v5804_v47 = vld [vmem:[%s8489_s2 + $0x84] ss:$16 sps:$4 sm:$0xff]   ;;  %v6383_v48 = vpack.c.bf16 %v522_v42, %v518_v41  ;;  %v539_v53 = vld [vmem:[%s8490_s3 + $0x168] sm:$0xff]  ;;  %v5806_v56 = vld [vmem:[%s8489_s2 + $0x80] ss:$16 sps:$4 sm:$0xff]  }
  0x11   :  { %4774 = vmatpush1.bf16.msra.mxu0 %v6350_v37  ;;  %v526_v50 = vld [vmem:[%s8490_s3 + $0x100] sm:$0xff]  ;;  %v1951_v54 = vld [vmem:[%s8491_s1 + $0x28] sm:$0xff]  ;;  %319 = vmatpush1.bf16.msra.mxu1 %v5803_v46  ;;  %v6419_v60 = vpack.c.bf16 %v539_v53, %v535_v52  ;;  %v537_v42 = vld [vmem:[%s8490_s3 + $0x158] sm:$0xff] }
  0x12   :  { %1958 = vperm.xlu1 %5791, %v1947_v25   ;;  %1955 = vperm.xlu0 %5790, %v1946_v26   ;;  %v530_v51 = vld [vmem:[%s8490_s3 + $0x120] sm:$0xff]  ;;  %v543_v1 = vld [vmem:[%s8490_s3 + $0x188] sm:$0xff]  ;;  %v6509_v25 = vand.u32 127, %v44_v23 }
  0x13   :  { %4776 = vmatprep.subr.bf16.mxu0 %v6359_v40  ;;  %v1950_v55 = vld [vmem:[%s8491_s1 + $0x20] sm:$0xff]  ;;  %320 = vmatprep.subr.bf16.mxu1 %v5804_v47  ;;  %v6413_v58 = vpack.c.bf16 %v530_v51, %v526_v50  ;;  %v547_v2 = vld [vmem:[%s8490_s3 + $0x1a8] sm:$0xff]  ;;  %v553_v51 = vld [vmem:[%s8490_s3 + $0x1d8] sm:$0xff] }
  0x14   :  { %v5807_v57 = vld [vmem:[%s8489_s2 + $0xa4] ss:$16 sps:$4 sm:$0xff]   ;;  %v5809_v3 = vld [vmem:[%s8489_s2 + $0xa0] ss:$16 sps:$4 sm:$0xff]   ;;  %v6452_v8 = vpack.c.bf16 %v547_v2, %v543_v1  ;;  %v551_v9 = vld [vmem:[%s8490_s3 + $0x1c8] sm:$0xff]  ;;  %8513 = vst [vmem:[#allocation4_spill] sm:$0xff] %v6509_v25 }
  0x15   :  { %4778 = vmatpush1.bf16.msra.mxu0 %v6383_v48  ;;  %v534_v61 = vld [vmem:[%s8490_s3 + $0x140] sm:$0xff]  ;;  %321 = vmatpush1.bf16.msra.mxu1 %v5806_v56  ;;  %v555_v10 = vld [vmem:[%s8490_s3 + $0x1e8] sm:$0xff]  ;;  %v496_v2 = vld [vmem:[%s8490_s3 + $0x10] sm:$0xff] }
  0x16   :  { %1964 = vperm.xlu1 %5791, %v1949_v39   ;;  %1961 = vperm.xlu0 %5790, %v1948_v43   ;;  %v538_v62 = vld [vmem:[%s8490_s3 + $0x160] sm:$0xff]  ;;  %v6473_v16 = vpack.c.bf16 %v555_v10, %v551_v9  ;;  %v5818_v20 = vld [vmem:[%s8489_s2 + $0xc] ss:$16 sps:$4 sm:$0xff]   ;;  %v5816_v29 = vld [vmem:[%s8489_s2 + $0x8] ss:$16 sps:$4 sm:$0xff]  }
  0x17   :  { %4780 = vmatprep.subr.bf16.mxu0 %v6386_v49  ;;  %322 = vmatprep.subr.bf16.mxu1 %v5807_v57  ;;  %v5810_v4 = vld [vmem:[%s8489_s2 + $0xc4] ss:$16 sps:$4 sm:$0xff]   ;;  %v6443_v5 = vpack.c.bf16 %v538_v62, %v534_v61  ;;  %v5812_v11 = vld [vmem:[%s8489_s2 + $0xc0] ss:$16 sps:$4 sm:$0xff]   ;;  %v5821_v31 = vld [vmem:[%s8489_s2 + $0x2c] ss:$16 sps:$4 sm:$0xff]  }
  0x18   :  { %v542_v6 = vld [vmem:[%s8490_s3 + $0x180] sm:$0xff]  ;;  %v5819_v35 = vld [vmem:[%s8489_s2 + $0x28] ss:$16 sps:$4 sm:$0xff]   ;;  %v5824_v36 = vld [vmem:[%s8489_s2 + $0x4c] ss:$16 sps:$4 sm:$0xff]  }
  0x19   :  { %4782 = vmatpush1.bf16.msra.mxu0 %v6413_v58  ;;  %v546_v7 = vld [vmem:[%s8490_s3 + $0x1a0] sm:$0xff]  ;;  %323 = vmatpush1.bf16.msra.mxu1 %v5809_v3  ;;  %v5822_v39 = vld [vmem:[%s8489_s2 + $0x48] ss:$16 sps:$4 sm:$0xff]   ;;  %v5827_v41 = vld [vmem:[%s8489_s2 + $0x6c] ss:$16 sps:$4 sm:$0xff]  }
  0x1a   :  { %1970 = vperm.xlu1 %5791, %v1951_v54   ;;  %1967 = vperm.xlu0 %5790, %v1950_v55   ;;  %v5813_v13 = vld [vmem:[%s8489_s2 + $0xe4] ss:$16 sps:$4 sm:$0xff]   ;;  %v6467_v14 = vpack.c.bf16 %v546_v7, %v542_v6  ;;  %v5815_v19 = vld [vmem:[%s8489_s2 + $0xe0] ss:$16 sps:$4 sm:$0xff]   ;;  %v5825_v45 = vld [vmem:[%s8489_s2 + $0x68] ss:$16 sps:$4 sm:$0xff]  }
  0x1b   :  { %4784 = vmatprep.subr.bf16.mxu0 %v6419_v60  ;;  %324 = vmatprep.subr.bf16.mxu1 %v5810_v4  ;;  %v550_v15 = vld [vmem:[%s8490_s3 + $0x1c0] sm:$0xff]  ;;  %v5830_v46 = vld [vmem:[%s8489_s2 + $0x8c] ss:$16 sps:$4 sm:$0xff]   ;;  %v5828_v47 = vld [vmem:[%s8489_s2 + $0x88] ss:$16 sps:$4 sm:$0xff]  }
  0x1c   :  { %v554_v18 = vld [vmem:[%s8490_s3 + $0x1e0] sm:$0xff]  ;;  %v5833_v50 = vld [vmem:[%s8489_s2 + $0xac] ss:$16 sps:$4 sm:$0xff]   ;;  %v5831_v54 = vld [vmem:[%s8489_s2 + $0xa8] ss:$16 sps:$4 sm:$0xff]  }
  0x1d   :  { %4786 = vmatpush1.bf16.msra.mxu0 %v6443_v5  ;;  %325 = vmatpush1.bf16.msra.mxu1 %v5812_v11  ;;  %v6485_v22 = vpack.c.bf16 %v554_v18, %v550_v15  ;;  %v5836_v55 = vld [vmem:[%s8489_s2 + $0xcc] ss:$16 sps:$4 sm:$0xff]   ;;  %v5834_v56 = vld [vmem:[%s8489_s2 + $0xc8] ss:$16 sps:$4 sm:$0xff]   ;;  %v500_v3 = vld [vmem:[%s8490_s3 + $0x30] sm:$0xff] }
  0x1e   :  { %1976 = vperm.xlu1 %5791, %v1953_v59   ;;  %1973 = vperm.xlu0 %5790, %v1952_v63   ;;  %v5839_v57 = vld [vmem:[%s8489_s2 + $0xec] ss:$16 sps:$4 sm:$0xff]   ;;  %v5837_v63 = vld [vmem:[%s8489_s2 + $0xe8] ss:$16 sps:$4 sm:$0xff]   ;;  %v6616_v7 = vpack.c.bf16 %v500_v3, %v496_v2  ;;  %v504_v10 = vld [vmem:[%s8490_s3 + $0x50] sm:$0xff] }
  0x1f   :  { %4788 = vmatprep.subr.bf16.mxu0 %v6452_v8  ;;  %326 = vmatprep.subr.bf16.mxu1 %v5813_v13  ;;  %v497_v61 = vld [vmem:[%s8490_s3 + $0x18] sm:$0xff]  ;;  %v508_v11 = vld [vmem:[%s8490_s3 + $0x70] sm:$0xff] }
  0x20   :  { %v501_v62 = vld [vmem:[%s8490_s3 + $0x38] sm:$0xff]  ;;  %v6637_v18 = vpack.c.bf16 %v508_v11, %v504_v10  ;;  %v552_v3 = vld [vmem:[%s8490_s3 + $0x1d0] sm:$0xff]  ;;  %v6776_v11 = vshrl.u32 %v44_v23, 7 }
  0x21   :  { %4790 = vmatpush1.bf16.msra.mxu0 %v6467_v14  ;;  %327 = vmatpush1.bf16.msra.mxu1 %v5815_v19  ;;  %v6602_v1 = vpack.c.bf16 %v501_v62, %v497_v61  ;;  %v505_v4 = vld [vmem:[%s8490_s3 + $0x58] sm:$0xff]  ;;  %v548_v61 = vld [vmem:[%s8490_s3 + $0x1b0] sm:$0xff] }
  0x22   :  { %4792 = vmatprep.subr.bf16.mxu0 %v6473_v16  ;;  %385 = vmatprep.subr.bf16.mxu1 %v5818_v20  ;;  %v509_v6 = vld [vmem:[%s8490_s3 + $0x78] sm:$0xff]  ;;  %v512_v20 = vld [vmem:[%s8490_s3 + $0x90] sm:$0xff]  ;;  %8522 = vst [vmem:[#allocation5_spill] sm:$0xff] %v6776_v11 }
  0x23   :  { %v6619_v9 = vpack.c.bf16 %v509_v6, %v505_v4  ;;  %v513_v13 = vld [vmem:[%s8490_s3 + $0x98] sm:$0xff]  ;;  %v556_v4 = vld [vmem:[%s8490_s3 + $0x1f0] sm:$0xff] }
  0x24   :  { %v517_v15 = vld [vmem:[%s8490_s3 + $0xb8] sm:$0xff]  ;;  %v6751_v6 = vpack.c.bf16 %v556_v4, %v552_v3 }
  0x25   :  { %4794 = vmatpush1.bf16.msra.mxu0 %v6485_v22  ;;  %v6641_v19 = vpack.c.bf16 %v517_v15, %v513_v13  ;;  %v557_v62 = vld [vmem:[%s8490_s3 + $0x1f8] sm:$0xff]  ;;  %v8500_v13 = vsub.s32 0, %v6776_v11  ;;  %v130_v15 = vld [vmem:[%s8492_s4] sm:$0xf] }
  0x26   :  { %4828 = vmatprep.subr.bf16.mxu0 %v6278_v12  ;;  %v6739_v2 = vpack.c.bf16 %v557_v62, %v553_v51 }
  0x28   :  { %623 = vmatmul.mubr.f32.vlgmr.msra.gmra.mrb[0].mxu0 %v8505_v30 }
  0x29   :  { %4830 = vmatpush1.bf16.msra.mxu0 %v6292_v17  ;;  %796 = vmatprep.mubr.f32.mxu0 %v8505_v30 }
  0x2a   :  { %4832 = vmatprep.subr.bf16.mxu0 %v6304_v21 }
  0x2d   :  { %4834 = vmatpush1.bf16.msra.mxu0 %v6323_v27 }
  0x2e   :  { %4836 = vmatprep.subr.bf16.mxu0 %v6335_v32 }
  0x31   :  { %4838 = vmatpush1.bf16.msra.mxu0 %v6350_v37 }
  0x32   :  { %4840 = vmatprep.subr.bf16.mxu0 %v6359_v40 }
  0x35   :  { %4842 = vmatpush1.bf16.msra.mxu0 %v6383_v48 }
  0x36   :  { %4844 = vmatprep.subr.bf16.mxu0 %v6386_v49 }
  0x39   :  { %4846 = vmatpush1.bf16.msra.mxu0 %v6413_v58 }
  0x3a   :  { %4848 = vmatprep.subr.bf16.mxu0 %v6419_v60 }
  0x3d   :  { %4850 = vmatpush1.bf16.msra.mxu0 %v6443_v5 }
  0x3e   :  { %4852 = vmatprep.subr.bf16.mxu0 %v6452_v8 }
  0x41   :  { %4854 = vmatpush1.bf16.msra.mxu0 %v6467_v14 }
  0x42   :  { %4856 = vmatprep.subr.bf16.mxu0 %v6473_v16 }
  0x45   :  { %4858 = vmatpush1.bf16.msra.mxu0 %v6485_v22 }
  0x46   :  { %4892 = vmatprep.subr.bf16.mxu0 %v6278_v12 }
  0x81   :  { %v48_v24 = vpop.permute.xlu0 %47  ;;  %v54_v28 = vpop.permute.xlu1 %53 }
  0x82   :  { %vm70_vm1 = vcmp.eq.s32.totalorder %v48_v24, %v6509_v25  ;;  %vm72_vm3 = vcmp.eq.s32.totalorder %v54_v28, %v6509_v25  ;;  %v516_v24 = vld [vmem:[%s8490_s3 + $0xb0] sm:$0xff]  ;;  %v525_v28 = vld [vmem:[%s8490_s3 + $0xf8] sm:$0xff] }
  0x85   :  { %v51_v26 = vpop.permute.xlu0 %50  ;;  %v57_v38 = vpop.permute.xlu1 %56 }
  0x86   :  { %vm71_vm0 = vcmp.eq.s32.totalorder %v51_v26, %v6509_v25  ;;  %vm73_vm4 = vcmp.eq.s32.totalorder %v57_v38, %v6509_v25  ;;  %v521_v26 = vld [vmem:[%s8490_s3 + $0xd8] sm:$0xff] }
  0x87   :  { %vm6519_vm2 = vmpackc.low %vm71_vm0, %vm70_vm1  ;;  %v533_v38 = vld [vmem:[%s8490_s3 + $0x138] sm:$0xff] }
  0x88   :  { %4599 = vmatmul.mubr.msk.bf16.vlgmr.msra.gmra.mrb[0].mxu1 %vm6519_vm2, %v8501_v34  ;;  %vm6541_vm5 = vmpackc.low %vm73_vm4, %vm72_vm3 }
  0x89   :  { %386 = vmatpush1.bf16.msra.mxu1 %v5816_v29  ;;  %354 = vmatprep.mubr.bf16.mxu1 %v8503_v0  ;;  %v63_v43 = vpop.permute.xlu1 %62  ;;  %v60_v44 = vpop.permute.xlu0 %59  ;;  %v6656_v29 = vpack.c.bf16 %v516_v24, %v512_v20  ;;  %v8499_v20 = vsub.s32 1, %v6776_v11  ;;  %v135_v24 = vrot.slane %v130_v15, %v8500_v13 }
  0x8a   :  { %387 = vmatprep.subr.bf16.mxu1 %v5821_v31  ;;  %vm75_vm6 = vcmp.eq.s32.totalorder %v63_v43, %v6509_v25  ;;  %vm74_vm7 = vcmp.eq.s32.totalorder %v60_v44, %v6509_v25  ;;  %v6659_v31 = vpack.c.bf16 %v525_v28, %v521_v26  ;;  %v528_v43 = vld [vmem:[%s8490_s3 + $0x110] sm:$0xff] }
  0x8b   :  { %vm6563_vm8 = vmpackc.low %vm75_vm6, %vm74_vm7  ;;  %v532_v44 = vld [vmem:[%s8490_s3 + $0x130] sm:$0xff]  ;;  %v139_v26 = vrot.slane %v130_v15, %v8499_v20 }
  0x8d   :  { %388 = vmatpush1.bf16.msra.mxu1 %v5819_v35  ;;  %v69_v52 = vpop.permute.xlu1 %68  ;;  %v66_v53 = vpop.permute.xlu0 %65  ;;  %v524_v35 = vld [vmem:[%s8490_s3 + $0xf0] sm:$0xff] }
  0x8e   :  { %389 = vmatprep.subr.bf16.mxu1 %v5824_v36  ;;  %vm77_vm9 = vcmp.eq.s32.totalorder %v69_v52, %v6509_v25  ;;  %vm76_vm10 = vcmp.eq.s32.totalorder %v66_v53, %v6509_v25  ;;  %v529_v36 = vld [vmem:[%s8490_s3 + $0x118] sm:$0xff]  ;;  %v540_v52 = vld [vmem:[%s8490_s3 + $0x170] sm:$0xff] }
  0x8f   :  { %vm6585_vm11 = vmpackc.low %vm77_vm9, %vm76_vm10  ;;  %v545_v53 = vld [vmem:[%s8490_s3 + $0x198] sm:$0xff] }
  0x90   :  { %4601 = vmatmul.mubr.msk.bf16.gmra.mrb[4].mxu1 %vm6541_vm5, %v8501_v34 }
  0x91   :  { %390 = vmatpush1.bf16.msra.mxu1 %v5822_v39  ;;  %364 = vmatprep.mubr.bf16.mxu1 %v8503_v0  ;;  %v6677_v39 = vpack.c.bf16 %v524_v35, %v520_v33 }
  0x92   :  { %391 = vmatprep.subr.bf16.mxu1 %v5827_v41  ;;  %v6681_v41 = vpack.c.bf16 %v533_v38, %v529_v36 }
  0x95   :  { %392 = vmatpush1.bf16.msra.mxu1 %v5825_v45  ;;  %v541_v45 = vld [vmem:[%s8490_s3 + $0x178] sm:$0xff] }
  0x96   :  { %393 = vmatprep.subr.bf16.mxu1 %v5830_v46  ;;  %v6696_v46 = vpack.c.bf16 %v532_v44, %v528_v43 }
  0x98   :  { %4603 = vmatmul.mubr.msk.bf16.gmra.mrb[8].mxu1 %vm6563_vm8, %v8501_v34 }
  0x99   :  { %394 = vmatpush1.bf16.msra.mxu1 %v5828_v47  ;;  %374 = vmatprep.mubr.bf16.mxu1 %v8503_v0  ;;  %v6699_v47 = vpack.c.bf16 %v541_v45, %v537_v42 }
  0x9a   :  { %395 = vmatprep.subr.bf16.mxu1 %v5833_v50  ;;  %v536_v50 = vld [vmem:[%s8490_s3 + $0x150] sm:$0xff] }
  0x9d   :  { %396 = vmatpush1.bf16.msra.mxu1 %v5831_v54  ;;  %v549_v54 = vld [vmem:[%s8490_s3 + $0x1b8] sm:$0xff] }
  0x9e   :  { %397 = vmatprep.subr.bf16.mxu1 %v5836_v55  ;;  %v6717_v55 = vpack.c.bf16 %v540_v52, %v536_v50 }
  0xa0   :  { %4605 = vmatmul.mubr.msk.bf16.gmra.mrb[12].mxu1 %vm6585_vm11, %v8501_v34 }
  0xa1   :  { %398 = vmatpush1.bf16.msra.mxu1 %v5834_v56  ;;  %417 = vmatprep.mubr.bf16.mxu1 %v8503_v0  ;;  %v6721_v56 = vpack.c.bf16 %v549_v54, %v545_v53 }
  0xa2   :  { %399 = vmatprep.subr.bf16.mxu1 %v5839_v57  ;;  %v544_v57 = vld [vmem:[%s8490_s3 + $0x190] sm:$0xff] }
  0xa5   :  { %400 = vmatpush1.bf16.msra.mxu1 %v5837_v63  ;;  %v6736_v63 = vpack.c.bf16 %v548_v61, %v544_v57 }
  0xa6   :  { %4796 = vmatprep.subr.bf16.mxu1 %v6602_v1 }
  0xa8   :  { %4607 = vmatmul.mubr.msk.bf16.vlgmr.msra.gmra.mrb[16].mxu1 %vm6519_vm2, %v8501_v34 }
  0xa9   :  { %4798 = vmatpush1.bf16.msra.mxu1 %v6616_v7  ;;  %427 = vmatprep.mubr.bf16.mxu1 %v8503_v0 }
  0xaa   :  { %4800 = vmatprep.subr.bf16.mxu1 %v6619_v9 }
  0xad   :  { %4802 = vmatpush1.bf16.msra.mxu1 %v6637_v18 }
  0xae   :  { %4804 = vmatprep.subr.bf16.mxu1 %v6641_v19 }
  0xb0   :  { %4609 = vmatmul.mubr.msk.bf16.gmra.mrb[20].mxu1 %vm6541_vm5, %v8501_v34 }
  0xb1   :  { %4806 = vmatpush1.bf16.msra.mxu1 %v6656_v29  ;;  %437 = vmatprep.mubr.bf16.mxu1 %v8503_v0 }
  0xb2   :  { %4808 = vmatprep.subr.bf16.mxu1 %v6659_v31 }
  0xb5   :  { %4810 = vmatpush1.bf16.msra.mxu1 %v6677_v39 }
  0xb6   :  { %4812 = vmatprep.subr.bf16.mxu1 %v6681_v41 }
  0xb8   :  { %4611 = vmatmul.mubr.msk.bf16.gmra.mrb[24].mxu1 %vm6563_vm8, %v8501_v34 }
  0xb9   :  { %4814 = vmatpush1.bf16.msra.mxu1 %v6696_v46  ;;  %447 = vmatprep.mubr.bf16.mxu1 %v8503_v0 }
  0xba   :  { %4816 = vmatprep.subr.bf16.mxu1 %v6699_v47 }
  0xbd   :  { %4818 = vmatpush1.bf16.msra.mxu1 %v6717_v55 }
  0xbe   :  { %4820 = vmatprep.subr.bf16.mxu1 %v6721_v56 }
  0xc0   :  { %4613 = vmatmul.mubr.msk.bf16.gmra.mrb[28].mxu1 %vm6585_vm11, %v8501_v34 }
  0xc1   :  { %4822 = vmatpush1.bf16.msra.mxu1 %v6736_v63  ;;  %693 = vmatprep.mubr.f32.mxu1 %v8505_v30 }
  0xc2   :  { %4824 = vmatprep.subr.bf16.mxu1 %v6739_v2 }
  0xc5   :  { %4826 = vmatpush1.bf16.msra.mxu1 %v6751_v6 }
  0xc6   :  { %4860 = vmatprep.subr.bf16.mxu1 %v6602_v1 }
  0xc8   :  { %694 = vmatmul.mubr.f32.vlgmr.msra.gmra.mrb[32].mxu1 %v8505_v30 }
  0xc9   :  { %4862 = vmatpush1.bf16.msra.mxu1 %v6616_v7  ;;  %867 = vmatprep.mubr.f32.mxu1 %v8505_v30 }
  0xca   :  { %4864 = vmatprep.subr.bf16.mxu1 %v6619_v9 }
  0xcd   :  { %4866 = vmatpush1.bf16.msra.mxu1 %v6637_v18 }
  0xce   :  { %4868 = vmatprep.subr.bf16.mxu1 %v6641_v19 }
  0xd1   :  { %4870 = vmatpush1.bf16.msra.mxu1 %v6656_v29 }
  0xd2   :  { %4872 = vmatprep.subr.bf16.mxu1 %v6659_v31 }
  0xd5   :  { %4874 = vmatpush1.bf16.msra.mxu1 %v6677_v39 }
  0xd6   :  { %4876 = vmatprep.subr.bf16.mxu1 %v6681_v41 }
  0xd9   :  { %4878 = vmatpush1.bf16.msra.mxu1 %v6696_v46 }
  0xda   :  { %4880 = vmatprep.subr.bf16.mxu1 %v6699_v47 }
  0xdd   :  { %4882 = vmatpush1.bf16.msra.mxu1 %v6717_v55 }
  0xde   :  { %4884 = vmatprep.subr.bf16.mxu1 %v6721_v56 }
  0xe1   :  { %4886 = vmatpush1.bf16.msra.mxu1 %v6736_v63 }
  0xe2   :  { %4888 = vmatprep.subr.bf16.mxu1 %v6739_v2 }
  0xe5   :  { %4890 = vmatpush1.bf16.msra.mxu1 %v6751_v6 }
  0xe6   :  { %4924 = vmatprep.subr.bf16.mxu1 %v6602_v1 }
  0xfb   :  { %v624_v59 = vpop.f32.mrb[0].mxu0 }
  0xfc   :  { %v626_v10 = vpop.f32.mrb[1].mxu0 }
 0x15b   :  { %v346_v28 = vpop.f32.mrb[0].mxu1 }
 0x15c   :  { %v347_v33 = vadd.f32 %v346_v28, %v135_v24  ;;  %v348_v35 = vpop.f32.mrb[1].mxu1 }
 0x15d   :  { %v349_v36 = vadd.f32 %v348_v35, %v139_v26  ;;  %v350_v23 = vpop.f32.mrb[2].mxu1 }
 0x15e   :  { %v6787_v38 = vadd.f32 %v350_v23, %v135_v24  ;;  %v700_v43 = vadd.f32 %v624_v59, %v347_v33  ;;  %v352_v44 = vpop.f32.mrb[3].mxu1 }
 0x15f   :  { %v6789_v42 = vadd.f32 %v352_v44, %v139_v26  ;;  %v701_v45 = vadd.f32 %v626_v10, %v349_v36 }
 0x163   :  { %v356_v50 = vpop.f32.mrb[4].mxu1 }
 0x164   :  { %v6791_v52 = vadd.f32 %v356_v50, %v135_v24  ;;  %v358_v53 = vpop.f32.mrb[5].mxu1 }
 0x165   :  { %v6793_v54 = vadd.f32 %v358_v53, %v139_v26  ;;  %v360_v57 = vpop.f32.mrb[6].mxu1 }
 0x166   :  { %v6795_v61 = vadd.f32 %v360_v57, %v135_v24  ;;  %v362_v51 = vpop.f32.mrb[7].mxu1 }
 0x167   :  { %v6797_v62 = vadd.f32 %v362_v51, %v139_v26 }
 0x169   :  { %8523 = vst [vmem:[#allocation6_spill] sm:$0xff] %v6797_v62 }
 0x16b   :  { %v366_v3 = vpop.f32.mrb[8].mxu1 }
 0x16c   :  { %v6799_v4 = vadd.f32 %v366_v3, %v135_v24  ;;  %v368_v59 = vpop.f32.mrb[9].mxu1 }
 0x16d   :  { %v6801_v28 = vadd.f32 %v368_v59, %v139_v26  ;;  %v370_v33 = vpop.f32.mrb[10].mxu1  ;;  %v8509_v59 = vsub.s32 2, %v6776_v11 }
 0x16e   :  { %8524 = vst [vmem:[#allocation7_spill] sm:$0xff] %v6799_v4  ;;  %v6803_v10 = vadd.f32 %v370_v33, %v135_v24  ;;  %v372_v35 = vpop.f32.mrb[11].mxu1  ;;  %v8510_v33 = vsub.s32 3, %v6776_v11 }
 0x16f   :  { %8525 = vst [vmem:[#allocation8_spill] sm:$0xff] %v6801_v28  ;;  %v6805_v36 = vadd.f32 %v372_v35, %v139_v26  ;;  %v143_v35 = vrot.slane %v130_v15, %v8509_v59 }
 0x170   :  { %8526 = vst [vmem:[#allocation9_spill] sm:$0xff] %v6803_v10 }
 0x171   :  { %8527 = vst [vmem:[#allocation10_spill] sm:$0xff] %v6805_v36 }
 0x173   :  { %v376_v23 = vpop.f32.mrb[12].mxu1 }
 0x174   :  { %v6807_v44 = vadd.f32 %v376_v23, %v135_v24  ;;  %v378_v50 = vpop.f32.mrb[13].mxu1  ;;  %v147_v23 = vrot.slane %v130_v15, %v8510_v33  ;;  %v4614_v15 = vmul.f32 -1.442695, %v700_v43 }
 0x175   :  { %v6809_v53 = vadd.f32 %v378_v50, %v139_v26  ;;  %v380_v57 = vpop.f32.mrb[14].mxu1 }
 0x176   :  { %8528 = vst [vmem:[#allocation11_spill] sm:$0xff] %v6807_v44  ;;  %v6811_v51 = vadd.f32 %v380_v57, %v135_v24  ;;  %v382_v3 = vpop.f32.mrb[15].mxu1 }
 0x177   :  { %8529 = vst [vmem:[#allocation12_spill] sm:$0xff] %v6809_v53  ;;  %v6813_v20 = vadd.f32 %v382_v3, %v139_v26  ;;  %v4615_v53 = vmul.f32 -1.442695, %v701_v45 }
 0x178   :  { %8530 = vst [vmem:[#allocation13_spill] sm:$0xff] %v6811_v51 }
 0x179   :  { %8531 = vst [vmem:[#allocation14_spill] sm:$0xff] %v6813_v20  ;;  %5896 = vpow2.f32 %v4615_v53 }
 0x17a   :  { %5898 = vpow2.f32 %v4614_v15 }
 0x17b   :  { %v419_v13 = vpop.f32.mrb[16].mxu1 }
 0x17c   :  { %v421_v34 = vpop.f32.mrb[17].mxu1 }
 0x17d   :  { %v423_v50 = vpop.f32.mrb[18].mxu1  ;;  %v422_v4 = vadd.f32 %v421_v34, %v147_v23 }
 0x17e   :  { %v6821_v0 = vadd.f32 %v423_v50, %v143_v35  ;;  %v425_v24 = vpop.f32.mrb[19].mxu1 }
 0x17f   :  { %v6823_v57 = vadd.f32 %v425_v24, %v147_v23 }
 0x183   :  { %v429_v26 = vpop.f32.mrb[20].mxu1 }
 0x184   :  { %v6825_v3 = vadd.f32 %v429_v26, %v143_v35  ;;  %v431_v30 = vpop.f32.mrb[21].mxu1 }
 0x185   :  { %v6827_v20 = vadd.f32 %v431_v30, %v147_v23  ;;  %v433_v51 = vpop.f32.mrb[22].mxu1 }
 0x186   :  { %v6829_v25 = vadd.f32 %v433_v51, %v143_v35  ;;  %v435_v59 = vpop.f32.mrb[23].mxu1 }
 0x187   :  { %v6831_v44 = vadd.f32 %v435_v59, %v147_v23  ;;  %v5897_v59 = vpop.eup %5896 }
 0x188   :  { %v5899_v15 = vpop.eup %5898 }
 0x189   :  { %8532 = vst [vmem:[#allocation15_spill] sm:$0xff] %v6831_v44 }
 0x18b   :  { %v439_v50 = vpop.f32.mrb[24].mxu1 }
 0x18c   :  { %v6833_v33 = vadd.f32 %v439_v50, %v143_v35  ;;  %v441_v24 = vpop.f32.mrb[25].mxu1 }
 0x18d   :  { %v6835_v11 = vadd.f32 %v441_v24, %v147_v23  ;;  %v443_v26 = vpop.f32.mrb[26].mxu1 }
 0x18e   :  { %8533 = vst [vmem:[#allocation16_spill] sm:$0xff] %v6833_v33  ;;  %v6837_v36 = vadd.f32 %v443_v26, %v143_v35  ;;  %v445_v30 = vpop.f32.mrb[27].mxu1  ;;  %v707_v26 = vadd.f32 1.0, %v5899_v15 }
 0x18f   :  { %8534 = vst [vmem:[#allocation17_spill] sm:$0xff] %v6835_v11  ;;  %v6839_v10 = vadd.f32 %v445_v30, %v147_v23  ;;  %v713_v11 = vadd.f32 1.0, %v5897_v59 }
 0x190   :  { %8535 = vst [vmem:[#allocation18_spill] sm:$0xff] %v6837_v36  ;;  %v420_v36 = vadd.f32 %v419_v13, %v143_v35 }
 0x191   :  { %8536 = vst [vmem:[#allocation19_spill] sm:$0xff] %v6839_v10  ;;  %5900 = vrcp.f32 %v713_v11 }
 0x192   :  { %5902 = vrcp.f32 %v707_v26 }
 0x193   :  { %v449_v51 = vpop.f32.mrb[28].mxu1 }
 0x194   :  { %v6841_v28 = vadd.f32 %v449_v51, %v143_v35  ;;  %v451_v45 = vpop.f32.mrb[29].mxu1 }
 0x195   :  { %v6843_v43 = vadd.f32 %v451_v45, %v147_v23  ;;  %v453_v53 = vpop.f32.mrb[30].mxu1 }
 0x196   :  { %8537 = vst [vmem:[#allocation20_spill] sm:$0xff] %v6841_v28  ;;  %v6845_v50 = vadd.f32 %v453_v53, %v143_v35  ;;  %v455_v33 = vpop.f32.mrb[31].mxu1 }
 0x197   :  { %8538 = vst [vmem:[#allocation21_spill] sm:$0xff] %v6843_v43  ;;  %v6847_v24 = vadd.f32 %v455_v33, %v147_v23 }
 0x198   :  { %8539 = vst [vmem:[#allocation22_spill] sm:$0xff] %v6845_v50 }
 0x199   :  { %8540 = vst [vmem:[#allocation23_spill] sm:$0xff] %v6847_v24 }
 0x19b   :  { %v695_v30 = vpop.f32.mrb[32].mxu1  ;;  %v5901_v43 = vpop.eup %5900 }
 0x19c   :  { %v702_v10 = vadd.f32 %v695_v30, %v420_v36  ;;  %v697_v51 = vpop.f32.mrb[33].mxu1  ;;  %v5903_v44 = vpop.eup %5902  ;;  %v723_v50 = vmul.f32 0.0, %v5901_v43 }
 0x19d   :  { %v703_v28 = vadd.f32 %v697_v51, %v422_v4  ;;  %v8541_v4 = vmov 0.0  }
 0x19e   :  { %5904 = vtanh.f32 %v702_v10 }
 0x19f   :  { %v4616_v45 = vmul.f32 -1.442695, %v703_v28 }
 0x1a1   :  { %5906 = vpow2.f32 %v4616_v45 }
 0x1a8   :  { %v5905_v53 = vpop.eup %5904 }
 0x1a9   :  { %v724_v62 = vmul.f32 %v5905_v53, %v5903_v44 }
 0x1ab   :  { %v5907_v33 = vpop.eup %5906  ;;  %v6849_v24 = vadd.f32 %v724_v62, %v723_v50 }
 0x1ac   :  { %v720_v59 = vadd.f32 1.0, %v5907_v33 }
 0x1ad   :  { %5908 = vtanh.f32 %v6849_v24 }
 0x1ae   :  { %5910 = vrcp.f32 %v720_v59 }
 0x1b7   :  { %v5909_v34 = vpop.eup %5908 }
 0x1b8   :  { %v5911_v11 = vpop.eup %5910 }
 0x1b9   :  { %v727_v13 = vmul.f32 %v5911_v11, %v5909_v34 }
 0x1bb   :  { %797 = vmatmul.mubr.f32.vlgmr.msra.gmra.mrb[2].mxu0 %v727_v13  ;;  %868 = vmatmul.mubr.f32.vlgmr.msra.gmra.mrb[34].mxu1 %v727_v13 }
 0x1bc   :  { %4894 = vmatpush1.bf16.msra.mxu0 %v6292_v17  ;;  %4926 = vmatpush1.bf16.msra.mxu1 %v6616_v7 }
 0x1bd   :  { %4896 = vmatprep.subr.bf16.mxu0 %v6304_v21  ;;  %4928 = vmatprep.subr.bf16.mxu1 %v6619_v9 }
 0x1be   :  { %970 = vmatprep.mubr.f32.mxu0 %v8541_v4  ;;  %1041 = vmatprep.mubr.f32.mxu1 %v8541_v4 }
 0x1c0   :  { %4898 = vmatpush1.bf16.msra.mxu0 %v6323_v27  ;;  %4930 = vmatpush1.bf16.msra.mxu1 %v6637_v18 }
 0x1c1   :  { %4900 = vmatprep.subr.bf16.mxu0 %v6335_v32  ;;  %4932 = vmatprep.subr.bf16.mxu1 %v6641_v19 }
 0x1c4   :  { %4902 = vmatpush1.bf16.msra.mxu0 %v6350_v37  ;;  %4934 = vmatpush1.bf16.msra.mxu1 %v6656_v29 }
 0x1c5   :  { %4904 = vmatprep.subr.bf16.mxu0 %v6359_v40  ;;  %4936 = vmatprep.subr.bf16.mxu1 %v6659_v31 }
 0x1c8   :  { %4906 = vmatpush1.bf16.msra.mxu0 %v6383_v48  ;;  %4938 = vmatpush1.bf16.msra.mxu1 %v6677_v39 }
 0x1c9   :  { %4908 = vmatprep.subr.bf16.mxu0 %v6386_v49  ;;  %4940 = vmatprep.subr.bf16.mxu1 %v6681_v41 }
 0x1cc   :  { %4910 = vmatpush1.bf16.msra.mxu0 %v6413_v58  ;;  %4942 = vmatpush1.bf16.msra.mxu1 %v6696_v46 }
 0x1cd   :  { %4912 = vmatprep.subr.bf16.mxu0 %v6419_v60  ;;  %4944 = vmatprep.subr.bf16.mxu1 %v6699_v47 }
 0x1d0   :  { %4914 = vmatpush1.bf16.msra.mxu0 %v6443_v5  ;;  %4946 = vmatpush1.bf16.msra.mxu1 %v6717_v55 }
 0x1d1   :  { %4916 = vmatprep.subr.bf16.mxu0 %v6452_v8  ;;  %4948 = vmatprep.subr.bf16.mxu1 %v6721_v56 }
 0x1d4   :  { %4918 = vmatpush1.bf16.msra.mxu0 %v6467_v14  ;;  %4950 = vmatpush1.bf16.msra.mxu1 %v6736_v63 }
 0x1d5   :  { %4920 = vmatprep.subr.bf16.mxu0 %v6473_v16  ;;  %4952 = vmatprep.subr.bf16.mxu1 %v6739_v2 }
 0x1d8   :  { %4922 = vmatpush1.bf16.msra.mxu0 %v6485_v22  ;;  %4954 = vmatpush1.bf16.msra.mxu1 %v6751_v6 }
 0x1d9   :  { %4956 = vmatprep.subr.bf16.mxu0 %v6278_v12  ;;  %4988 = vmatprep.subr.bf16.mxu1 %v6602_v1 }
 0x28e   :  { %v798_v62 = vpop.f32.mrb[2].mxu0  ;;  %v869_v28 = vpop.f32.mrb[34].mxu1 }
 0x28f   :  { %v874_v10 = vadd.f32 %v798_v62, %v6787_v38  ;;  %v876_v36 = vadd.f32 %v869_v28, %v6821_v0  ;;  %v800_v44 = vpop.f32.mrb[3].mxu0  ;;  %v871_v35 = vpop.f32.mrb[35].mxu1 }
 0x290   :  { %v875_v23 = vadd.f32 %v800_v44, %v6789_v42  ;;  %v877_v43 = vadd.f32 %v871_v35, %v6823_v57 }
 0x291   :  { %v4617_v15 = vmul.f32 -1.442695, %v874_v10 }
 0x292   :  { %v4618_v50 = vmul.f32 -1.442695, %v875_v23  ;;  %v4619_v26 = vmul.f32 -1.442695, %v877_v43 }
 0x293   :  { %5912 = vpow2.f32 %v4617_v15 }
 0x294   :  { %5914 = vpow2.f32 %v4618_v50 }
 0x295   :  { %5916 = vpow2.f32 %v4619_v26 }
 0x296   :  { %5918 = vtanh.f32 %v876_v36 }
 0x29d   :  { %v5913_v30 = vpop.eup %5912 }
 0x29e   :  { %v5915_v51 = vpop.eup %5914  ;;  %v881_v45 = vadd.f32 1.0, %v5913_v30 }
 0x29f   :  { %v887_v53 = vadd.f32 1.0, %v5915_v51  ;;  %v5917_v0 = vpop.eup %5916 }
 0x2a0   :  { %5920 = vrcp.f32 %v881_v45  ;;  %v5919_v38 = vpop.eup %5918  ;;  %v894_v34 = vadd.f32 1.0, %v5917_v0 }
 0x2a1   :  { %5922 = vrcp.f32 %v887_v53 }
 0x2a2   :  { %5924 = vrcp.f32 %v894_v34 }
 0x2aa   :  { %v5921_v33 = vpop.eup %5920 }
 0x2ab   :  { %v5923_v59 = vpop.eup %5922  ;;  %v898_v42 = vmul.f32 %v5921_v33, %v5919_v38 }
 0x2ac   :  { %v897_v57 = vmul.f32 %v5923_v59, %v6849_v24  ;;  %v5925_v13 = vpop.eup %5924 }
 0x2ae   :  { %v6891_v11 = vadd.f32 %v898_v42, %v897_v57 }
 0x2b0   :  { %5926 = vtanh.f32 %v6891_v11 }
 0x2ba   :  { %v5927_v62 = vpop.eup %5926 }
 0x2bb   :  { %v901_v28 = vmul.f32 %v5927_v62, %v5925_v13 }
 0x2bd   :  { %971 = vmatmul.mubr.f32.vlgmr.msra.gmra.mrb[4].mxu0 %v901_v28  ;;  %1042 = vmatmul.mubr.f32.vlgmr.msra.gmra.mrb[36].mxu1 %v901_v28 }
 0x2be   :  { %4958 = vmatpush1.bf16.msra.mxu0 %v6292_v17  ;;  %4990 = vmatpush1.bf16.msra.mxu1 %v6616_v7 }
 0x2bf   :  { %4960 = vmatprep.subr.bf16.mxu0 %v6304_v21  ;;  %4992 = vmatprep.subr.bf16.mxu1 %v6619_v9 }
 0x2c0   :  { %1144 = vmatprep.mubr.f32.mxu0 %v8541_v4  ;;  %1215 = vmatprep.mubr.f32.mxu1 %v8541_v4 }
 0x2c2   :  { %4962 = vmatpush1.bf16.msra.mxu0 %v6323_v27  ;;  %4994 = vmatpush1.bf16.msra.mxu1 %v6637_v18 }
 0x2c3   :  { %4964 = vmatprep.subr.bf16.mxu0 %v6335_v32  ;;  %4996 = vmatprep.subr.bf16.mxu1 %v6641_v19 }
 0x2c6   :  { %4966 = vmatpush1.bf16.msra.mxu0 %v6350_v37  ;;  %4998 = vmatpush1.bf16.msra.mxu1 %v6656_v29 }
 0x2c7   :  { %4968 = vmatprep.subr.bf16.mxu0 %v6359_v40  ;;  %5000 = vmatprep.subr.bf16.mxu1 %v6659_v31 }
 0x2ca   :  { %4970 = vmatpush1.bf16.msra.mxu0 %v6383_v48  ;;  %5002 = vmatpush1.bf16.msra.mxu1 %v6677_v39 }
 0x2cb   :  { %4972 = vmatprep.subr.bf16.mxu0 %v6386_v49  ;;  %5004 = vmatprep.subr.bf16.mxu1 %v6681_v41 }
 0x2ce   :  { %4974 = vmatpush1.bf16.msra.mxu0 %v6413_v58  ;;  %5006 = vmatpush1.bf16.msra.mxu1 %v6696_v46 }
 0x2cf   :  { %4976 = vmatprep.subr.bf16.mxu0 %v6419_v60  ;;  %5008 = vmatprep.subr.bf16.mxu1 %v6699_v47 }
 0x2d2   :  { %4978 = vmatpush1.bf16.msra.mxu0 %v6443_v5  ;;  %5010 = vmatpush1.bf16.msra.mxu1 %v6717_v55 }
 0x2d3   :  { %4980 = vmatprep.subr.bf16.mxu0 %v6452_v8  ;;  %5012 = vmatprep.subr.bf16.mxu1 %v6721_v56 }
 0x2d6   :  { %4982 = vmatpush1.bf16.msra.mxu0 %v6467_v14  ;;  %5014 = vmatpush1.bf16.msra.mxu1 %v6736_v63 }
 0x2d7   :  { %4984 = vmatprep.subr.bf16.mxu0 %v6473_v16  ;;  %5016 = vmatprep.subr.bf16.mxu1 %v6739_v2 }
 0x2da   :  { %4986 = vmatpush1.bf16.msra.mxu0 %v6485_v22  ;;  %5018 = vmatpush1.bf16.msra.mxu1 %v6751_v6 }
 0x2db   :  { %5020 = vmatprep.subr.bf16.mxu0 %v6278_v12  ;;  %5052 = vmatprep.subr.bf16.mxu1 %v6602_v1 }
 0x390   :  { %v972_v24 = vpop.f32.mrb[4].mxu0  ;;  %v1043_v10 = vpop.f32.mrb[36].mxu1 }
 0x391   :  { %v1048_v36 = vadd.f32 %v972_v24, %v6791_v52  ;;  %v1050_v44 = vadd.f32 %v1043_v10, %v6825_v3  ;;  %v974_v35 = vpop.f32.mrb[5].mxu0  ;;  %v1045_v23 = vpop.f32.mrb[37].mxu1 }
 0x392   :  { %v1049_v43 = vadd.f32 %v974_v35, %v6793_v54  ;;  %v1051_v15 = vadd.f32 %v1045_v23, %v6827_v20  ;;  %v8543_v23 = vld [vmem:[#allocation15_spill] sm:$0xff] }
 0x393   :  { %v4620_v50 = vmul.f32 -1.442695, %v1048_v36 }
 0x394   :  { %v4621_v26 = vmul.f32 -1.442695, %v1049_v43  ;;  %v4622_v30 = vmul.f32 -1.442695, %v1051_v15 }
 0x395   :  { %5928 = vpow2.f32 %v4620_v50 }
 0x396   :  { %5930 = vpow2.f32 %v4621_v26 }
 0x397   :  { %5932 = vpow2.f32 %v4622_v30 }
 0x398   :  { %5934 = vtanh.f32 %v1050_v44  ;;  %v8542_v44 = vld [vmem:[#allocation6_spill] sm:$0xff] }
 0x39f   :  { %v5929_v51 = vpop.eup %5928 }
 0x3a0   :  { %v5931_v45 = vpop.eup %5930  ;;  %v1055_v53 = vadd.f32 1.0, %v5929_v51 }
 0x3a1   :  { %v1061_v0 = vadd.f32 1.0, %v5931_v45  ;;  %v5933_v52 = vpop.eup %5932 }
 0x3a2   :  { %5936 = vrcp.f32 %v1055_v53  ;;  %v5935_v3 = vpop.eup %5934  ;;  %v1068_v59 = vadd.f32 1.0, %v5933_v52 }
 0x3a3   :  { %5938 = vrcp.f32 %v1061_v0 }
 0x3a4   :  { %5940 = vrcp.f32 %v1068_v59 }
 0x3ac   :  { %v5937_v38 = vpop.eup %5936 }
 0x3ad   :  { %v5939_v33 = vpop.eup %5938  ;;  %v1072_v54 = vmul.f32 %v5937_v38, %v5935_v3 }
 0x3ae   :  { %v1071_v20 = vmul.f32 %v5939_v33, %v6891_v11  ;;  %v5941_v34 = vpop.eup %5940 }
 0x3b0   :  { %v6933_v42 = vadd.f32 %v1072_v54, %v1071_v20 }
 0x3b2   :  { %5942 = vtanh.f32 %v6933_v42 }
 0x3bc   :  { %v5943_v57 = vpop.eup %5942 }
 0x3bd   :  { %v1075_v13 = vmul.f32 %v5943_v57, %v5941_v34 }
 0x3bf   :  { %1145 = vmatmul.mubr.f32.vlgmr.msra.gmra.mrb[6].mxu0 %v1075_v13  ;;  %1216 = vmatmul.mubr.f32.vlgmr.msra.gmra.mrb[38].mxu1 %v1075_v13  ;;  %v8544_v13 = vld [vmem:[#allocation7_spill] sm:$0xff] }
 0x3c0   :  { %5022 = vmatpush1.bf16.msra.mxu0 %v6292_v17  ;;  %5054 = vmatpush1.bf16.msra.mxu1 %v6616_v7 }
 0x3c1   :  { %5024 = vmatprep.subr.bf16.mxu0 %v6304_v21  ;;  %5056 = vmatprep.subr.bf16.mxu1 %v6619_v9 }
 0x3c2   :  { %1318 = vmatprep.mubr.f32.mxu0 %v8541_v4  ;;  %1389 = vmatprep.mubr.f32.mxu1 %v8541_v4 }
 0x3c4   :  { %5026 = vmatpush1.bf16.msra.mxu0 %v6323_v27  ;;  %5058 = vmatpush1.bf16.msra.mxu1 %v6637_v18 }
 0x3c5   :  { %5028 = vmatprep.subr.bf16.mxu0 %v6335_v32  ;;  %5060 = vmatprep.subr.bf16.mxu1 %v6641_v19 }
 0x3c8   :  { %5030 = vmatpush1.bf16.msra.mxu0 %v6350_v37  ;;  %5062 = vmatpush1.bf16.msra.mxu1 %v6656_v29 }
 0x3c9   :  { %5032 = vmatprep.subr.bf16.mxu0 %v6359_v40  ;;  %5064 = vmatprep.subr.bf16.mxu1 %v6659_v31 }
 0x3cc   :  { %5034 = vmatpush1.bf16.msra.mxu0 %v6383_v48  ;;  %5066 = vmatpush1.bf16.msra.mxu1 %v6677_v39 }
 0x3cd   :  { %5036 = vmatprep.subr.bf16.mxu0 %v6386_v49  ;;  %5068 = vmatprep.subr.bf16.mxu1 %v6681_v41 }
 0x3d0   :  { %5038 = vmatpush1.bf16.msra.mxu0 %v6413_v58  ;;  %5070 = vmatpush1.bf16.msra.mxu1 %v6696_v46 }
 0x3d1   :  { %5040 = vmatprep.subr.bf16.mxu0 %v6419_v60  ;;  %5072 = vmatprep.subr.bf16.mxu1 %v6699_v47 }
 0x3d4   :  { %5042 = vmatpush1.bf16.msra.mxu0 %v6443_v5  ;;  %5074 = vmatpush1.bf16.msra.mxu1 %v6717_v55 }
 0x3d5   :  { %5044 = vmatprep.subr.bf16.mxu0 %v6452_v8  ;;  %5076 = vmatprep.subr.bf16.mxu1 %v6721_v56 }
 0x3d8   :  { %5046 = vmatpush1.bf16.msra.mxu0 %v6467_v14  ;;  %5078 = vmatpush1.bf16.msra.mxu1 %v6736_v63 }
 0x3d9   :  { %5048 = vmatprep.subr.bf16.mxu0 %v6473_v16  ;;  %5080 = vmatprep.subr.bf16.mxu1 %v6739_v2 }
 0x3dc   :  { %5050 = vmatpush1.bf16.msra.mxu0 %v6485_v22  ;;  %5082 = vmatpush1.bf16.msra.mxu1 %v6751_v6 }
 0x3dd   :  { %5084 = vmatprep.subr.bf16.mxu0 %v6278_v12  ;;  %5116 = vmatprep.subr.bf16.mxu1 %v6602_v1 }
 0x492   :  { %v1146_v11 = vpop.f32.mrb[6].mxu0  ;;  %v1217_v62 = vpop.f32.mrb[38].mxu1 }
 0x493   :  { %v1222_v28 = vadd.f32 %v1146_v11, %v6795_v61  ;;  %v1224_v24 = vadd.f32 %v1217_v62, %v6829_v25  ;;  %v1148_v10 = vpop.f32.mrb[7].mxu0  ;;  %v1219_v36 = vpop.f32.mrb[39].mxu1  ;;  %v8545_v62 = vld [vmem:[#allocation16_spill] sm:$0xff] }
 0x494   :  { %v1223_v35 = vadd.f32 %v1148_v10, %v8542_v44  ;;  %v1225_v43 = vadd.f32 %v1219_v36, %v8543_v23  ;;  %v8546_v36 = vld [vmem:[#allocation8_spill] sm:$0xff] }
 0x495   :  { %v4623_v15 = vmul.f32 -1.442695, %v1222_v28 }
 0x496   :  { %v4624_v50 = vmul.f32 -1.442695, %v1223_v35  ;;  %v4625_v26 = vmul.f32 -1.442695, %v1225_v43  ;;  %v8547_v35 = vld [vmem:[#allocation17_spill] sm:$0xff] }
 0x497   :  { %5944 = vpow2.f32 %v4623_v15 }
 0x498   :  { %5946 = vpow2.f32 %v4624_v50 }
 0x499   :  { %5948 = vpow2.f32 %v4625_v26 }
 0x49a   :  { %5950 = vtanh.f32 %v1224_v24 }
 0x4a1   :  { %v5945_v30 = vpop.eup %5944 }
 0x4a2   :  { %v5947_v51 = vpop.eup %5946  ;;  %v1229_v45 = vadd.f32 1.0, %v5945_v30 }
 0x4a3   :  { %v1235_v53 = vadd.f32 1.0, %v5947_v51  ;;  %v5949_v25 = vpop.eup %5948 }
 0x4a4   :  { %5952 = vrcp.f32 %v1229_v45  ;;  %v5951_v61 = vpop.eup %5950  ;;  %v1242_v38 = vadd.f32 1.0, %v5949_v25 }
 0x4a5   :  { %5954 = vrcp.f32 %v1235_v53 }
 0x4a6   :  { %5956 = vrcp.f32 %v1242_v38 }
 0x4ae   :  { %v5953_v0 = vpop.eup %5952 }
 0x4af   :  { %v5955_v52 = vpop.eup %5954  ;;  %v1246_v3 = vmul.f32 %v5953_v0, %v5951_v61 }
 0x4b0   :  { %v1245_v33 = vmul.f32 %v5955_v52, %v6933_v42  ;;  %v5957_v59 = vpop.eup %5956 }
 0x4b2   :  { %v6975_v54 = vadd.f32 %v1246_v3, %v1245_v33 }
 0x4b4   :  { %5958 = vtanh.f32 %v6975_v54 }
 0x4be   :  { %v5959_v20 = vpop.eup %5958 }
 0x4bf   :  { %v1249_v34 = vmul.f32 %v5959_v20, %v5957_v59 }
 0x4c1   :  { %1319 = vmatmul.mubr.f32.vlgmr.msra.gmra.mrb[8].mxu0 %v1249_v34  ;;  %1390 = vmatmul.mubr.f32.vlgmr.msra.gmra.mrb[40].mxu1 %v1249_v34 }
 0x4c2   :  { %5086 = vmatpush1.bf16.msra.mxu0 %v6292_v17  ;;  %5118 = vmatpush1.bf16.msra.mxu1 %v6616_v7 }
 0x4c3   :  { %5088 = vmatprep.subr.bf16.mxu0 %v6304_v21  ;;  %5120 = vmatprep.subr.bf16.mxu1 %v6619_v9 }
 0x4c4   :  { %1492 = vmatprep.mubr.f32.mxu0 %v8541_v4  ;;  %1563 = vmatprep.mubr.f32.mxu1 %v8541_v4 }
 0x4c6   :  { %5090 = vmatpush1.bf16.msra.mxu0 %v6323_v27  ;;  %5122 = vmatpush1.bf16.msra.mxu1 %v6637_v18 }
 0x4c7   :  { %5092 = vmatprep.subr.bf16.mxu0 %v6335_v32  ;;  %5124 = vmatprep.subr.bf16.mxu1 %v6641_v19 }
 0x4ca   :  { %5094 = vmatpush1.bf16.msra.mxu0 %v6350_v37  ;;  %5126 = vmatpush1.bf16.msra.mxu1 %v6656_v29 }
 0x4cb   :  { %5096 = vmatprep.subr.bf16.mxu0 %v6359_v40  ;;  %5128 = vmatprep.subr.bf16.mxu1 %v6659_v31 }
 0x4ce   :  { %5098 = vmatpush1.bf16.msra.mxu0 %v6383_v48  ;;  %5130 = vmatpush1.bf16.msra.mxu1 %v6677_v39 }
 0x4cf   :  { %5100 = vmatprep.subr.bf16.mxu0 %v6386_v49  ;;  %5132 = vmatprep.subr.bf16.mxu1 %v6681_v41 }
 0x4d2   :  { %5102 = vmatpush1.bf16.msra.mxu0 %v6413_v58  ;;  %5134 = vmatpush1.bf16.msra.mxu1 %v6696_v46 }
 0x4d3   :  { %5104 = vmatprep.subr.bf16.mxu0 %v6419_v60  ;;  %5136 = vmatprep.subr.bf16.mxu1 %v6699_v47 }
 0x4d6   :  { %5106 = vmatpush1.bf16.msra.mxu0 %v6443_v5  ;;  %5138 = vmatpush1.bf16.msra.mxu1 %v6717_v55 }
 0x4d7   :  { %5108 = vmatprep.subr.bf16.mxu0 %v6452_v8  ;;  %5140 = vmatprep.subr.bf16.mxu1 %v6721_v56 }
 0x4da   :  { %5110 = vmatpush1.bf16.msra.mxu0 %v6467_v14  ;;  %5142 = vmatpush1.bf16.msra.mxu1 %v6736_v63 }
 0x4db   :  { %5112 = vmatprep.subr.bf16.mxu0 %v6473_v16  ;;  %5144 = vmatprep.subr.bf16.mxu1 %v6739_v2 }
 0x4de   :  { %5114 = vmatpush1.bf16.msra.mxu0 %v6485_v22  ;;  %5146 = vmatpush1.bf16.msra.mxu1 %v6751_v6 }
 0x4df   :  { %5148 = vmatprep.subr.bf16.mxu0 %v6278_v12  ;;  %5180 = vmatprep.subr.bf16.mxu1 %v6602_v1 }
 0x594   :  { %v1320_v42 = vpop.f32.mrb[8].mxu0  ;;  %v1391_v57 = vpop.f32.mrb[40].mxu1 }
 0x595   :  { %v1396_v11 = vadd.f32 %v1320_v42, %v8544_v13  ;;  %v1398_v28 = vadd.f32 %v1391_v57, %v8545_v62  ;;  %v1322_v24 = vpop.f32.mrb[9].mxu0  ;;  %v1393_v10 = vpop.f32.mrb[41].mxu1  ;;  %v8548_v57 = vld [vmem:[#allocation9_spill] sm:$0xff] }
 0x596   :  { %v1397_v44 = vadd.f32 %v1322_v24, %v8546_v36  ;;  %v1399_v23 = vadd.f32 %v1393_v10, %v8547_v35  ;;  %v8550_v10 = vld [vmem:[#allocation10_spill] sm:$0xff] }
 0x597   :  { %v4626_v43 = vmul.f32 -1.442695, %v1396_v11  ;;  %v8549_v11 = vld [vmem:[#allocation18_spill] sm:$0xff] }
 0x598   :  { %v4627_v15 = vmul.f32 -1.442695, %v1397_v44  ;;  %v4628_v50 = vmul.f32 -1.442695, %v1399_v23  ;;  %v8551_v44 = vld [vmem:[#allocation19_spill] sm:$0xff] }
 0x599   :  { %5960 = vpow2.f32 %v4626_v43 }
 0x59a   :  { %5962 = vpow2.f32 %v4627_v15 }
 0x59b   :  { %5964 = vpow2.f32 %v4628_v50 }
 0x59c   :  { %5966 = vtanh.f32 %v1398_v28 }
 0x5a3   :  { %v5961_v26 = vpop.eup %5960 }
 0x5a4   :  { %v5963_v30 = vpop.eup %5962  ;;  %v1403_v51 = vadd.f32 1.0, %v5961_v26 }
 0x5a5   :  { %v1409_v45 = vadd.f32 1.0, %v5963_v30  ;;  %v5965_v53 = vpop.eup %5964 }
 0x5a6   :  { %5968 = vrcp.f32 %v1403_v51  ;;  %v5967_v25 = vpop.eup %5966  ;;  %v1416_v3 = vadd.f32 1.0, %v5965_v53 }
 0x5a7   :  { %5970 = vrcp.f32 %v1409_v45 }
 0x5a8   :  { %5972 = vrcp.f32 %v1416_v3 }
 0x5b0   :  { %v5969_v61 = vpop.eup %5968 }
 0x5b1   :  { %v5971_v0 = vpop.eup %5970  ;;  %v1420_v52 = vmul.f32 %v5969_v61, %v5967_v25 }
 0x5b2   :  { %v1419_v38 = vmul.f32 %v5971_v0, %v6975_v54  ;;  %v5973_v59 = vpop.eup %5972 }
 0x5b4   :  { %v7017_v33 = vadd.f32 %v1420_v52, %v1419_v38 }
 0x5b6   :  { %5974 = vtanh.f32 %v7017_v33 }
 0x5c0   :  { %v5975_v20 = vpop.eup %5974 }
 0x5c1   :  { %v1423_v34 = vmul.f32 %v5975_v20, %v5973_v59  ;;  %v5840_v20 = vld [vmem:[%s8493_s5] ss:$16 sps:$4 sm:$0xff]  }
 0x5c3   :  { %1493 = vmatmul.mubr.f32.vlgmr.msra.gmra.mrb[10].mxu0 %v1423_v34  ;;  %1564 = vmatmul.mubr.f32.vlgmr.msra.gmra.mrb[42].mxu1 %v1423_v34  ;;  %v5843_v34 = vld [vmem:[%s8493_s5 + $0x8] ss:$16 sps:$4 sm:$0xff]  }
 0x5c4   :  { %5150 = vmatpush1.bf16.msra.mxu0 %v6292_v17  ;;  %5182 = vmatpush1.bf16.msra.mxu1 %v6616_v7 }
 0x5c5   :  { %5152 = vmatprep.subr.bf16.mxu0 %v6304_v21  ;;  %5184 = vmatprep.subr.bf16.mxu1 %v6619_v9 }
 0x5c6   :  { %1666 = vmatprep.mubr.f32.mxu0 %v8541_v4  ;;  %1737 = vmatprep.mubr.f32.mxu1 %v8541_v4 }
 0x5c8   :  { %5154 = vmatpush1.bf16.msra.mxu0 %v6323_v27  ;;  %5186 = vmatpush1.bf16.msra.mxu1 %v6637_v18 }
 0x5c9   :  { %5156 = vmatprep.subr.bf16.mxu0 %v6335_v32  ;;  %5188 = vmatprep.subr.bf16.mxu1 %v6641_v19 }
 0x5cc   :  { %5158 = vmatpush1.bf16.msra.mxu0 %v6350_v37  ;;  %5190 = vmatpush1.bf16.msra.mxu1 %v6656_v29 }
 0x5cd   :  { %5160 = vmatprep.subr.bf16.mxu0 %v6359_v40  ;;  %5192 = vmatprep.subr.bf16.mxu1 %v6659_v31 }
 0x5d0   :  { %5162 = vmatpush1.bf16.msra.mxu0 %v6383_v48  ;;  %5194 = vmatpush1.bf16.msra.mxu1 %v6677_v39 }
 0x5d1   :  { %5164 = vmatprep.subr.bf16.mxu0 %v6386_v49  ;;  %5196 = vmatprep.subr.bf16.mxu1 %v6681_v41 }
 0x5d4   :  { %5166 = vmatpush1.bf16.msra.mxu0 %v6413_v58  ;;  %5198 = vmatpush1.bf16.msra.mxu1 %v6696_v46 }
 0x5d5   :  { %5168 = vmatprep.subr.bf16.mxu0 %v6419_v60  ;;  %5200 = vmatprep.subr.bf16.mxu1 %v6699_v47 }
 0x5d8   :  { %5170 = vmatpush1.bf16.msra.mxu0 %v6443_v5  ;;  %5202 = vmatpush1.bf16.msra.mxu1 %v6717_v55 }
 0x5d9   :  { %5172 = vmatprep.subr.bf16.mxu0 %v6452_v8  ;;  %5204 = vmatprep.subr.bf16.mxu1 %v6721_v56 }
 0x5dc   :  { %5174 = vmatpush1.bf16.msra.mxu0 %v6467_v14  ;;  %5206 = vmatpush1.bf16.msra.mxu1 %v6736_v63 }
 0x5dd   :  { %5176 = vmatprep.subr.bf16.mxu0 %v6473_v16  ;;  %5208 = vmatprep.subr.bf16.mxu1 %v6739_v2 }
 0x5e0   :  { %5178 = vmatpush1.bf16.msra.mxu0 %v6485_v22  ;;  %5210 = vmatpush1.bf16.msra.mxu1 %v6751_v6 }
 0x5e1   :  { %5212 = vmatprep.subr.bf16.mxu0 %v6278_v12  ;;  %5244 = vmatprep.subr.bf16.mxu1 %v6602_v1 }
 0x696   :  { %v1494_v54 = vpop.f32.mrb[10].mxu0  ;;  %v1565_v42 = vpop.f32.mrb[42].mxu1 }
 0x697   :  { %v1570_v13 = vadd.f32 %v1494_v54, %v8548_v57  ;;  %v1572_v62 = vadd.f32 %v1565_v42, %v8549_v11  ;;  %v1496_v28 = vpop.f32.mrb[11].mxu0  ;;  %v1567_v24 = vpop.f32.mrb[43].mxu1  ;;  %v5848_v42 = vld [vmem:[%s8493_s5 + $0x24] ss:$16 sps:$4 sm:$0xff]   ;;  %v5851_v57 = vld [vmem:[%s8493_s5 + $0x2c] ss:$16 sps:$4 sm:$0xff]  }
 0x698   :  { %v1571_v36 = vadd.f32 %v1496_v28, %v8550_v10  ;;  %v1573_v35 = vadd.f32 %v1567_v24, %v8551_v44  ;;  %v5849_v11 = vld [vmem:[%s8493_s5 + $0x28] ss:$16 sps:$4 sm:$0xff]   ;;  %v5857_v28 = vld [vmem:[%s8493_s5 + $0x4c] ss:$16 sps:$4 sm:$0xff]   ;;  %v8556_v24 = vmov 0  }
 0x699   :  { %v4629_v23 = vmul.f32 -1.442695, %v1570_v13  ;;  %v5846_v13 = vld [vmem:[%s8493_s5 + $0x20] ss:$16 sps:$4 sm:$0xff]   ;;  %v5860_v44 = vld [vmem:[%s8493_s5 + $0x64] ss:$16 sps:$4 sm:$0xff]  }
 0x69a   :  { %v4630_v43 = vmul.f32 -1.442695, %v1571_v36  ;;  %v4631_v15 = vmul.f32 -1.442695, %v1573_v35  ;;  %v5852_v10 = vld [vmem:[%s8493_s5 + $0x40] ss:$16 sps:$4 sm:$0xff]  }
 0x69b   :  { %5976 = vpow2.f32 %v4629_v23  ;;  %v5855_v36 = vld [vmem:[%s8493_s5 + $0x48] ss:$16 sps:$4 sm:$0xff]   ;;  %v5863_v35 = vld [vmem:[%s8493_s5 + $0x6c] ss:$16 sps:$4 sm:$0xff]   ;;  %v5858_v23 = vld [vmem:[%s8493_s5 + $0x60] ss:$16 sps:$4 sm:$0xff]  }
 0x69c   :  { %5978 = vpow2.f32 %v4630_v43  ;;  %v5861_v43 = vld [vmem:[%s8493_s5 + $0x68] ss:$16 sps:$4 sm:$0xff]  }
 0x69d   :  { %5980 = vpow2.f32 %v4631_v15  ;;  %v5866_v15 = vld [vmem:[%s8493_s5 + $0x84] ss:$16 sps:$4 sm:$0xff]  }
 0x69e   :  { %5982 = vtanh.f32 %v1572_v62  ;;  %v5854_v62 = vld [vmem:[%s8493_s5 + $0x44] ss:$16 sps:$4 sm:$0xff]  }
 0x6a5   :  { %v5977_v12 = vpop.eup %5976 }
 0x6a6   :  { %v5979_v50 = vpop.eup %5978  ;;  %v1577_v1 = vadd.f32 1.0, %v5977_v12  ;;  %v5869_v12 = vld [vmem:[%s8493_s5 + $0x8c] ss:$16 sps:$4 sm:$0xff]  }
 0x6a7   :  { %v1583_v26 = vadd.f32 1.0, %v5979_v50  ;;  %v5981_v30 = vpop.eup %5980  ;;  %v5864_v50 = vld [vmem:[%s8493_s5 + $0x80] ss:$16 sps:$4 sm:$0xff]  }
 0x6a8   :  { %5984 = vrcp.f32 %v1577_v1  ;;  %v5983_v51 = vpop.eup %5982  ;;  %v1590_v61 = vadd.f32 1.0, %v5981_v30  ;;  %v5867_v1 = vld [vmem:[%s8493_s5 + $0x88] ss:$16 sps:$4 sm:$0xff]   ;;  %v5875_v30 = vld [vmem:[%s8493_s5 + $0xac] ss:$16 sps:$4 sm:$0xff]  }
 0x6a9   :  { %5986 = vrcp.f32 %v1583_v26  ;;  %v5872_v26 = vld [vmem:[%s8493_s5 + $0xa4] ss:$16 sps:$4 sm:$0xff]  }
 0x6aa   :  { %5988 = vrcp.f32 %v1590_v61  ;;  %v5876_v61 = vld [vmem:[%s8493_s5 + $0xc0] ss:$16 sps:$4 sm:$0xff]  }
 0x6b2   :  { %v5985_v45 = vpop.eup %5984 }
 0x6b3   :  { %v5987_v53 = vpop.eup %5986  ;;  %v1594_v25 = vmul.f32 %v5985_v45, %v5983_v51  ;;  %v5870_v51 = vld [vmem:[%s8493_s5 + $0xa0] ss:$16 sps:$4 sm:$0xff]   ;;  %v5873_v45 = vld [vmem:[%s8493_s5 + $0xa8] ss:$16 sps:$4 sm:$0xff]  }
 0x6b4   :  { %v1593_v0 = vmul.f32 %v5987_v53, %v7017_v33  ;;  %v5989_v3 = vpop.eup %5988  ;;  %v5878_v53 = vld [vmem:[%s8493_s5 + $0xc4] ss:$16 sps:$4 sm:$0xff]  }
 0x6b6   :  { %v7059_v52 = vadd.f32 %v1594_v25, %v1593_v0  ;;  %v5881_v25 = vld [vmem:[%s8493_s5 + $0xcc] ss:$16 sps:$4 sm:$0xff]   ;;  %v5879_v0 = vld [vmem:[%s8493_s5 + $0xc8] ss:$16 sps:$4 sm:$0xff]  }
 0x6b8   :  { %5990 = vtanh.f32 %v7059_v52 }
 0x6c2   :  { %v5991_v38 = vpop.eup %5990 }
 0x6c3   :  { %v1597_v59 = vmul.f32 %v5991_v38, %v5989_v3  ;;  %v5887_v3 = vld [vmem:[%s8493_s5 + $0xec] ss:$16 sps:$4 sm:$0xff]   ;;  %v1959_v38 = vpop.permute.xlu1 %1958 }
 0x6c5   :  { %1667 = vmatmul.mubr.f32.vlgmr.msra.gmra.mrb[12].mxu0 %v1597_v59  ;;  %1738 = vmatmul.mubr.f32.vlgmr.msra.gmra.mrb[44].mxu1 %v1597_v59  ;;  %v1956_v59 = vpop.permute.xlu0 %1955 }
 0x6c6   :  { %5214 = vmatpush1.bf16.msra.mxu0 %v6292_v17  ;;  %5246 = vmatpush1.bf16.msra.mxu1 %v6616_v7  ;;  %v5842_v17 = vld [vmem:[%s8493_s5 + $0x4] ss:$16 sps:$4 sm:$0xff]  }
 0x6c7   :  { %5216 = vmatprep.subr.bf16.mxu0 %v6304_v21  ;;  %5248 = vmatprep.subr.bf16.mxu1 %v6619_v9  ;;  %v5845_v21 = vld [vmem:[%s8493_s5 + $0xc] ss:$16 sps:$4 sm:$0xff]  }
 0x6c8   :  { %1840 = vmatprep.mubr.f32.mxu0 %v8541_v4  ;;  %1911 = vmatprep.mubr.f32.mxu1 %v8541_v4 }
 0x6ca   :  { %5218 = vmatpush1.bf16.msra.mxu0 %v6323_v27  ;;  %5250 = vmatpush1.bf16.msra.mxu1 %v6637_v18 }
 0x6cb   :  { %5220 = vmatprep.subr.bf16.mxu0 %v6335_v32  ;;  %5252 = vmatprep.subr.bf16.mxu1 %v6641_v19 }
 0x6ce   :  { %5222 = vmatpush1.bf16.msra.mxu0 %v6350_v37  ;;  %5254 = vmatpush1.bf16.msra.mxu1 %v6656_v29  ;;  %v8552_v37 = vld [vmem:[#allocation11_spill] sm:$0xff] }
 0x6cf   :  { %5224 = vmatprep.subr.bf16.mxu0 %v6359_v40  ;;  %5256 = vmatprep.subr.bf16.mxu1 %v6659_v31 }
 0x6d2   :  { %5226 = vmatpush1.bf16.msra.mxu0 %v6383_v48  ;;  %5258 = vmatpush1.bf16.msra.mxu1 %v6677_v39  ;;  %v8553_v48 = vld [vmem:[#allocation20_spill] sm:$0xff] }
 0x6d3   :  { %5228 = vmatprep.subr.bf16.mxu0 %v6386_v49  ;;  %5260 = vmatprep.subr.bf16.mxu1 %v6681_v41 }
 0x6d6   :  { %5230 = vmatpush1.bf16.msra.mxu0 %v6413_v58  ;;  %5262 = vmatpush1.bf16.msra.mxu1 %v6696_v46 }
 0x6d7   :  { %5232 = vmatprep.subr.bf16.mxu0 %v6419_v60  ;;  %5264 = vmatprep.subr.bf16.mxu1 %v6699_v47 }
 0x6da   :  { %5234 = vmatpush1.bf16.msra.mxu0 %v6443_v5  ;;  %5266 = vmatpush1.bf16.msra.mxu1 %v6717_v55  ;;  %v8554_v5 = vld [vmem:[#allocation12_spill] sm:$0xff] }
 0x6db   :  { %5236 = vmatprep.subr.bf16.mxu0 %v6452_v8  ;;  %5268 = vmatprep.subr.bf16.mxu1 %v6721_v56 }
 0x6de   :  { %5238 = vmatpush1.bf16.msra.mxu0 %v6467_v14  ;;  %5270 = vmatpush1.bf16.msra.mxu1 %v6736_v63  ;;  %v8555_v14 = vld [vmem:[#allocation21_spill] sm:$0xff] }
 0x6df   :  { %5240 = vmatprep.subr.bf16.mxu0 %v6473_v16  ;;  %5272 = vmatprep.subr.bf16.mxu1 %v6739_v2 }
 0x6e2   :  { %5242 = vmatpush1.bf16.msra.mxu0 %v6485_v22  ;;  %5274 = vmatpush1.bf16.msra.mxu1 %v6751_v6 }
 0x6e3   :  { %2220 = vmatprep.subr.bf16.mxu0 %v5842_v17  ;;  %2293 = vmatprep.subr.bf16.mxu1 %v5845_v21  ;;  %v5882_v17 = vld [vmem:[%s8493_s5 + $0xe0] ss:$16 sps:$4 sm:$0xff]   ;;  %v5885_v21 = vld [vmem:[%s8493_s5 + $0xe8] ss:$16 sps:$4 sm:$0xff]  }
 0x798   :  { %v1668_v27 = vpop.f32.mrb[12].mxu0  ;;  %v1739_v32 = vpop.f32.mrb[44].mxu1 }
 0x799   :  { %v1744_v40 = vadd.f32 %v1668_v27, %v8552_v37  ;;  %v1746_v49 = vadd.f32 %v1739_v32, %v8553_v48  ;;  %v1670_v58 = vpop.f32.mrb[13].mxu0  ;;  %v1741_v60 = vpop.f32.mrb[45].mxu1  ;;  %v8557_v27 = vld [vmem:[#allocation4_spill] sm:$0xff]  ;;  %v8558_v32 = vmov 1.0|1.0  }
 0x79a   :  { %v1745_v8 = vadd.f32 %v1670_v58, %v8554_v5  ;;  %v1747_v16 = vadd.f32 %v1741_v60, %v8555_v14  ;;  %vm1979_vm12 = vcmp.eq.s32.totalorder %v1959_v38, %v8557_v27  ;;  %vm1978_vm13 = vcmp.eq.s32.totalorder %v1956_v59, %v8557_v27  ;;  %v1965_v37 = vpop.permute.xlu1 %1964  ;;  %v2403_v5 = vld [vmem:[%s8494_s6 + $0x8] sm:$0xff]  ;;  %v2405_v14 = vld [vmem:[%s8494_s6 + $0x18] sm:$0xff] }
 0x79b   :  { %v4632_v22 = vmul.f32 -1.442695, %v1744_v40  ;;  %vm4678_vm14 = vmpackc.low %vm1979_vm12, %vm1978_vm13  ;;  %v1962_v40 = vpop.permute.xlu0 %1961  ;;  %vm1981_vm15 = vcmp.eq.s32.totalorder %v1965_v37, %v8557_v27  ;;  %v2437_v38 = vld [vmem:[%s8494_s6 + $0x118] sm:$0xff]  ;;  %v2436_v37 = vld [vmem:[%s8494_s6 + $0x110] sm:$0xff] }
 0x79c   :  { %v4633_v7 = vmul.f32 -1.442695, %v1745_v8  ;;  %v4634_v9 = vmul.f32 -1.442695, %v1747_v16  ;;  %vm1980_vm0 = vcmp.eq.s32.totalorder %v1962_v40, %v8557_v27  ;;  %v2407_v8 = vld [vmem:[%s8494_s6 + $0x28] sm:$0xff]  ;;  %v2440_v40 = vld [vmem:[%s8494_s6 + $0x130] sm:$0xff] }
 0x79d   :  { %5992 = vpow2.f32 %v4632_v22  ;;  %vm4680_vm1 = vmpackc.low %vm1981_vm15, %vm1980_vm0  ;;  %v7233_v16 = vpack.c.bf16 %v2407_v8, %v2403_v5  ;;  %v2402_v22 = vld [vmem:[%s8494_s6] sm:$0xff]  ;;  %v2445_v5 = vld [vmem:[%s8494_s6 + $0x158] sm:$0xff] }
 0x79e   :  { %5994 = vpow2.f32 %v4633_v7  ;;  %v1971_v48 = vpop.permute.xlu1 %1970  ;;  %v2406_v7 = vld [vmem:[%s8494_s6 + $0x20] sm:$0xff] }
 0x79f   :  { %5996 = vpow2.f32 %v4634_v9  ;;  %vm1983_vm2 = vcmp.eq.s32.totalorder %v1971_v48, %v8557_v27  ;;  %v2409_v9 = vld [vmem:[%s8494_s6 + $0x38] sm:$0xff] }
 0x7a0   :  { %5998 = vtanh.f32 %v1746_v49  ;;  %v1968_v49 = vpop.permute.xlu0 %1967 }
 0x7a1   :  { %vm1982_vm3 = vcmp.eq.s32.totalorder %v1968_v49, %v8557_v27  ;;  %v7399_v49 = vpack.c.bf16 %v2440_v40, %v2436_v37  ;;  %v8560_v37 = vld [vmem:[#allocation22_spill] sm:$0xff] }
 0x7a2   :  { %vm4682_vm4 = vmpackc.low %vm1983_vm2, %vm1982_vm3  ;;  %v1977_v58 = vpop.permute.xlu1 %1976 }
 0x7a3   :  { %vm1985_vm5 = vcmp.eq.s32.totalorder %v1977_v58, %v8557_v27  ;;  %v2443_v58 = vld [vmem:[%s8494_s6 + $0x148] sm:$0xff] }
 0x7a4   :  { %v1974_v60 = vpop.permute.xlu0 %1973 }
 0x7a5   :  { %vm1984_vm6 = vcmp.eq.s32.totalorder %v1974_v60, %v8557_v27  ;;  %v2447_v60 = vld [vmem:[%s8494_s6 + $0x168] sm:$0xff] }
 0x7a6   :  { %vm4684_vm7 = vmpackc.low %vm1985_vm5, %vm1984_vm6  ;;  %v7412_v8 = vpack.c.bf16 %v2447_v60, %v2443_v58 }
 0x7a7   :  { %v5993_v18 = vpop.eup %5992 }
 0x7a8   :  { %v5995_v19 = vpop.eup %5994  ;;  %v1751_v29 = vadd.f32 1.0, %v5993_v18  ;;  %v7244_v18 = vpack.c.bf16 %v2406_v7, %v2402_v22  ;;  %v2446_v22 = vld [vmem:[%s8494_s6 + $0x160] sm:$0xff]  ;;  %v2449_v7 = vld [vmem:[%s8494_s6 + $0x178] sm:$0xff] }
 0x7a9   :  { %v1757_v31 = vadd.f32 1.0, %v5995_v19  ;;  %v5997_v39 = vpop.eup %5996  ;;  %v7246_v19 = vpack.c.bf16 %v2409_v9, %v2405_v14  ;;  %v2442_v14 = vld [vmem:[%s8494_s6 + $0x140] sm:$0xff] }
 0x7aa   :  { %6000 = vrcp.f32 %v1751_v29  ;;  %v5999_v41 = vpop.eup %5998  ;;  %v1764_v56 = vadd.f32 1.0, %v5997_v39  ;;  %v2404_v29 = vld [vmem:[%s8494_s6 + $0x10] sm:$0xff]  ;;  %v7424_v9 = vpack.c.bf16 %v2446_v22, %v2442_v14  ;;  %v8562_v22 = vld [vmem:[#allocation23_spill] sm:$0xff] }
 0x7ab   :  { %6002 = vrcp.f32 %v1757_v31  ;;  %v2408_v31 = vld [vmem:[%s8494_s6 + $0x30] sm:$0xff] }
 0x7ac   :  { %6004 = vrcp.f32 %v1764_v56  ;;  %v7255_v39 = vpack.c.bf16 %v2408_v31, %v2404_v29  ;;  %v2410_v56 = vld [vmem:[%s8494_s6 + $0x40] sm:$0xff]  ;;  %v7426_v29 = vpack.c.bf16 %v2449_v7, %v2445_v5  ;;  %v2444_v31 = vld [vmem:[%s8494_s6 + $0x150] sm:$0xff] }
 0x7ad   :  { %v8561_v5 = vld [vmem:[#allocation14_spill] sm:$0xff] }
 0x7b4   :  { %v6001_v46 = vpop.eup %6000 }
 0x7b5   :  { %v6003_v47 = vpop.eup %6002  ;;  %v1768_v55 = vmul.f32 %v6001_v46, %v5999_v41  ;;  %v2411_v41 = vld [vmem:[%s8494_s6 + $0x48] sm:$0xff] }
 0x7b6   :  { %v1767_v63 = vmul.f32 %v6003_v47, %v7059_v52  ;;  %v6005_v6 = vpop.eup %6004  ;;  %v5884_v52 = vld [vmem:[%s8493_s5 + $0xe4] ss:$16 sps:$4 sm:$0xff]   ;;  %v2415_v46 = vld [vmem:[%s8494_s6 + $0x68] sm:$0xff]  ;;  %v2413_v47 = vld [vmem:[%s8494_s6 + $0x58] sm:$0xff] }
 0x7b8   :  { %v7105_v2 = vadd.f32 %v1768_v55, %v1767_v63  ;;  %v7269_v55 = vpack.c.bf16 %v2415_v46, %v2411_v41  ;;  %v2414_v63 = vld [vmem:[%s8494_s6 + $0x60] sm:$0xff]  ;;  %v2448_v41 = vld [vmem:[%s8494_s6 + $0x170] sm:$0xff] }
 0x7b9   :  { %v7435_v46 = vpack.c.bf16 %v2448_v41, %v2444_v31 }
 0x7ba   :  { %6006 = vtanh.f32 %v7105_v2 }
 0x7c4   :  { %v6007_v33 = vpop.eup %6006 }
 0x7c5   :  { %v1771_v54 = vmul.f32 %v6007_v33, %v6005_v6  ;;  %v2417_v6 = vld [vmem:[%s8494_s6 + $0x78] sm:$0xff]  ;;  %v7280_v33 = vpack.c.bf16 %v2414_v63, %v2410_v56  ;;  %v2455_v56 = vld [vmem:[%s8494_s6 + $0x1a8] sm:$0xff] }
 0x7c7   :  { %1841 = vmatmul.mubr.f32.vlgmr.msra.gmra.mrb[14].mxu0 %v1771_v54  ;;  %1912 = vmatmul.mubr.f32.vlgmr.msra.gmra.mrb[46].mxu1 %v1771_v54  ;;  %v2416_v54 = vld [vmem:[%s8494_s6 + $0x70] sm:$0xff] }
 0x7c8   :  { %2221 = vmatpush1.bf16.msra.mxu0 %v5840_v20  ;;  %2294 = vmatpush1.bf16.msra.mxu1 %v5843_v34  ;;  %v7282_v20 = vpack.c.bf16 %v2417_v6, %v2413_v47  ;;  %v2412_v34 = vld [vmem:[%s8494_s6 + $0x50] sm:$0xff]  ;;  %v2451_v47 = vld [vmem:[%s8494_s6 + $0x188] sm:$0xff]  ;;  %v2453_v6 = vld [vmem:[%s8494_s6 + $0x198] sm:$0xff] }
 0x7c9   :  { %2222 = vmatprep.subr.bf16.mxu0 %v5848_v42  ;;  %2295 = vmatprep.subr.bf16.mxu1 %v5851_v57  ;;  %v7291_v42 = vpack.c.bf16 %v2416_v54, %v2412_v34  ;;  %v2419_v57 = vld [vmem:[%s8494_s6 + $0x88] sm:$0xff]  ;;  %v7445_v63 = vpack.c.bf16 %v2455_v56, %v2451_v47  ;;  %v2457_v34 = vld [vmem:[%s8494_s6 + $0x1b8] sm:$0xff]  ;;  %v2450_v54 = vld [vmem:[%s8494_s6 + $0x180] sm:$0xff] }
 0x7ca   :  { %2252 = vmatprep.mubr.bf16.mxu0 %v8556_v24  ;;  %2325 = vmatprep.mubr.bf16.mxu1 %v8556_v24 }
 0x7cc   :  { %2223 = vmatpush1.bf16.msra.mxu0 %v5846_v13  ;;  %2296 = vmatpush1.bf16.msra.mxu1 %v5849_v11  ;;  %v2423_v13 = vld [vmem:[%s8494_s6 + $0xa8] sm:$0xff]  ;;  %v2421_v11 = vld [vmem:[%s8494_s6 + $0x98] sm:$0xff] }
 0x7cd   :  { %2224 = vmatprep.subr.bf16.mxu0 %v5854_v62  ;;  %2297 = vmatprep.subr.bf16.mxu1 %v5857_v28  ;;  %v7305_v62 = vpack.c.bf16 %v2423_v13, %v2419_v57  ;;  %v2418_v28 = vld [vmem:[%s8494_s6 + $0x80] sm:$0xff]  ;;  %v7459_v13 = vpack.c.bf16 %v2457_v34, %v2453_v6 }
 0x7ce   :  { %v2454_v57 = vld [vmem:[%s8494_s6 + $0x1a0] sm:$0xff] }
 0x7d0   :  { %2225 = vmatpush1.bf16.msra.mxu0 %v5852_v10  ;;  %2298 = vmatpush1.bf16.msra.mxu1 %v5855_v36  ;;  %v2425_v10 = vld [vmem:[%s8494_s6 + $0xb8] sm:$0xff] }
 0x7d1   :  { %2226 = vmatprep.subr.bf16.mxu0 %v5860_v44  ;;  %2299 = vmatprep.subr.bf16.mxu1 %v5863_v35  ;;  %v7318_v44 = vpack.c.bf16 %v2425_v10, %v2421_v11  ;;  %v2420_v35 = vld [vmem:[%s8494_s6 + $0x90] sm:$0xff] }
 0x7d2   :  { %v2452_v11 = vld [vmem:[%s8494_s6 + $0x190] sm:$0xff] }
 0x7d4   :  { %2227 = vmatpush1.bf16.msra.mxu0 %v5858_v23  ;;  %2300 = vmatpush1.bf16.msra.mxu1 %v5861_v43  ;;  %v2424_v23 = vld [vmem:[%s8494_s6 + $0xb0] sm:$0xff] }
 0x7d5   :  { %2228 = vmatprep.subr.bf16.mxu0 %v5866_v15  ;;  %2301 = vmatprep.subr.bf16.mxu1 %v5869_v12  ;;  %v7327_v43 = vpack.c.bf16 %v2424_v23, %v2420_v35  ;;  %v2427_v15 = vld [vmem:[%s8494_s6 + $0xc8] sm:$0xff] }
 0x7d6   :  { %v2431_v12 = vld [vmem:[%s8494_s6 + $0xe8] sm:$0xff] }
 0x7d7   :  { %v2459_v35 = vld [vmem:[%s8494_s6 + $0x1c8] sm:$0xff] }
 0x7d8   :  { %2229 = vmatpush1.bf16.msra.mxu0 %v5864_v50  ;;  %2302 = vmatpush1.bf16.msra.mxu1 %v5867_v1  ;;  %v2429_v50 = vld [vmem:[%s8494_s6 + $0xd8] sm:$0xff]  ;;  %v7341_v1 = vpack.c.bf16 %v2431_v12, %v2427_v15  ;;  %v2463_v23 = vld [vmem:[%s8494_s6 + $0x1e8] sm:$0xff] }
 0x7d9   :  { %2230 = vmatprep.subr.bf16.mxu0 %v5872_v26  ;;  %2303 = vmatprep.subr.bf16.mxu1 %v5875_v30  ;;  %v2426_v26 = vld [vmem:[%s8494_s6 + $0xc0] sm:$0xff]  ;;  %v2461_v15 = vld [vmem:[%s8494_s6 + $0x1d8] sm:$0xff]  ;;  %v7484_v12 = vpack.c.bf16 %v2463_v23, %v2459_v35 }
 0x7da   :  { %v2430_v30 = vld [vmem:[%s8494_s6 + $0xe0] sm:$0xff] }
 0x7dc   :  { %2231 = vmatpush1.bf16.msra.mxu0 %v5870_v51  ;;  %2304 = vmatpush1.bf16.msra.mxu1 %v5873_v45  ;;  %v2433_v51 = vld [vmem:[%s8494_s6 + $0xf8] sm:$0xff]  ;;  %v7352_v45 = vpack.c.bf16 %v2430_v30, %v2426_v26  ;;  %v2462_v26 = vld [vmem:[%s8494_s6 + $0x1e0] sm:$0xff] }
 0x7dd   :  { %2232 = vmatprep.subr.bf16.mxu0 %v5878_v53  ;;  %2305 = vmatprep.subr.bf16.mxu1 %v5881_v25  ;;  %v7354_v53 = vpack.c.bf16 %v2433_v51, %v2429_v50  ;;  %v2428_v25 = vld [vmem:[%s8494_s6 + $0xd0] sm:$0xff]  ;;  %v2458_v50 = vld [vmem:[%s8494_s6 + $0x1c0] sm:$0xff]  ;;  %v2465_v30 = vld [vmem:[%s8494_s6 + $0x1f8] sm:$0xff] }
 0x7de   :  { %v7496_v51 = vpack.c.bf16 %v2462_v26, %v2458_v50  ;;  %v2038_v26 = vld [vmem:[%s8495_s7] sm:$0xf] }
 0x7e0   :  { %2233 = vmatpush1.bf16.msra.mxu0 %v5876_v61  ;;  %2306 = vmatpush1.bf16.msra.mxu1 %v5879_v0  ;;  %v2432_v61 = vld [vmem:[%s8494_s6 + $0xf0] sm:$0xff] }
 0x7e1   :  { %2234 = vmatprep.subr.bf16.mxu0 %v5884_v52  ;;  %2307 = vmatprep.subr.bf16.mxu1 %v5887_v3  ;;  %v7363_v0 = vpack.c.bf16 %v2432_v61, %v2428_v25  ;;  %v2435_v52 = vld [vmem:[%s8494_s6 + $0x108] sm:$0xff]  ;;  %v7498_v25 = vpack.c.bf16 %v2465_v30, %v2461_v15  ;;  %v2460_v61 = vld [vmem:[%s8494_s6 + $0x1d0] sm:$0xff] }
 0x7e2   :  { %v2439_v3 = vld [vmem:[%s8494_s6 + $0x128] sm:$0xff] }
 0x7e3   :  { %v7377_v59 = vpack.c.bf16 %v2439_v3, %v2435_v52  ;;  %v2464_v52 = vld [vmem:[%s8494_s6 + $0x1f0] sm:$0xff] }
 0x7e4   :  { %2235 = vmatpush1.bf16.msra.mxu0 %v5882_v17  ;;  %2308 = vmatpush1.bf16.msra.mxu1 %v5885_v21  ;;  %v2434_v17 = vld [vmem:[%s8494_s6 + $0x100] sm:$0xff]  ;;  %v7507_v3 = vpack.c.bf16 %v2464_v52, %v2460_v61 }
 0x7e5   :  { %5276 = vmatprep.subr.bf16.mxu0 %v7233_v16  ;;  %5308 = vmatprep.subr.bf16.mxu1 %v7246_v19  ;;  %v2438_v21 = vld [vmem:[%s8494_s6 + $0x120] sm:$0xff] }
 0x7e6   :  { %v7385_v27 = vpack.c.bf16 %v2438_v21, %v2434_v17  ;;  %v8559_v21 = vld [vmem:[#allocation13_spill] sm:$0xff] }
 0x7e7   :  { %4679 = vmatmul.mubr.msk.bf16.vlgmr.msra.gmra.mrb[16].mxu0 %vm4678_vm14, %v8558_v32  ;;  %4687 = vmatmul.mubr.msk.bf16.vlgmr.msra.gmra.mrb[48].mxu1 %vm4678_vm14, %v8558_v32 }
 0x7e8   :  { %2262 = vmatprep.mubr.bf16.mxu0 %v8556_v24  ;;  %2335 = vmatprep.mubr.bf16.mxu1 %v8556_v24 }
 0x7e9   :  { %5278 = vmatpush1.bf16.msra.mxu0 %v7244_v18  ;;  %5310 = vmatpush1.bf16.msra.mxu1 %v7255_v39 }
 0x7ea   :  { %5280 = vmatprep.subr.bf16.mxu0 %v7269_v55  ;;  %5312 = vmatprep.subr.bf16.mxu1 %v7282_v20 }
 0x7ed   :  { %5282 = vmatpush1.bf16.msra.mxu0 %v7280_v33  ;;  %5314 = vmatpush1.bf16.msra.mxu1 %v7291_v42 }
 0x7ee   :  { %5284 = vmatprep.subr.bf16.mxu0 %v7305_v62  ;;  %5316 = vmatprep.subr.bf16.mxu1 %v7318_v44 }
 0x7ef   :  { %4681 = vmatmul.mubr.msk.bf16.gmra.mrb[20].mxu0 %vm4680_vm1, %v8558_v32  ;;  %4689 = vmatmul.mubr.msk.bf16.gmra.mrb[52].mxu1 %vm4680_vm1, %v8558_v32 }
 0x7f0   :  { %2272 = vmatprep.mubr.bf16.mxu0 %v8556_v24  ;;  %2345 = vmatprep.mubr.bf16.mxu1 %v8556_v24 }
 0x7f1   :  { %5318 = vmatpush1.bf16.msra.mxu1 %v7327_v43 }
 0x7f2   :  { %5320 = vmatprep.subr.bf16.mxu1 %v7354_v53 }
 0x7f5   :  { %5322 = vmatpush1.bf16.msra.mxu1 %v7363_v0 }
 0x7f7   :  { %4683 = vmatmul.mubr.msk.bf16.gmra.mrb[24].mxu0 %vm4682_vm4, %v8558_v32  ;;  %4691 = vmatmul.mubr.msk.bf16.gmra.mrb[56].mxu1 %vm4682_vm4, %v8558_v32 }
 0x7f8   :  { %2282 = vmatprep.mubr.bf16.mxu0 %v8556_v24  ;;  %2355 = vmatprep.mubr.bf16.mxu1 %v8556_v24  ;;  %v2422_v24 = vld [vmem:[%s8494_s6 + $0xa0] sm:$0xff] }
 0x7f9   :  { %v7316_v36 = vpack.c.bf16 %v2422_v24, %v2418_v28  ;;  %v7466_v28 = vpack.c.bf16 %v2454_v57, %v2450_v54  ;;  %v2456_v24 = vld [vmem:[%s8494_s6 + $0x1b0] sm:$0xff] }
 0x7fa   :  { %v7472_v10 = vpack.c.bf16 %v2456_v24, %v2452_v11 }
 0x7fb   :  { %5286 = vmatpush1.bf16.msra.mxu0 %v7316_v36 }
 0x7fc   :  { %5288 = vmatprep.subr.bf16.mxu0 %v7341_v1 }
 0x7ff   :  { %4685 = vmatmul.mubr.msk.bf16.gmra.mrb[28].mxu0 %vm4684_vm7, %v8558_v32  ;;  %4693 = vmatmul.mubr.msk.bf16.gmra.mrb[60].mxu1 %vm4684_vm7, %v8558_v32  ;;  %v2441_v32 = vld [vmem:[%s8494_s6 + $0x138] sm:$0xff] }
 0x800   :  { %2530 = vmatprep.mubr.f32.mxu0 %v8541_v4  ;;  %2601 = vmatprep.mubr.f32.mxu1 %v8541_v4  ;;  %v7397_v48 = vpack.c.bf16 %v2441_v32, %v2437_v38 }
 0x801   :  { %5290 = vmatpush1.bf16.msra.mxu0 %v7352_v45 }
 0x802   :  { %5292 = vmatprep.subr.bf16.mxu0 %v7377_v59  ;;  %5324 = vmatprep.subr.bf16.mxu1 %v7397_v48 }
 0x803   :  { %5326 = vmatpush1.bf16.msra.mxu1 %v7399_v49 }
 0x804   :  { %5328 = vmatprep.subr.bf16.mxu1 %v7426_v29 }
 0x805   :  { %5294 = vmatpush1.bf16.msra.mxu0 %v7385_v27 }
 0x806   :  { %5296 = vmatprep.subr.bf16.mxu0 %v7412_v8 }
 0x807   :  { %5330 = vmatpush1.bf16.msra.mxu1 %v7435_v46 }
 0x808   :  { %5332 = vmatprep.subr.bf16.mxu1 %v7459_v13 }
 0x809   :  { %5298 = vmatpush1.bf16.msra.mxu0 %v7424_v9 }
 0x80a   :  { %5300 = vmatprep.subr.bf16.mxu0 %v7445_v63 }
 0x80b   :  { %5334 = vmatpush1.bf16.msra.mxu1 %v7472_v10 }
 0x80c   :  { %5336 = vmatprep.subr.bf16.mxu1 %v7498_v25 }
 0x80d   :  { %5302 = vmatpush1.bf16.msra.mxu0 %v7466_v28 }
 0x80e   :  { %5304 = vmatprep.subr.bf16.mxu0 %v7484_v12 }
 0x80f   :  { %5338 = vmatpush1.bf16.msra.mxu1 %v7507_v3 }
 0x810   :  { %5372 = vmatprep.subr.bf16.mxu1 %v7246_v19 }
 0x811   :  { %5306 = vmatpush1.bf16.msra.mxu0 %v7496_v51 }
 0x812   :  { %5340 = vmatprep.subr.bf16.mxu0 %v7233_v16 }
 0x89a   :  { %v1842_v38 = vpop.f32.mrb[14].mxu0  ;;  %v1913_v17 = vpop.f32.mrb[46].mxu1 }
 0x89b   :  { %v1918_v32 = vadd.f32 %v1842_v38, %v8559_v21  ;;  %v1920_v40 = vadd.f32 %v1913_v17, %v8560_v37  ;;  %v1844_v58 = vpop.f32.mrb[15].mxu0  ;;  %v1915_v60 = vpop.f32.mrb[47].mxu1  ;;  %v8563_v38 = vld [vmem:[#allocation5_spill] sm:$0xff] }
 0x89c   :  { %v1919_v14 = vadd.f32 %v1844_v58, %v8561_v5  ;;  %v1921_v7 = vadd.f32 %v1915_v60, %v8562_v22  ;;  %v8564_v17 = vsub.s32 0, %v8563_v38  ;;  %v8566_v58 = vsub.s32 1, %v8563_v38 }
 0x89d   :  { %v4635_v31 = vmul.f32 -1.442695, %v1918_v32  ;;  %v8565_v32 = vsub.s32 2, %v8563_v38  ;;  %v8567_v5 = vsub.s32 3, %v8563_v38 }
 0x89e   :  { %v4636_v41 = vmul.f32 -1.442695, %v1919_v14  ;;  %v4637_v47 = vmul.f32 -1.442695, %v1921_v7  ;;  %v7530_v21 = vrot.slane %v2038_v26, %v8564_v17  ;;  %v7543_v60 = vrot.slane %v2038_v26, %v8566_v58 }
 0x89f   :  { %6008 = vpow2.f32 %v4635_v31  ;;  %v7534_v37 = vrot.slane %v2038_v26, %v8565_v32  ;;  %v7547_v14 = vrot.slane %v2038_v26, %v8567_v5 }
 0x8a0   :  { %6010 = vpow2.f32 %v4636_v41 }
 0x8a1   :  { %6012 = vpow2.f32 %v4637_v47 }
 0x8a2   :  { %6014 = vtanh.f32 %v1920_v40 }
 0x8a9   :  { %v6009_v56 = vpop.eup %6008 }
 0x8aa   :  { %v6011_v6 = vpop.eup %6010  ;;  %v1925_v34 = vadd.f32 1.0, %v6009_v56 }
 0x8ab   :  { %v1931_v54 = vadd.f32 1.0, %v6011_v6  ;;  %v6013_v57 = vpop.eup %6012 }
 0x8ac   :  { %6016 = vrcp.f32 %v1925_v34  ;;  %v6015_v11 = vpop.eup %6014  ;;  %v1938_v15 = vadd.f32 1.0, %v6013_v57 }
 0x8ad   :  { %6018 = vrcp.f32 %v1931_v54 }
 0x8ae   :  { %6020 = vrcp.f32 %v1938_v15 }
 0x8b6   :  { %v6017_v24 = vpop.eup %6016 }
 0x8b7   :  { %v6019_v35 = vpop.eup %6018  ;;  %v1942_v23 = vmul.f32 %v6017_v24, %v6015_v11 }
 0x8b8   :  { %v1941_v50 = vmul.f32 %v6019_v35, %v7105_v2  ;;  %v6021_v17 = vpop.eup %6020 }
 0x8ba   :  { %v7522_v30 = vadd.f32 %v1942_v23, %v1941_v50  ;;  %v7524_v61 = vpop.f32.mrb[16].mxu0  ;;  %v7526_v52 = vpop.f32.mrb[48].mxu1 }
 0x8bb   :  { %v7536_v2 = vpop.f32.mrb[17].mxu0  ;;  %v7538_v40 = vpop.f32.mrb[49].mxu1 }
 0x8bc   :  { %6022 = vtanh.f32 %v7522_v30  ;;  %v2258_v22 = vpop.f32.mrb[18].mxu0  ;;  %v2331_v7 = vpop.f32.mrb[50].mxu1 }
 0x8bd   :  { %v7550_v31 = vadd.f32 %v2258_v22, %v7530_v21  ;;  %v7553_v41 = vadd.f32 %v2331_v7, %v7534_v37  ;;  %v2260_v47 = vpop.f32.mrb[19].mxu0  ;;  %v2333_v56 = vpop.f32.mrb[51].mxu1 }
 0x8be   :  { %v7556_v6 = vadd.f32 %v2260_v47, %v7543_v60  ;;  %v7559_v34 = vadd.f32 %v2333_v56, %v7547_v14 }
 0x8c2   :  { %v2264_v54 = vpop.f32.mrb[20].mxu0  ;;  %v2337_v57 = vpop.f32.mrb[52].mxu1 }
 0x8c3   :  { %v7562_v11 = vadd.f32 %v2264_v54, %v7530_v21  ;;  %v7565_v24 = vadd.f32 %v2337_v57, %v7534_v37  ;;  %v2266_v35 = vpop.f32.mrb[21].mxu0  ;;  %v2339_v23 = vpop.f32.mrb[53].mxu1 }
 0x8c4   :  { %v7568_v15 = vadd.f32 %v2266_v35, %v7543_v60  ;;  %v7571_v50 = vadd.f32 %v2339_v23, %v7547_v14  ;;  %v2268_v26 = vpop.f32.mrb[22].mxu0  ;;  %v2341_v38 = vpop.f32.mrb[54].mxu1 }
 0x8c5   :  { %v7574_v32 = vadd.f32 %v2268_v26, %v7530_v21  ;;  %v7577_v58 = vadd.f32 %v2341_v38, %v7534_v37  ;;  %v2270_v5 = vpop.f32.mrb[23].mxu0  ;;  %v2343_v22 = vpop.f32.mrb[55].mxu1 }
 0x8c6   :  { %v6023_v7 = vpop.eup %6022  ;;  %v7580_v47 = vadd.f32 %v2270_v5, %v7543_v60  ;;  %v7583_v56 = vadd.f32 %v2343_v22, %v7547_v14 }
 0x8c7   :  { %v1945_v54 = vmul.f32 %v6023_v7, %v6021_v17 }
 0x8c8   :  { %8568 = vst [vmem:[#allocation6_spill] sm:$0xff] %v7580_v47  ;;  %8569 = vst [vmem:[#allocation15_spill] sm:$0xff] %v7583_v56 }
 0x8c9   :  { %2531 = vmatmul.mubr.f32.vlgmr.msra.gmra.mrb[32].mxu0 %v1945_v54  ;;  %2602 = vmatmul.mubr.f32.vlgmr.msra.gmra.mrb[64].mxu1 %v1945_v54 }
 0x8ca   :  { %v2274_v57 = vpop.f32.mrb[24].mxu0  ;;  %v2347_v35 = vpop.f32.mrb[56].mxu1  ;;  %5342 = vmatpush1.bf16.msra.mxu0 %v7244_v18  ;;  %5374 = vmatpush1.bf16.msra.mxu1 %v7255_v39 }
 0x8cb   :  { %v7588_v23 = vadd.f32 %v2274_v57, %v7530_v21  ;;  %v7591_v26 = vadd.f32 %v2347_v35, %v7534_v37  ;;  %v2276_v38 = vpop.f32.mrb[25].mxu0  ;;  %v2349_v5 = vpop.f32.mrb[57].mxu1  ;;  %5344 = vmatprep.subr.bf16.mxu0 %v7269_v55  ;;  %5376 = vmatprep.subr.bf16.mxu1 %v7282_v20 }
 0x8cc   :  { %v7596_v17 = vadd.f32 %v2276_v38, %v7543_v60  ;;  %v7599_v22 = vadd.f32 %v2349_v5, %v7547_v14  ;;  %v2278_v7 = vpop.f32.mrb[26].mxu0  ;;  %v2351_v54 = vpop.f32.mrb[58].mxu1  ;;  %2769 = vmatprep.mubr.f32.mxu0 %v8541_v4  ;;  %2840 = vmatprep.mubr.f32.mxu1 %v8541_v4 }
 0x8cd   :  { %8570 = vst [vmem:[#allocation7_spill] sm:$0xff] %v7588_v23  ;;  %8571 = vst [vmem:[#allocation16_spill] sm:$0xff] %v7591_v26  ;;  %v7604_v57 = vadd.f32 %v2278_v7, %v7530_v21  ;;  %v7607_v35 = vadd.f32 %v2351_v54, %v7534_v37  ;;  %v2280_v26 = vpop.f32.mrb[27].mxu0  ;;  %v2353_v23 = vpop.f32.mrb[59].mxu1 }
 0x8ce   :  { %8572 = vst [vmem:[#allocation8_spill] sm:$0xff] %v7596_v17  ;;  %8573 = vst [vmem:[#allocation17_spill] sm:$0xff] %v7599_v22  ;;  %v7610_v38 = vadd.f32 %v2280_v26, %v7543_v60  ;;  %v7613_v5 = vadd.f32 %v2353_v23, %v7547_v14  ;;  %5346 = vmatpush1.bf16.msra.mxu0 %v7280_v33  ;;  %5378 = vmatpush1.bf16.msra.mxu1 %v7291_v42 }
 0x8cf   :  { %8574 = vst [vmem:[#allocation9_spill] sm:$0xff] %v7604_v57  ;;  %8575 = vst [vmem:[#allocation18_spill] sm:$0xff] %v7607_v35  ;;  %5348 = vmatprep.subr.bf16.mxu0 %v7305_v62  ;;  %5380 = vmatprep.subr.bf16.mxu1 %v7318_v44 }
 0x8d0   :  { %8576 = vst [vmem:[#allocation10_spill] sm:$0xff] %v7610_v38  ;;  %8577 = vst [vmem:[#allocation19_spill] sm:$0xff] %v7613_v5 }
 0x8d2   :  { %v2284_v7 = vpop.f32.mrb[28].mxu0  ;;  %v2357_v57 = vpop.f32.mrb[60].mxu1  ;;  %5350 = vmatpush1.bf16.msra.mxu0 %v7316_v36  ;;  %5382 = vmatpush1.bf16.msra.mxu1 %v7327_v43 }
 0x8d3   :  { %v7622_v26 = vadd.f32 %v2284_v7, %v7530_v21  ;;  %v7625_v23 = vadd.f32 %v2357_v57, %v7534_v37  ;;  %v2286_v54 = vpop.f32.mrb[29].mxu0  ;;  %v2359_v5 = vpop.f32.mrb[61].mxu1  ;;  %5352 = vmatprep.subr.bf16.mxu0 %v7341_v1  ;;  %5384 = vmatprep.subr.bf16.mxu1 %v7354_v53 }
 0x8d4   :  { %v7630_v38 = vadd.f32 %v2286_v54, %v7543_v60  ;;  %v7633_v35 = vadd.f32 %v2359_v5, %v7547_v14  ;;  %v2288_v22 = vpop.f32.mrb[30].mxu0  ;;  %v2361_v17 = vpop.f32.mrb[62].mxu1  ;;  %v2257_v5 = vadd.f32 %v7536_v2, %v7543_v60 }
 0x8d5   :  { %8578 = vst [vmem:[#allocation11_spill] sm:$0xff] %v7622_v26  ;;  %8579 = vst [vmem:[#allocation20_spill] sm:$0xff] %v7625_v23  ;;  %v7636_v7 = vadd.f32 %v2288_v22, %v7530_v21  ;;  %v7639_v57 = vadd.f32 %v2361_v17, %v7534_v37  ;;  %v2290_v23 = vpop.f32.mrb[31].mxu0  ;;  %v2363_v26 = vpop.f32.mrb[63].mxu1  ;;  %v2255_v17 = vadd.f32 %v7524_v61, %v7530_v21 }
 0x8d6   :  { %8580 = vst [vmem:[#allocation12_spill] sm:$0xff] %v7630_v38  ;;  %8581 = vst [vmem:[#allocation21_spill] sm:$0xff] %v7633_v35  ;;  %v7642_v56 = vadd.f32 %v2290_v23, %v7543_v60  ;;  %v7645_v47 = vadd.f32 %v2363_v26, %v7547_v14  ;;  %5354 = vmatpush1.bf16.msra.mxu0 %v7352_v45  ;;  %5386 = vmatpush1.bf16.msra.mxu1 %v7363_v0 }
 0x8d7   :  { %8582 = vst [vmem:[#allocation4_spill] sm:$0xff] %v7636_v7  ;;  %8583 = vst [vmem:[#allocation13_spill] sm:$0xff] %v7639_v57  ;;  %5356 = vmatprep.subr.bf16.mxu0 %v7377_v59  ;;  %5388 = vmatprep.subr.bf16.mxu1 %v7397_v48  ;;  %v2328_v22 = vadd.f32 %v7526_v52, %v7534_v37  ;;  %v2330_v26 = vadd.f32 %v7538_v40, %v7547_v14 }
 0x8d8   :  { %8584 = vst [vmem:[#allocation22_spill] sm:$0xff] %v7642_v56  ;;  %8585 = vst [vmem:[#allocation14_spill] sm:$0xff] %v7645_v47 }
 0x8da   :  { %5358 = vmatpush1.bf16.msra.mxu0 %v7385_v27  ;;  %5390 = vmatpush1.bf16.msra.mxu1 %v7399_v49 }
 0x8db   :  { %5360 = vmatprep.subr.bf16.mxu0 %v7412_v8  ;;  %5392 = vmatprep.subr.bf16.mxu1 %v7426_v29 }
 0x8de   :  { %5362 = vmatpush1.bf16.msra.mxu0 %v7424_v9  ;;  %5394 = vmatpush1.bf16.msra.mxu1 %v7435_v46 }
 0x8df   :  { %5364 = vmatprep.subr.bf16.mxu0 %v7445_v63  ;;  %5396 = vmatprep.subr.bf16.mxu1 %v7459_v13 }
 0x8e2   :  { %5366 = vmatpush1.bf16.msra.mxu0 %v7466_v28  ;;  %5398 = vmatpush1.bf16.msra.mxu1 %v7472_v10 }
 0x8e3   :  { %5368 = vmatprep.subr.bf16.mxu0 %v7484_v12  ;;  %5400 = vmatprep.subr.bf16.mxu1 %v7498_v25 }
 0x8e6   :  { %5370 = vmatpush1.bf16.msra.mxu0 %v7496_v51  ;;  %5402 = vmatpush1.bf16.msra.mxu1 %v7507_v3 }
 0x8e7   :  { %5404 = vmatprep.subr.bf16.mxu0 %v7233_v16  ;;  %5436 = vmatprep.subr.bf16.mxu1 %v7246_v19 }
 0x99c   :  { %v2532_v23 = vpop.f32.mrb[32].mxu0  ;;  %v2603_v54 = vpop.f32.mrb[64].mxu1 }
 0x99d   :  { %v2608_v47 = vadd.f32 %v2532_v23, %v2255_v17  ;;  %v2610_v56 = vadd.f32 %v2603_v54, %v2328_v22  ;;  %v2534_v57 = vpop.f32.mrb[33].mxu0  ;;  %v2605_v16 = vpop.f32.mrb[65].mxu1 }
 0x99e   :  { %v2609_v7 = vadd.f32 %v2534_v57, %v2257_v5  ;;  %v2611_v19 = vadd.f32 %v2605_v16, %v2330_v26  ;;  %v3123_v26 = vld [vmem:[%s8494_s6 + $0x20] sm:$0xff]  ;;  %v3121_v16 = vld [vmem:[%s8494_s6 + $0x10] sm:$0xff] }
 0x99f   :  { %v4694_v35 = vmul.f32 -1.442695, %v2608_v47 }
 0x9a0   :  { %v4695_v38 = vmul.f32 -1.442695, %v2609_v7  ;;  %v4696_v61 = vmul.f32 -1.442695, %v2611_v19  ;;  %v3125_v19 = vld [vmem:[%s8494_s6 + $0x30] sm:$0xff] }
 0x9a1   :  { %6024 = vpow2.f32 %v4694_v35 }
 0x9a2   :  { %6026 = vpow2.f32 %v4695_v38 }
 0x9a3   :  { %6028 = vpow2.f32 %v4696_v61  ;;  %v7760_v61 = vpack.c.bf16 %v3125_v19, %v3121_v16  ;;  %v3153_v19 = vld [vmem:[%s8494_s6 + $0x110] sm:$0xff] }
 0x9a4   :  { %6030 = vtanh.f32 %v2610_v56  ;;  %v3119_v56 = vld [vmem:[%s8494_s6] sm:$0xff] }
 0x9a5   :  { %v7751_v54 = vpack.c.bf16 %v3123_v26, %v3119_v56  ;;  %v3155_v56 = vld [vmem:[%s8494_s6 + $0x120] sm:$0xff] }
 0x9ab   :  { %v6025_v52 = vpop.eup %6024 }
 0x9ac   :  { %v6027_v21 = vpop.eup %6026  ;;  %v2615_v37 = vadd.f32 1.0, %v6025_v52  ;;  %v3128_v52 = vld [vmem:[%s8494_s6 + $0x48] sm:$0xff] }
 0x9ad   :  { %v2621_v2 = vadd.f32 1.0, %v6027_v21  ;;  %v6029_v40 = vpop.eup %6028  ;;  %v3132_v21 = vld [vmem:[%s8494_s6 + $0x68] sm:$0xff] }
 0x9ae   :  { %6032 = vrcp.f32 %v2615_v37  ;;  %v6031_v60 = vpop.eup %6030  ;;  %v2628_v57 = vadd.f32 1.0, %v6029_v40  ;;  %v3130_v37 = vld [vmem:[%s8494_s6 + $0x58] sm:$0xff] }
 0x9af   :  { %6034 = vrcp.f32 %v2621_v2  ;;  %v7774_v2 = vpack.c.bf16 %v3132_v21, %v3128_v52  ;;  %v3134_v40 = vld [vmem:[%s8494_s6 + $0x78] sm:$0xff]  ;;  %v3157_v52 = vld [vmem:[%s8494_s6 + $0x130] sm:$0xff] }
 0x9b0   :  { %6036 = vrcp.f32 %v2628_v57  ;;  %v3129_v57 = vld [vmem:[%s8494_s6 + $0x50] sm:$0xff]  ;;  %v7904_v21 = vpack.c.bf16 %v3157_v52, %v3153_v19 }
 0x9b8   :  { %v6033_v14 = vpop.eup %6032 }
 0x9b9   :  { %v6035_v17 = vpop.eup %6034  ;;  %v2632_v22 = vmul.f32 %v6033_v14, %v6031_v60  ;;  %v3127_v60 = vld [vmem:[%s8494_s6 + $0x40] sm:$0xff] }
 0x9ba   :  { %v2631_v47 = vmul.f32 %v6035_v17, %v7522_v30  ;;  %v6037_v35 = vpop.eup %6036  ;;  %v3120_v30 = vld [vmem:[%s8494_s6 + $0x8] sm:$0xff]  ;;  %v3131_v14 = vld [vmem:[%s8494_s6 + $0x60] sm:$0xff]  ;;  %v7785_v17 = vpack.c.bf16 %v3134_v40, %v3130_v37 }
 0x9bb   :  { %v3160_v37 = vld [vmem:[%s8494_s6 + $0x148] sm:$0xff] }
 0x9bc   :  { %v7676_v7 = vadd.f32 %v2632_v22, %v2631_v47  ;;  %v7787_v22 = vpack.c.bf16 %v3131_v14, %v3127_v60  ;;  %v3133_v47 = vld [vmem:[%s8494_s6 + $0x70] sm:$0xff]  ;;  %v3164_v40 = vld [vmem:[%s8494_s6 + $0x168] sm:$0xff]  ;;  %v3162_v60 = vld [vmem:[%s8494_s6 + $0x158] sm:$0xff] }
 0x9bd   :  { %v7917_v14 = vpack.c.bf16 %v3164_v40, %v3160_v37 }
 0x9be   :  { %6038 = vtanh.f32 %v7676_v7 }
 0x9c8   :  { %v6039_v38 = vpop.eup %6038 }
 0x9c9   :  { %v7679_v5 = vmul.f32 %v6039_v38, %v6037_v35  ;;  %v3136_v35 = vld [vmem:[%s8494_s6 + $0x88] sm:$0xff] }
 0x9ca   :  { %v3140_v38 = vld [vmem:[%s8494_s6 + $0xa8] sm:$0xff] }
 0x9cb   :  { %2770 = vmatmul.mubr.f32.vlgmr.msra.gmra.mrb[34].mxu0 %v7679_v5  ;;  %2841 = vmatmul.mubr.f32.vlgmr.msra.gmra.mrb[66].mxu1 %v7679_v5 }
 0x9cc   :  { %5406 = vmatpush1.bf16.msra.mxu0 %v7244_v18  ;;  %5438 = vmatpush1.bf16.msra.mxu1 %v7255_v39 }
 0x9cd   :  { %5408 = vmatprep.subr.bf16.mxu0 %v7269_v55  ;;  %5440 = vmatprep.subr.bf16.mxu1 %v7282_v20 }
 0x9ce   :  { %3008 = vmatprep.mubr.f32.mxu0 %v8541_v4  ;;  %3079 = vmatprep.mubr.f32.mxu1 %v8541_v4 }
 0x9d0   :  { %5410 = vmatpush1.bf16.msra.mxu0 %v7280_v33  ;;  %5442 = vmatpush1.bf16.msra.mxu1 %v7291_v42 }
 0x9d1   :  { %5412 = vmatprep.subr.bf16.mxu0 %v7305_v62  ;;  %5444 = vmatprep.subr.bf16.mxu1 %v7318_v44 }
 0x9d4   :  { %5414 = vmatpush1.bf16.msra.mxu0 %v7316_v36  ;;  %5446 = vmatpush1.bf16.msra.mxu1 %v7327_v43 }
 0x9d5   :  { %5416 = vmatprep.subr.bf16.mxu0 %v7341_v1  ;;  %5448 = vmatprep.subr.bf16.mxu1 %v7354_v53 }
 0x9d8   :  { %5418 = vmatpush1.bf16.msra.mxu0 %v7352_v45  ;;  %5450 = vmatpush1.bf16.msra.mxu1 %v7363_v0 }
 0x9d9   :  { %5420 = vmatprep.subr.bf16.mxu0 %v7377_v59  ;;  %5452 = vmatprep.subr.bf16.mxu1 %v7397_v48 }
 0x9dc   :  { %5422 = vmatpush1.bf16.msra.mxu0 %v7385_v27  ;;  %5454 = vmatpush1.bf16.msra.mxu1 %v7399_v49 }
 0x9dd   :  { %5424 = vmatprep.subr.bf16.mxu0 %v7412_v8  ;;  %5456 = vmatprep.subr.bf16.mxu1 %v7426_v29 }
 0x9e0   :  { %5426 = vmatpush1.bf16.msra.mxu0 %v7424_v9  ;;  %5458 = vmatpush1.bf16.msra.mxu1 %v7435_v46 }
 0x9e1   :  { %5428 = vmatprep.subr.bf16.mxu0 %v7445_v63  ;;  %5460 = vmatprep.subr.bf16.mxu1 %v7459_v13 }
 0x9e4   :  { %5430 = vmatpush1.bf16.msra.mxu0 %v7466_v28  ;;  %5462 = vmatpush1.bf16.msra.mxu1 %v7472_v10 }
 0x9e5   :  { %5432 = vmatprep.subr.bf16.mxu0 %v7484_v12  ;;  %5464 = vmatprep.subr.bf16.mxu1 %v7498_v25 }
 0x9e8   :  { %5434 = vmatpush1.bf16.msra.mxu0 %v7496_v51  ;;  %5466 = vmatpush1.bf16.msra.mxu1 %v7507_v3 }
 0xa9e   :  { %v2771_v18 = vpop.f32.mrb[34].mxu0  ;;  %v2842_v39 = vpop.f32.mrb[66].mxu1 }
 0xa9f   :  { %v2847_v55 = vadd.f32 %v2771_v18, %v7550_v31  ;;  %v2849_v33 = vadd.f32 %v2842_v39, %v7553_v41  ;;  %v2773_v20 = vpop.f32.mrb[35].mxu0  ;;  %v2844_v42 = vpop.f32.mrb[67].mxu1  ;;  %v3124_v31 = vld [vmem:[%s8494_s6 + $0x28] sm:$0xff]  ;;  %v3122_v41 = vld [vmem:[%s8494_s6 + $0x18] sm:$0xff]  ;;  %v7810_v39 = vpack.c.bf16 %v3140_v38, %v3136_v35  ;;  %v3163_v35 = vld [vmem:[%s8494_s6 + $0x160] sm:$0xff] }
 0xaa0   :  { %v2848_v62 = vadd.f32 %v2773_v20, %v7556_v6  ;;  %v2850_v36 = vadd.f32 %v2844_v42, %v7559_v34  ;;  %v7738_v6 = vpack.c.bf16 %v3124_v31, %v3120_v30  ;;  %v3126_v34 = vld [vmem:[%s8494_s6 + $0x38] sm:$0xff]  ;;  %v3139_v20 = vld [vmem:[%s8494_s6 + $0xa0] sm:$0xff] }
 0xaa1   :  { %v4697_v44 = vmul.f32 -1.442695, %v2847_v55  ;;  %v7749_v23 = vpack.c.bf16 %v3126_v34, %v3122_v41  ;;  %v3138_v18 = vld [vmem:[%s8494_s6 + $0x98] sm:$0xff]  ;;  %v3151_v34 = vld [vmem:[%s8494_s6 + $0x100] sm:$0xff] }
 0xaa2   :  { %v4698_v43 = vmul.f32 -1.442695, %v2848_v62  ;;  %v4699_v1 = vmul.f32 -1.442695, %v2850_v36  ;;  %5468 = vmatprep.subr.bf16.mxu0 %v7738_v6  ;;  %v3142_v55 = vld [vmem:[%s8494_s6 + $0xb8] sm:$0xff]  ;;  %v3137_v36 = vld [vmem:[%s8494_s6 + $0x90] sm:$0xff]  ;;  %v7895_v16 = vpack.c.bf16 %v3155_v56, %v3151_v34 }
 0xaa3   :  { %6040 = vpow2.f32 %v4697_v44  ;;  %5500 = vmatprep.subr.bf16.mxu1 %v7749_v23  ;;  %v7821_v42 = vpack.c.bf16 %v3142_v55, %v3138_v18  ;;  %v3141_v44 = vld [vmem:[%s8494_s6 + $0xb0] sm:$0xff]  ;;  %v3154_v30 = vld [vmem:[%s8494_s6 + $0x118] sm:$0xff] }
 0xaa4   :  { %6042 = vpow2.f32 %v4698_v43  ;;  %v7832_v43 = vpack.c.bf16 %v3141_v44, %v3137_v36  ;;  %v3158_v41 = vld [vmem:[%s8494_s6 + $0x138] sm:$0xff]  ;;  %v3161_v55 = vld [vmem:[%s8494_s6 + $0x150] sm:$0xff]  ;;  %v3172_v44 = vld [vmem:[%s8494_s6 + $0x1a8] sm:$0xff] }
 0xaa5   :  { %6044 = vpow2.f32 %v4699_v1  ;;  %v3144_v1 = vld [vmem:[%s8494_s6 + $0xc8] sm:$0xff]  ;;  %v7893_v26 = vpack.c.bf16 %v3158_v41, %v3154_v30 }
 0xaa6   :  { %6046 = vtanh.f32 %v2849_v33  ;;  %v3135_v33 = vld [vmem:[%s8494_s6 + $0x80] sm:$0xff] }
 0xaa7   :  { %v7823_v62 = vpack.c.bf16 %v3139_v20, %v3135_v33  ;;  %v3165_v33 = vld [vmem:[%s8494_s6 + $0x170] sm:$0xff]  ;;  %v3168_v20 = vld [vmem:[%s8494_s6 + $0x188] sm:$0xff] }
 0xaa8   :  { %v7943_v36 = vpack.c.bf16 %v3165_v33, %v3161_v55 }
 0xaad   :  { %v6041_v45 = vpop.eup %6040 }
 0xaae   :  { %v6043_v53 = vpop.eup %6042  ;;  %v2854_v0 = vadd.f32 1.0, %v6041_v45  ;;  %v3148_v45 = vld [vmem:[%s8494_s6 + $0xe8] sm:$0xff] }
 0xaaf   :  { %v2860_v59 = vadd.f32 1.0, %v6043_v53  ;;  %v6045_v27 = vpop.eup %6044  ;;  %v3146_v53 = vld [vmem:[%s8494_s6 + $0xd8] sm:$0xff] }
 0xab0   :  { %6048 = vrcp.f32 %v2854_v0  ;;  %v6047_v48 = vpop.eup %6046  ;;  %v2867_v29 = vadd.f32 1.0, %v6045_v27  ;;  %v7846_v0 = vpack.c.bf16 %v3148_v45, %v3144_v1  ;;  %v3143_v27 = vld [vmem:[%s8494_s6 + $0xc0] sm:$0xff]  ;;  %v3170_v1 = vld [vmem:[%s8494_s6 + $0x198] sm:$0xff] }
 0xab1   :  { %6050 = vrcp.f32 %v2860_v59  ;;  %v3150_v59 = vld [vmem:[%s8494_s6 + $0xf8] sm:$0xff] }
 0xab2   :  { %6052 = vrcp.f32 %v2867_v29  ;;  %v3149_v29 = vld [vmem:[%s8494_s6 + $0xf0] sm:$0xff]  ;;  %v3174_v45 = vld [vmem:[%s8494_s6 + $0x1b8] sm:$0xff] }
 0xaba   :  { %v6049_v49 = vpop.eup %6048 }
 0xabb   :  { %v6051_v8 = vpop.eup %6050  ;;  %v2871_v9 = vmul.f32 %v6049_v49, %v6047_v48  ;;  %v3147_v48 = vld [vmem:[%s8494_s6 + $0xe0] sm:$0xff]  ;;  %v7857_v49 = vpack.c.bf16 %v3150_v59, %v3146_v53  ;;  %v7955_v53 = vpack.c.bf16 %v3172_v44, %v3168_v20  ;;  %v7957_v59 = vpack.c.bf16 %v3174_v45, %v3170_v1 }
 0xabc   :  { %v2870_v46 = vmul.f32 %v6051_v8, %v7676_v7  ;;  %v6053_v13 = vpop.eup %6052  ;;  %v7796_v7 = vpack.c.bf16 %v3133_v47, %v3129_v57  ;;  %v7859_v8 = vpack.c.bf16 %v3147_v48, %v3143_v27  ;;  %v3166_v57 = vld [vmem:[%s8494_s6 + $0x178] sm:$0xff]  ;;  %v3159_v47 = vld [vmem:[%s8494_s6 + $0x140] sm:$0xff] }
 0xabd   :  { %v7929_v38 = vpack.c.bf16 %v3166_v57, %v3162_v60  ;;  %v7931_v18 = vpack.c.bf16 %v3163_v35, %v3159_v47  ;;  %v3167_v27 = vld [vmem:[%s8494_s6 + $0x180] sm:$0xff] }
 0xabe   :  { %v7720_v63 = vadd.f32 %v2871_v9, %v2870_v46  ;;  %v3145_v9 = vld [vmem:[%s8494_s6 + $0xd0] sm:$0xff]  ;;  %v3171_v48 = vld [vmem:[%s8494_s6 + $0x1a0] sm:$0xff] }
 0xabf   :  { %v7868_v46 = vpack.c.bf16 %v3149_v29, %v3145_v9  ;;  %v3169_v9 = vld [vmem:[%s8494_s6 + $0x190] sm:$0xff]  ;;  %v7969_v29 = vpack.c.bf16 %v3171_v48, %v3167_v27  ;;  %v3419_v27 = vld [vmem:[%s8494_s6 + $0x1e8] sm:$0xff]  ;;  %v3417_v48 = vld [vmem:[%s8494_s6 + $0x1d8] sm:$0xff] }
 0xac0   :  { %6054 = vtanh.f32 %v7720_v63 }
 0xaca   :  { %v6055_v28 = vpop.eup %6054 }
 0xacb   :  { %v7723_v10 = vmul.f32 %v6055_v28, %v6053_v13  ;;  %v3152_v13 = vld [vmem:[%s8494_s6 + $0x108] sm:$0xff] }
 0xacc   :  { %v3156_v28 = vld [vmem:[%s8494_s6 + $0x128] sm:$0xff] }
 0xacd   :  { %3009 = vmatmul.mubr.f32.vlgmr.msra.gmra.mrb[36].mxu0 %v7723_v10  ;;  %3080 = vmatmul.mubr.f32.vlgmr.msra.gmra.mrb[68].mxu1 %v7723_v10  ;;  %v7882_v31 = vpack.c.bf16 %v3156_v28, %v3152_v13  ;;  %v3173_v13 = vld [vmem:[%s8494_s6 + $0x1b0] sm:$0xff] }
 0xace   :  { %3247 = vmatprep.mubr.f32.mxu0 %v8541_v4  ;;  %3318 = vmatprep.mubr.f32.mxu1 %v8541_v4  ;;  %v7976_v28 = vpack.c.bf16 %v3173_v13, %v3169_v9  ;;  %v3421_v13 = vld [vmem:[%s8494_s6 + $0x1f8] sm:$0xff] }
 0xacf   :  { %5470 = vmatpush1.bf16.msra.mxu0 %v7751_v54  ;;  %5502 = vmatpush1.bf16.msra.mxu1 %v7760_v61 }
 0xad0   :  { %5472 = vmatprep.subr.bf16.mxu0 %v7774_v2  ;;  %5504 = vmatprep.subr.bf16.mxu1 %v7785_v17 }
 0xad3   :  { %5474 = vmatpush1.bf16.msra.mxu0 %v7787_v22  ;;  %5506 = vmatpush1.bf16.msra.mxu1 %v7796_v7 }
 0xad4   :  { %5476 = vmatprep.subr.bf16.mxu0 %v7810_v39  ;;  %5508 = vmatprep.subr.bf16.mxu1 %v7821_v42 }
 0xad7   :  { %5478 = vmatpush1.bf16.msra.mxu0 %v7823_v62  ;;  %5510 = vmatpush1.bf16.msra.mxu1 %v7832_v43 }
 0xad8   :  { %5480 = vmatprep.subr.bf16.mxu0 %v7846_v0  ;;  %5512 = vmatprep.subr.bf16.mxu1 %v7857_v49 }
 0xadb   :  { %5482 = vmatpush1.bf16.msra.mxu0 %v7859_v8  ;;  %5514 = vmatpush1.bf16.msra.mxu1 %v7868_v46 }
 0xadc   :  { %5484 = vmatprep.subr.bf16.mxu0 %v7882_v31  ;;  %5516 = vmatprep.subr.bf16.mxu1 %v7893_v26 }
 0xadf   :  { %5486 = vmatpush1.bf16.msra.mxu0 %v7895_v16  ;;  %5518 = vmatpush1.bf16.msra.mxu1 %v7904_v21 }
 0xae0   :  { %5488 = vmatprep.subr.bf16.mxu0 %v7917_v14  ;;  %5520 = vmatprep.subr.bf16.mxu1 %v7929_v38 }
 0xae3   :  { %5490 = vmatpush1.bf16.msra.mxu0 %v7931_v18  ;;  %5522 = vmatpush1.bf16.msra.mxu1 %v7943_v36 }
 0xae4   :  { %5492 = vmatprep.subr.bf16.mxu0 %v7955_v53  ;;  %5524 = vmatprep.subr.bf16.mxu1 %v7957_v59 }
 0xae7   :  { %5494 = vmatpush1.bf16.msra.mxu0 %v7969_v29  ;;  %5526 = vmatpush1.bf16.msra.mxu1 %v7976_v28 }
 0xae8   :  { %5496 = vmatprep.subr.bf16.mxu0 %v7484_v12  ;;  %5528 = vmatprep.subr.bf16.mxu1 %v7498_v25 }
 0xaeb   :  { %5498 = vmatpush1.bf16.msra.mxu0 %v7496_v51  ;;  %5530 = vmatpush1.bf16.msra.mxu1 %v7507_v3 }
 0xaec   :  { %5532 = vmatprep.subr.bf16.mxu0 %v7738_v6  ;;  %5564 = vmatprep.subr.bf16.mxu1 %v7749_v23 }
 0xba0   :  { %v3010_v30 = vpop.f32.mrb[36].mxu0  ;;  %v3081_v41 = vpop.f32.mrb[68].mxu1 }
 0xba1   :  { %v3086_v34 = vadd.f32 %v3010_v30, %v7562_v11  ;;  %v3088_v56 = vadd.f32 %v3081_v41, %v7565_v24  ;;  %v3012_v19 = vpop.f32.mrb[37].mxu0  ;;  %v3083_v52 = vpop.f32.mrb[69].mxu1  ;;  %v3414_v30 = vld [vmem:[%s8494_s6 + $0x1c0] sm:$0xff] }
 0xba2   :  { %v3087_v12 = vadd.f32 %v3012_v19, %v7568_v15  ;;  %v3089_v25 = vadd.f32 %v3083_v52, %v7571_v50  ;;  %v3418_v41 = vld [vmem:[%s8494_s6 + $0x1e0] sm:$0xff]  ;;  %v3416_v19 = vld [vmem:[%s8494_s6 + $0x1d0] sm:$0xff] }
 0xba3   :  { %v4700_v37 = vmul.f32 -1.442695, %v3086_v34  ;;  %v8047_v34 = vpack.c.bf16 %v3421_v13, %v3417_v48  ;;  %v3420_v52 = vld [vmem:[%s8494_s6 + $0x1f0] sm:$0xff] }
 0xba4   :  { %v4701_v51 = vmul.f32 -1.442695, %v3087_v12  ;;  %v4702_v3 = vmul.f32 -1.442695, %v3089_v25  ;;  %v8058_v12 = vpack.c.bf16 %v3420_v52, %v3416_v19 }
 0xba5   :  { %6056 = vpow2.f32 %v4700_v37 }
 0xba6   :  { %6058 = vpow2.f32 %v4701_v51 }
 0xba7   :  { %6060 = vpow2.f32 %v4702_v3 }
 0xba8   :  { %6062 = vtanh.f32 %v3088_v56  ;;  %v8049_v56 = vpack.c.bf16 %v3418_v41, %v3414_v30 }
 0xbaf   :  { %v6057_v40 = vpop.eup %6056 }
 0xbb0   :  { %v6059_v60 = vpop.eup %6058  ;;  %v3093_v57 = vadd.f32 1.0, %v6057_v40 }
 0xbb1   :  { %v3099_v47 = vadd.f32 1.0, %v6059_v60  ;;  %v6061_v11 = vpop.eup %6060 }
 0xbb2   :  { %6064 = vrcp.f32 %v3093_v57  ;;  %v6063_v24 = vpop.eup %6062  ;;  %v3106_v33 = vadd.f32 1.0, %v6061_v11  ;;  %v8586_v57 = vld [vmem:[#allocation6_spill] sm:$0xff]  ;;  %v8587_v11 = vld [vmem:[#allocation15_spill] sm:$0xff] }
 0xbb3   :  { %6066 = vrcp.f32 %v3099_v47 }
 0xbb4   :  { %6068 = vrcp.f32 %v3106_v33 }
 0xbbc   :  { %v6065_v35 = vpop.eup %6064 }
 0xbbd   :  { %v6067_v55 = vpop.eup %6066  ;;  %v3110_v15 = vmul.f32 %v6065_v35, %v6063_v24 }
 0xbbe   :  { %v3109_v50 = vmul.f32 %v6067_v55, %v7720_v63  ;;  %v6069_v44 = vpop.eup %6068  ;;  %v3415_v63 = vld [vmem:[%s8494_s6 + $0x1c8] sm:$0xff] }
 0xbbf   :  { %v8036_v9 = vpack.c.bf16 %v3419_v27, %v3415_v63 }
 0xbc0   :  { %v7992_v20 = vadd.f32 %v3110_v15, %v3109_v50 }
 0xbc2   :  { %6070 = vtanh.f32 %v7992_v20 }
 0xbcc   :  { %v6071_v1 = vpop.eup %6070 }
 0xbcd   :  { %v7995_v45 = vmul.f32 %v6071_v1, %v6069_v44 }
 0xbcf   :  { %3248 = vmatmul.mubr.f32.vlgmr.msra.gmra.mrb[38].mxu0 %v7995_v45  ;;  %3319 = vmatmul.mubr.f32.vlgmr.msra.gmra.mrb[70].mxu1 %v7995_v45 }
 0xbd0   :  { %5534 = vmatpush1.bf16.msra.mxu0 %v7751_v54  ;;  %5566 = vmatpush1.bf16.msra.mxu1 %v7760_v61 }
 0xbd1   :  { %5536 = vmatprep.subr.bf16.mxu0 %v7774_v2  ;;  %5568 = vmatprep.subr.bf16.mxu1 %v7785_v17 }
 0xbd2   :  { %3486 = vmatprep.mubr.f32.mxu0 %v8541_v4  ;;  %3557 = vmatprep.mubr.f32.mxu1 %v8541_v4 }
 0xbd4   :  { %5538 = vmatpush1.bf16.msra.mxu0 %v7787_v22  ;;  %5570 = vmatpush1.bf16.msra.mxu1 %v7796_v7 }
 0xbd5   :  { %5540 = vmatprep.subr.bf16.mxu0 %v7810_v39  ;;  %5572 = vmatprep.subr.bf16.mxu1 %v7821_v42 }
 0xbd8   :  { %5542 = vmatpush1.bf16.msra.mxu0 %v7823_v62  ;;  %5574 = vmatpush1.bf16.msra.mxu1 %v7832_v43 }
 0xbd9   :  { %5544 = vmatprep.subr.bf16.mxu0 %v7846_v0  ;;  %5576 = vmatprep.subr.bf16.mxu1 %v7857_v49 }
 0xbdc   :  { %5546 = vmatpush1.bf16.msra.mxu0 %v7859_v8  ;;  %5578 = vmatpush1.bf16.msra.mxu1 %v7868_v46 }
 0xbdd   :  { %5548 = vmatprep.subr.bf16.mxu0 %v7882_v31  ;;  %5580 = vmatprep.subr.bf16.mxu1 %v7893_v26 }
 0xbe0   :  { %5550 = vmatpush1.bf16.msra.mxu0 %v7895_v16  ;;  %5582 = vmatpush1.bf16.msra.mxu1 %v7904_v21 }
 0xbe1   :  { %5552 = vmatprep.subr.bf16.mxu0 %v7917_v14  ;;  %5584 = vmatprep.subr.bf16.mxu1 %v7929_v38 }
 0xbe4   :  { %5554 = vmatpush1.bf16.msra.mxu0 %v7931_v18  ;;  %5586 = vmatpush1.bf16.msra.mxu1 %v7943_v36 }
 0xbe5   :  { %5556 = vmatprep.subr.bf16.mxu0 %v7955_v53  ;;  %5588 = vmatprep.subr.bf16.mxu1 %v7957_v59 }
 0xbe8   :  { %5558 = vmatpush1.bf16.msra.mxu0 %v7969_v29  ;;  %5590 = vmatpush1.bf16.msra.mxu1 %v7976_v28 }
 0xbe9   :  { %5560 = vmatprep.subr.bf16.mxu0 %v8036_v9  ;;  %5592 = vmatprep.subr.bf16.mxu1 %v8047_v34 }
 0xbec   :  { %5562 = vmatpush1.bf16.msra.mxu0 %v8049_v56  ;;  %5594 = vmatpush1.bf16.msra.mxu1 %v8058_v12 }
 0xbed   :  { %5596 = vmatprep.subr.bf16.mxu0 %v7738_v6  ;;  %5628 = vmatprep.subr.bf16.mxu1 %v7749_v23 }
 0xca2   :  { %v3249_v25 = vpop.f32.mrb[38].mxu0  ;;  %v3320_v37 = vpop.f32.mrb[70].mxu1 }
 0xca3   :  { %v3325_v51 = vadd.f32 %v3249_v25, %v7574_v32  ;;  %v3327_v3 = vadd.f32 %v3320_v37, %v7577_v58  ;;  %v3251_v40 = vpop.f32.mrb[39].mxu0  ;;  %v3322_v60 = vpop.f32.mrb[71].mxu1 }
 0xca4   :  { %v3326_v47 = vadd.f32 %v3251_v40, %v8586_v57  ;;  %v3328_v24 = vadd.f32 %v3322_v60, %v8587_v11  ;;  %v8589_v40 = vld [vmem:[#allocation16_spill] sm:$0xff] }
 0xca5   :  { %v4703_v35 = vmul.f32 -1.442695, %v3325_v51  ;;  %v8588_v51 = vld [vmem:[#allocation7_spill] sm:$0xff]  ;;  %v8590_v11 = vld [vmem:[#allocation8_spill] sm:$0xff] }
 0xca6   :  { %v4704_v55 = vmul.f32 -1.442695, %v3326_v47  ;;  %v4705_v15 = vmul.f32 -1.442695, %v3328_v24 }
 0xca7   :  { %6072 = vpow2.f32 %v4703_v35  ;;  %v8591_v35 = vld [vmem:[#allocation17_spill] sm:$0xff] }
 0xca8   :  { %6074 = vpow2.f32 %v4704_v55 }
 0xca9   :  { %6076 = vpow2.f32 %v4705_v15 }
 0xcaa   :  { %6078 = vtanh.f32 %v3327_v3 }
 0xcb1   :  { %v6073_v33 = vpop.eup %6072 }
 0xcb2   :  { %v6075_v50 = vpop.eup %6074  ;;  %v3332_v44 = vadd.f32 1.0, %v6073_v33 }
 0xcb3   :  { %v3338_v1 = vadd.f32 1.0, %v6075_v50  ;;  %v6077_v32 = vpop.eup %6076 }
 0xcb4   :  { %6080 = vrcp.f32 %v3332_v44  ;;  %v6079_v58 = vpop.eup %6078  ;;  %v3345_v13 = vadd.f32 1.0, %v6077_v32 }
 0xcb5   :  { %6082 = vrcp.f32 %v3338_v1 }
 0xcb6   :  { %6084 = vrcp.f32 %v3345_v13 }
 0xcbe   :  { %v6081_v63 = vpop.eup %6080 }
 0xcbf   :  { %v6083_v27 = vpop.eup %6082  ;;  %v3349_v48 = vmul.f32 %v6081_v63, %v6079_v58 }
 0xcc0   :  { %v3348_v30 = vmul.f32 %v6083_v27, %v7992_v20  ;;  %v6085_v19 = vpop.eup %6084 }
 0xcc2   :  { %v8070_v41 = vadd.f32 %v3349_v48, %v3348_v30 }
 0xcc4   :  { %6086 = vtanh.f32 %v8070_v41 }
 0xcce   :  { %v6087_v52 = vpop.eup %6086 }
 0xccf   :  { %v8073_v25 = vmul.f32 %v6087_v52, %v6085_v19 }
 0xcd1   :  { %3487 = vmatmul.mubr.f32.vlgmr.msra.gmra.mrb[40].mxu0 %v8073_v25  ;;  %3558 = vmatmul.mubr.f32.vlgmr.msra.gmra.mrb[72].mxu1 %v8073_v25 }
 0xcd2   :  { %5598 = vmatpush1.bf16.msra.mxu0 %v7751_v54  ;;  %5630 = vmatpush1.bf16.msra.mxu1 %v7760_v61 }
 0xcd3   :  { %5600 = vmatprep.subr.bf16.mxu0 %v7774_v2  ;;  %5632 = vmatprep.subr.bf16.mxu1 %v7785_v17 }
 0xcd4   :  { %3725 = vmatprep.mubr.f32.mxu0 %v8541_v4  ;;  %3796 = vmatprep.mubr.f32.mxu1 %v8541_v4 }
 0xcd6   :  { %5602 = vmatpush1.bf16.msra.mxu0 %v7787_v22  ;;  %5634 = vmatpush1.bf16.msra.mxu1 %v7796_v7 }
 0xcd7   :  { %5604 = vmatprep.subr.bf16.mxu0 %v7810_v39  ;;  %5636 = vmatprep.subr.bf16.mxu1 %v7821_v42 }
 0xcda   :  { %5606 = vmatpush1.bf16.msra.mxu0 %v7823_v62  ;;  %5638 = vmatpush1.bf16.msra.mxu1 %v7832_v43 }
 0xcdb   :  { %5608 = vmatprep.subr.bf16.mxu0 %v7846_v0  ;;  %5640 = vmatprep.subr.bf16.mxu1 %v7857_v49 }
 0xcde   :  { %5610 = vmatpush1.bf16.msra.mxu0 %v7859_v8  ;;  %5642 = vmatpush1.bf16.msra.mxu1 %v7868_v46 }
 0xcdf   :  { %5612 = vmatprep.subr.bf16.mxu0 %v7882_v31  ;;  %5644 = vmatprep.subr.bf16.mxu1 %v7893_v26 }
 0xce2   :  { %5614 = vmatpush1.bf16.msra.mxu0 %v7895_v16  ;;  %5646 = vmatpush1.bf16.msra.mxu1 %v7904_v21 }
 0xce3   :  { %5616 = vmatprep.subr.bf16.mxu0 %v7917_v14  ;;  %5648 = vmatprep.subr.bf16.mxu1 %v7929_v38 }
 0xce6   :  { %5618 = vmatpush1.bf16.msra.mxu0 %v7931_v18  ;;  %5650 = vmatpush1.bf16.msra.mxu1 %v7943_v36 }
 0xce7   :  { %5620 = vmatprep.subr.bf16.mxu0 %v7955_v53  ;;  %5652 = vmatprep.subr.bf16.mxu1 %v7957_v59 }
 0xcea   :  { %5622 = vmatpush1.bf16.msra.mxu0 %v7969_v29  ;;  %5654 = vmatpush1.bf16.msra.mxu1 %v7976_v28 }
 0xceb   :  { %5624 = vmatprep.subr.bf16.mxu0 %v8036_v9  ;;  %5656 = vmatprep.subr.bf16.mxu1 %v8047_v34 }
 0xcee   :  { %5626 = vmatpush1.bf16.msra.mxu0 %v8049_v56  ;;  %5658 = vmatpush1.bf16.msra.mxu1 %v8058_v12 }
 0xcef   :  { %5660 = vmatprep.subr.bf16.mxu0 %v7738_v6  ;;  %5692 = vmatprep.subr.bf16.mxu1 %v7749_v23 }
 0xda4   :  { %v3488_v20 = vpop.f32.mrb[40].mxu0  ;;  %v3559_v37 = vpop.f32.mrb[72].mxu1 }
 0xda5   :  { %v3564_v3 = vadd.f32 %v3488_v20, %v8588_v51  ;;  %v3566_v60 = vadd.f32 %v3559_v37, %v8589_v40  ;;  %v3490_v57 = vpop.f32.mrb[41].mxu0  ;;  %v3561_v47 = vpop.f32.mrb[73].mxu1 }
 0xda6   :  { %v3565_v24 = vadd.f32 %v3490_v57, %v8590_v11  ;;  %v3567_v55 = vadd.f32 %v3561_v47, %v8591_v35  ;;  %v4080_v57 = vld [vmem:[%s8494_s6 + $0x28] sm:$0xff]  ;;  %v4075_v11 = vld [vmem:[%s8494_s6] sm:$0xff] }
 0xda7   :  { %v4706_v15 = vmul.f32 -1.442695, %v3564_v3 }
 0xda8   :  { %v4707_v33 = vmul.f32 -1.442695, %v3565_v24  ;;  %v4708_v50 = vmul.f32 -1.442695, %v3567_v55  ;;  %v4079_v24 = vld [vmem:[%s8494_s6 + $0x20] sm:$0xff]  ;;  %v4082_v55 = vld [vmem:[%s8494_s6 + $0x38] sm:$0xff] }
 0xda9   :  { %6088 = vpow2.f32 %v4706_v15  ;;  %v5725_v35 = vpack.c.bf16 %v4079_v24, %v4075_v11  ;;  %v4077_v15 = vld [vmem:[%s8494_s6 + $0x10] sm:$0xff] }
 0xdaa   :  { %6090 = vpow2.f32 %v4707_v33  ;;  %v4081_v33 = vld [vmem:[%s8494_s6 + $0x30] sm:$0xff] }
 0xdab   :  { %6092 = vpow2.f32 %v4708_v50  ;;  %v4109_v11 = vld [vmem:[%s8494_s6 + $0x110] sm:$0xff] }
 0xdac   :  { %6094 = vtanh.f32 %v3566_v60  ;;  %v4076_v60 = vld [vmem:[%s8494_s6 + $0x8] sm:$0xff]  ;;  %v4113_v24 = vld [vmem:[%s8494_s6 + $0x130] sm:$0xff] }
 0xdad   :  { %v5723_v47 = vpack.c.bf16 %v4080_v57, %v4076_v60  ;;  %v4110_v60 = vld [vmem:[%s8494_s6 + $0x118] sm:$0xff] }
 0xdb3   :  { %v6089_v6 = vpop.eup %6088 }
 0xdb4   :  { %v6091_v44 = vpop.eup %6090  ;;  %v3571_v23 = vadd.f32 1.0, %v6089_v6  ;;  %v5757_v6 = vpack.c.bf16 %v4081_v33, %v4077_v15  ;;  %v4120_v15 = vld [vmem:[%s8494_s6 + $0x168] sm:$0xff]  ;;  %v4115_v33 = vld [vmem:[%s8494_s6 + $0x140] sm:$0xff] }
 0xdb5   :  { %v3577_v1 = vadd.f32 1.0, %v6091_v44  ;;  %v6093_v32 = vpop.eup %6092  ;;  %v4084_v44 = vld [vmem:[%s8494_s6 + $0x48] sm:$0xff] }
 0xdb6   :  { %6096 = vrcp.f32 %v3571_v23  ;;  %v6095_v58 = vpop.eup %6094  ;;  %v3584_v13 = vadd.f32 1.0, %v6093_v32  ;;  %v4088_v23 = vld [vmem:[%s8494_s6 + $0x68] sm:$0xff]  ;;  %v4083_v32 = vld [vmem:[%s8494_s6 + $0x40] sm:$0xff] }
 0xdb7   :  { %6098 = vrcp.f32 %v3577_v1  ;;  %v5727_v1 = vpack.c.bf16 %v4088_v23, %v4084_v44  ;;  %v4118_v44 = vld [vmem:[%s8494_s6 + $0x158] sm:$0xff] }
 0xdb8   :  { %6100 = vrcp.f32 %v3584_v13  ;;  %v4085_v13 = vld [vmem:[%s8494_s6 + $0x50] sm:$0xff]  ;;  %v4122_v23 = vld [vmem:[%s8494_s6 + $0x178] sm:$0xff] }
 0xdc0   :  { %v6097_v63 = vpop.eup %6096 }
 0xdc1   :  { %v6099_v27 = vpop.eup %6098  ;;  %v3588_v48 = vmul.f32 %v6097_v63, %v6095_v58  ;;  %v4087_v58 = vld [vmem:[%s8494_s6 + $0x60] sm:$0xff]  ;;  %v4086_v63 = vld [vmem:[%s8494_s6 + $0x58] sm:$0xff] }
 0xdc2   :  { %v3587_v30 = vmul.f32 %v6099_v27, %v8070_v41  ;;  %v6101_v52 = vpop.eup %6100  ;;  %v5729_v27 = vpack.c.bf16 %v4087_v58, %v4083_v32  ;;  %v5775_v32 = vpack.c.bf16 %v4122_v23, %v4118_v44  ;;  %v4117_v58 = vld [vmem:[%s8494_s6 + $0x150] sm:$0xff] }
 0xdc4   :  { %v8116_v19 = vadd.f32 %v3588_v48, %v3587_v30  ;;  %v4090_v48 = vld [vmem:[%s8494_s6 + $0x78] sm:$0xff]  ;;  %v4089_v30 = vld [vmem:[%s8494_s6 + $0x70] sm:$0xff] }
 0xdc6   :  { %6102 = vtanh.f32 %v8116_v19 }
 0xdd0   :  { %v6103_v20 = vpop.eup %6102 }
 0xdd1   :  { %v8119_v37 = vmul.f32 %v6103_v20, %v6101_v52  ;;  %v5761_v52 = vpack.c.bf16 %v4089_v30, %v4085_v13  ;;  %v4092_v20 = vld [vmem:[%s8494_s6 + $0x88] sm:$0xff]  ;;  %v4123_v30 = vld [vmem:[%s8494_s6 + $0x180] sm:$0xff] }
 0xdd2   :  { %v4128_v13 = vld [vmem:[%s8494_s6 + $0x1a8] sm:$0xff] }
 0xdd3   :  { %3726 = vmatmul.mubr.f32.vlgmr.msra.gmra.mrb[42].mxu0 %v8119_v37  ;;  %3797 = vmatmul.mubr.f32.vlgmr.msra.gmra.mrb[74].mxu1 %v8119_v37 }
 0xdd4   :  { %5662 = vmatpush1.bf16.msra.mxu0 %v7751_v54  ;;  %5694 = vmatpush1.bf16.msra.mxu1 %v7760_v61 }
 0xdd5   :  { %5664 = vmatprep.subr.bf16.mxu0 %v7774_v2  ;;  %5696 = vmatprep.subr.bf16.mxu1 %v7785_v17  ;;  %v8592_v2 = vld [vmem:[#allocation9_spill] sm:$0xff] }
 0xdd6   :  { %3964 = vmatprep.mubr.f32.mxu0 %v8541_v4  ;;  %4035 = vmatprep.mubr.f32.mxu1 %v8541_v4 }
 0xdd8   :  { %5666 = vmatpush1.bf16.msra.mxu0 %v7787_v22  ;;  %5698 = vmatpush1.bf16.msra.mxu1 %v7796_v7  ;;  %v8593_v22 = vld [vmem:[#allocation18_spill] sm:$0xff] }
 0xdd9   :  { %5668 = vmatprep.subr.bf16.mxu0 %v7810_v39  ;;  %5700 = vmatprep.subr.bf16.mxu1 %v7821_v42 }
 0xddc   :  { %5670 = vmatpush1.bf16.msra.mxu0 %v7823_v62  ;;  %5702 = vmatpush1.bf16.msra.mxu1 %v7832_v43  ;;  %v8594_v62 = vld [vmem:[#allocation10_spill] sm:$0xff] }
 0xddd   :  { %5672 = vmatprep.subr.bf16.mxu0 %v7846_v0  ;;  %5704 = vmatprep.subr.bf16.mxu1 %v7857_v49  ;;  %v8595_v0 = vld [vmem:[#allocation19_spill] sm:$0xff] }
 0xde0   :  { %5674 = vmatpush1.bf16.msra.mxu0 %v7859_v8  ;;  %5706 = vmatpush1.bf16.msra.mxu1 %v7868_v46 }
 0xde1   :  { %5676 = vmatprep.subr.bf16.mxu0 %v7882_v31  ;;  %5708 = vmatprep.subr.bf16.mxu1 %v7893_v26 }
 0xde4   :  { %5678 = vmatpush1.bf16.msra.mxu0 %v7895_v16  ;;  %5710 = vmatpush1.bf16.msra.mxu1 %v7904_v21 }
 0xde5   :  { %5680 = vmatprep.subr.bf16.mxu0 %v7917_v14  ;;  %5712 = vmatprep.subr.bf16.mxu1 %v7929_v38 }
 0xde8   :  { %5682 = vmatpush1.bf16.msra.mxu0 %v7931_v18  ;;  %5714 = vmatpush1.bf16.msra.mxu1 %v7943_v36 }
 0xde9   :  { %5684 = vmatprep.subr.bf16.mxu0 %v7955_v53  ;;  %5716 = vmatprep.subr.bf16.mxu1 %v7957_v59 }
 0xdec   :  { %5686 = vmatpush1.bf16.msra.mxu0 %v7969_v29  ;;  %5718 = vmatpush1.bf16.msra.mxu1 %v7976_v28 }
 0xded   :  { %5688 = vmatprep.subr.bf16.mxu0 %v8036_v9  ;;  %5720 = vmatprep.subr.bf16.mxu1 %v8047_v34 }
 0xdf0   :  { %5690 = vmatpush1.bf16.msra.mxu0 %v8049_v56  ;;  %5722 = vmatpush1.bf16.msra.mxu1 %v8058_v12 }
 0xdf1   :  { %5724 = vmatprep.subr.bf16.mxu0 %v5723_v47  ;;  %v4114_v47 = vld [vmem:[%s8494_s6 + $0x138] sm:$0xff] }
 0xea6   :  { %v3727_v54 = vpop.f32.mrb[42].mxu0  ;;  %v3798_v61 = vpop.f32.mrb[74].mxu1 }
 0xea7   :  { %v3803_v17 = vadd.f32 %v3727_v54, %v8592_v2  ;;  %v3805_v7 = vadd.f32 %v3798_v61, %v8593_v22  ;;  %v3729_v39 = vpop.f32.mrb[43].mxu0  ;;  %v3800_v42 = vpop.f32.mrb[75].mxu1  ;;  %v4096_v54 = vld [vmem:[%s8494_s6 + $0xa8] sm:$0xff]  ;;  %v4091_v2 = vld [vmem:[%s8494_s6 + $0x80] sm:$0xff]  ;;  %v4094_v22 = vld [vmem:[%s8494_s6 + $0x98] sm:$0xff] }
 0xea8   :  { %v3804_v43 = vadd.f32 %v3729_v39, %v8594_v62  ;;  %v3806_v49 = vadd.f32 %v3800_v42, %v8595_v0  ;;  %v5731_v61 = vpack.c.bf16 %v4096_v54, %v4092_v20  ;;  %v4098_v39 = vld [vmem:[%s8494_s6 + $0xb8] sm:$0xff]  ;;  %v4093_v42 = vld [vmem:[%s8494_s6 + $0x90] sm:$0xff] }
 0xea9   :  { %v4709_v8 = vmul.f32 -1.442695, %v3803_v17  ;;  %v4095_v17 = vld [vmem:[%s8494_s6 + $0xa0] sm:$0xff]  ;;  %v4097_v62 = vld [vmem:[%s8494_s6 + $0xb0] sm:$0xff]  ;;  %v4126_v54 = vld [vmem:[%s8494_s6 + $0x198] sm:$0xff] }
 0xeaa   :  { %v4710_v46 = vmul.f32 -1.442695, %v3804_v43  ;;  %v4711_v31 = vmul.f32 -1.442695, %v3806_v49  ;;  %v5763_v43 = vpack.c.bf16 %v4098_v39, %v4094_v22  ;;  %v5765_v0 = vpack.c.bf16 %v4097_v62, %v4093_v42  ;;  %v4100_v49 = vld [vmem:[%s8494_s6 + $0xc8] sm:$0xff]  ;;  %v4129_v22 = vld [vmem:[%s8494_s6 + $0x1b0] sm:$0xff] }
 0xeab   :  { %6104 = vpow2.f32 %v4709_v8  ;;  %v4104_v8 = vld [vmem:[%s8494_s6 + $0xe8] sm:$0xff]  ;;  %v5888_v39 = vld [vmem:[%s8496_s8] sm:$0xff]  }
 0xeac   :  { %6106 = vpow2.f32 %v4710_v46  ;;  %v5735_v46 = vpack.c.bf16 %v4104_v8, %v4100_v49  ;;  %v8597_v49 = vld [vmem:[#allocation20_spill] sm:$0xff] }
 0xead   :  { %6108 = vpow2.f32 %v4711_v31  ;;  %v4099_v31 = vld [vmem:[%s8494_s6 + $0xc0] sm:$0xff] }
 0xeae   :  { %6110 = vtanh.f32 %v3805_v7  ;;  %v5733_v7 = vpack.c.bf16 %v4095_v17, %v4091_v2  ;;  %v4125_v2 = vld [vmem:[%s8494_s6 + $0x190] sm:$0xff] }
 0xeb5   :  { %v6105_v26 = vpop.eup %6104 }
 0xeb6   :  { %v6107_v16 = vpop.eup %6106  ;;  %v3810_v21 = vadd.f32 1.0, %v6105_v26  ;;  %v4103_v26 = vld [vmem:[%s8494_s6 + $0xe0] sm:$0xff] }
 0xeb7   :  { %v3816_v14 = vadd.f32 1.0, %v6107_v16  ;;  %v6109_v38 = vpop.eup %6108  ;;  %v4102_v16 = vld [vmem:[%s8494_s6 + $0xd8] sm:$0xff] }
 0xeb8   :  { %6112 = vrcp.f32 %v3810_v21  ;;  %v6111_v18 = vpop.eup %6110  ;;  %v3823_v29 = vadd.f32 1.0, %v6109_v38  ;;  %v5737_v21 = vpack.c.bf16 %v4103_v26, %v4099_v31  ;;  %v4101_v38 = vld [vmem:[%s8494_s6 + $0xd0] sm:$0xff]  ;;  %v8598_v26 = vld [vmem:[#allocation12_spill] sm:$0xff] }
 0xeb9   :  { %6114 = vrcp.f32 %v3816_v14  ;;  %v4106_v14 = vld [vmem:[%s8494_s6 + $0xf8] sm:$0xff] }
 0xeba   :  { %6116 = vrcp.f32 %v3823_v29  ;;  %v4112_v29 = vld [vmem:[%s8494_s6 + $0x128] sm:$0xff] }
 0xec2   :  { %v6113_v36 = vpop.eup %6112 }
 0xec3   :  { %v6115_v53 = vpop.eup %6114  ;;  %v3827_v59 = vmul.f32 %v6113_v36, %v6111_v18  ;;  %v4105_v18 = vld [vmem:[%s8494_s6 + $0xf0] sm:$0xff]  ;;  %v5767_v36 = vpack.c.bf16 %v4106_v14, %v4102_v16 }
 0xec4   :  { %v3826_v28 = vmul.f32 %v6115_v53, %v8116_v19  ;;  %v6117_v51 = vpop.eup %6116  ;;  %v5759_v19 = vpack.c.bf16 %v4090_v48, %v4086_v63  ;;  %v5769_v53 = vpack.c.bf16 %v4105_v18, %v4101_v38  ;;  %v4121_v63 = vld [vmem:[%s8494_s6 + $0x170] sm:$0xff] }
 0xec5   :  { %v5777_v48 = vpack.c.bf16 %v4121_v63, %v4117_v58  ;;  %v8601_v58 = vld [vmem:[#allocation13_spill] sm:$0xff] }
 0xec6   :  { %v8160_v41 = vadd.f32 %v3827_v59, %v3826_v28  ;;  %v4108_v59 = vld [vmem:[%s8494_s6 + $0x108] sm:$0xff] }
 0xec7   :  { %v5739_v28 = vpack.c.bf16 %v4112_v29, %v4108_v59 }
 0xec8   :  { %6118 = vtanh.f32 %v8160_v41 }
 0xed2   :  { %v6119_v3 = vpop.eup %6118 }
 0xed3   :  { %v8163_v40 = vmul.f32 %v6119_v3, %v6117_v51  ;;  %v4107_v51 = vld [vmem:[%s8494_s6 + $0x100] sm:$0xff] }
 0xed4   :  { %v4111_v3 = vld [vmem:[%s8494_s6 + $0x120] sm:$0xff] }
 0xed5   :  { %3965 = vmatmul.mubr.f32.vlgmr.msra.gmra.mrb[44].mxu0 %v8163_v40  ;;  %4036 = vmatmul.mubr.f32.vlgmr.msra.gmra.mrb[76].mxu1 %v8163_v40  ;;  %v5741_v57 = vpack.c.bf16 %v4111_v3, %v4107_v51 }
 0xed6   :  { %4203 = vmatprep.mubr.f32.mxu0 %v8541_v4  ;;  %4274 = vmatprep.mubr.f32.mxu1 %v8541_v4  ;;  %v4078_v4 = vld [vmem:[%s8494_s6 + $0x18] sm:$0xff] }
 0xed7   :  { %v5755_v50 = vpack.c.bf16 %v4082_v55, %v4078_v4  ;;  %5726 = vmatpush1.bf16.msra.mxu0 %v5725_v35  ;;  %v5771_v4 = vpack.c.bf16 %v4114_v47, %v4110_v60  ;;  %v5773_v35 = vpack.c.bf16 %v4113_v24, %v4109_v11  ;;  %v4116_v55 = vld [vmem:[%s8494_s6 + $0x148] sm:$0xff] }
 0xed8   :  { %5728 = vmatprep.subr.bf16.mxu0 %v5727_v1 }
 0xed9   :  { %5756 = vmatprep.subr.bf16.mxu1 %v5755_v50  ;;  %v5743_v50 = vpack.c.bf16 %v4120_v15, %v4116_v55  ;;  %v5891_v55 = vld [vmem:[%s8496_s8 + $0x18] sm:$0xff]   ;;  %v5894_v15 = vld [vmem:[%s8496_s8 + $0x30] sm:$0xff]  }
 0xeda   :  { %5758 = vmatpush1.bf16.msra.mxu1 %v5757_v6  ;;  %v4119_v6 = vld [vmem:[%s8494_s6 + $0x160] sm:$0xff] }
 0xedb   :  { %5730 = vmatpush1.bf16.msra.mxu0 %v5729_v27  ;;  %5760 = vmatprep.subr.bf16.mxu1 %v5759_v19  ;;  %v5745_v1 = vpack.c.bf16 %v4119_v6, %v4115_v33  ;;  %v4124_v27 = vld [vmem:[%s8494_s6 + $0x188] sm:$0xff]  ;;  %v4127_v19 = vld [vmem:[%s8494_s6 + $0x1a0] sm:$0xff]  ;;  %v5895_v33 = vld [vmem:[%s8496_s8 + $0x38] sm:$0xff]   ;;  %v4320_v6 = vpack.c.bf16 %v8163_v40, %v8119_v37 }
 0xedc   :  { %5732 = vmatprep.subr.bf16.mxu0 %v5731_v61  ;;  %v5749_v20 = vpack.c.bf16 %v4127_v19, %v4123_v30  ;;  %v4130_v61 = vld [vmem:[%s8494_s6 + $0x1b8] sm:$0xff]  ;;  %v8603_v19 = vld [vmem:[#allocation14_spill] sm:$0xff] }
 0xedd   :  { %v5779_v17 = vpack.c.bf16 %v4130_v61, %v4126_v54 }
 0xede   :  { %5762 = vmatpush1.bf16.msra.mxu1 %v5761_v52  ;;  %v5747_v52 = vpack.c.bf16 %v4128_v13, %v4124_v27  ;;  %v8602_v13 = vld [vmem:[#allocation22_spill] sm:$0xff] }
 0xedf   :  { %5734 = vmatpush1.bf16.msra.mxu0 %v5733_v7  ;;  %5764 = vmatprep.subr.bf16.mxu1 %v5763_v43  ;;  %v5781_v7 = vpack.c.bf16 %v4129_v22, %v4125_v2  ;;  %v8596_v43 = vld [vmem:[#allocation11_spill] sm:$0xff] }
 0xee0   :  { %5736 = vmatprep.subr.bf16.mxu0 %v5735_v46 }
 0xee2   :  { %5766 = vmatpush1.bf16.msra.mxu1 %v5765_v0 }
 0xee3   :  { %5738 = vmatpush1.bf16.msra.mxu0 %v5737_v21  ;;  %5768 = vmatprep.subr.bf16.mxu1 %v5767_v36  ;;  %v8599_v21 = vld [vmem:[#allocation21_spill] sm:$0xff] }
 0xee4   :  { %5740 = vmatprep.subr.bf16.mxu0 %v5739_v28 }
 0xee6   :  { %5770 = vmatpush1.bf16.msra.mxu1 %v5769_v53 }
 0xee7   :  { %5742 = vmatpush1.bf16.msra.mxu0 %v5741_v57  ;;  %5772 = vmatprep.subr.bf16.mxu1 %v5771_v4  ;;  %v5889_v4 = vld [vmem:[%s8496_s8 + $0x8] sm:$0xff]  }
 0xee8   :  { %5744 = vmatprep.subr.bf16.mxu0 %v5743_v50  ;;  %v4319_v50 = vpack.c.bf16 %v8073_v25, %v7995_v45 }
 0xeea   :  { %5774 = vmatpush1.bf16.msra.mxu1 %v5773_v35  ;;  %v4318_v35 = vpack.c.bf16 %v7723_v10, %v7679_v5  ;;  %v5892_v5 = vld [vmem:[%s8496_s8 + $0x20] sm:$0xff]   ;;  %v5893_v10 = vld [vmem:[%s8496_s8 + $0x28] sm:$0xff]  }
 0xeeb   :  { %5746 = vmatpush1.bf16.msra.mxu0 %v5745_v1  ;;  %5776 = vmatprep.subr.bf16.mxu1 %v5775_v32  ;;  %v8600_v1 = vld [vmem:[#allocation4_spill] sm:$0xff] }
 0xeec   :  { %5748 = vmatprep.subr.bf16.mxu0 %v5747_v52 }
 0xeee   :  { %5778 = vmatpush1.bf16.msra.mxu1 %v5777_v48 }
 0xeef   :  { %5780 = vmatprep.subr.bf16.mxu1 %v5779_v17  ;;  %5750 = vmatpush1.bf16.msra.mxu0 %v5749_v20 }
 0xef0   :  { %5752 = vmatprep.subr.bf16.mxu0 %v8036_v9 }
 0xef2   :  { %5782 = vmatpush1.bf16.msra.mxu1 %v5781_v7 }
 0xef3   :  { %5784 = vmatprep.subr.bf16.mxu1 %v8047_v34  ;;  %5754 = vmatpush1.bf16.msra.mxu0 %v8049_v56 }
 0xef4   :  { %4739 = vmatprep.subr.bf16.mxu0 %v5888_v39 }
 0xef6   :  { %5786 = vmatpush1.bf16.msra.mxu1 %v8058_v12 }
 0xfa8   :  { %v3966_v42 = vpop.f32.mrb[44].mxu0  ;;  %v4037_v62 = vpop.f32.mrb[76].mxu1 }
 0xfa9   :  { %v4042_v0 = vadd.f32 %v3966_v42, %v8596_v43  ;;  %v4044_v8 = vadd.f32 %v4037_v62, %v8597_v49  ;;  %v3968_v46 = vpop.f32.mrb[45].mxu0  ;;  %v4039_v31 = vpop.f32.mrb[77].mxu1  ;;  %v4718_v43 = vld [vmem:[%s8497_s9] ss:$0 sm:$0xff] }
 0xfaa   :  { %v4043_v16 = vadd.f32 %v3968_v46, %v8598_v26  ;;  %v4045_v9 = vadd.f32 %v4039_v31, %v8599_v21 }
 0xfab   :  { %v4712_v14 = vmul.f32 -1.442695, %v4042_v0 }
 0xfac   :  { %v4713_v38 = vmul.f32 -1.442695, %v4043_v16  ;;  %v4714_v34 = vmul.f32 -1.442695, %v4045_v9 }
 0xfad   :  { %6120 = vpow2.f32 %v4712_v14 }
 0xfae   :  { %6122 = vpow2.f32 %v4713_v38 }
 0xfaf   :  { %6124 = vpow2.f32 %v4714_v34 }
 0xfb0   :  { %6126 = vtanh.f32 %v4044_v8 }
 0xfb7   :  { %v6121_v56 = vpop.eup %6120 }
 0xfb8   :  { %v6123_v18 = vpop.eup %6122  ;;  %v4049_v12 = vadd.f32 1.0, %v6121_v56 }
 0xfb9   :  { %v4055_v36 = vadd.f32 1.0, %v6123_v18  ;;  %v6125_v53 = vpop.eup %6124 }
 0xfba   :  { %6128 = vrcp.f32 %v4049_v12  ;;  %v6127_v59 = vpop.eup %6126  ;;  %v4062_v3 = vadd.f32 1.0, %v6125_v53 }
 0xfbb   :  { %6130 = vrcp.f32 %v4055_v36 }
 0xfbc   :  { %6132 = vrcp.f32 %v4062_v3 }
 0xfc4   :  { %v6129_v29 = vpop.eup %6128 }
 0xfc5   :  { %v6131_v28 = vpop.eup %6130  ;;  %v4066_v51 = vmul.f32 %v6129_v29, %v6127_v59 }
 0xfc6   :  { %v4065_v60 = vmul.f32 %v6131_v28, %v8160_v41  ;;  %v6133_v47 = vpop.eup %6132  ;;  %v5890_v41 = vld [vmem:[%s8496_s8 + $0x10] sm:$0xff]  }
 0xfc8   :  { %v8349_v57 = vadd.f32 %v4066_v51, %v4065_v60 }
 0xfca   :  { %6134 = vtanh.f32 %v8349_v57 }
 0xfd4   :  { %v6135_v11 = vpop.eup %6134 }
 0xfd5   :  { %v8352_v24 = vmul.f32 %v6135_v11, %v6133_v47 }
 0xfd7   :  { %4204 = vmatmul.mubr.f32.vlgmr.msra.gmra.mrb[46].mxu0 %v8352_v24  ;;  %4275 = vmatmul.mubr.f32.vlgmr.msra.gmra.mrb[78].mxu1 %v8352_v24 }
 0xfd8   :  { %4740 = vmatpush3.bf16.msra.mxu0 %v5888_v39  ;;  %4755 = vmatprep.mubr.bf16.mxu0 %v4318_v35 }
 0xfd9   :  { %4741 = vmatprep.subr.bf16.mxu0 %v5889_v4 }
 0xfdc   :  { %4742 = vmatpush3.bf16.msra.mxu0 %v5889_v4 }
 0xfdd   :  { %4743 = vmatprep.subr.bf16.mxu0 %v5890_v41 }
 0xfe0   :  { %4744 = vmatpush3.bf16.msra.mxu0 %v5890_v41 }
 0xfe1   :  { %4745 = vmatprep.subr.bf16.mxu0 %v5891_v55 }
 0xfe4   :  { %4746 = vmatpush3.bf16.msra.mxu0 %v5891_v55 }
 0xfe5   :  { %4747 = vmatprep.subr.bf16.mxu0 %v5892_v5 }
 0xfe8   :  { %4748 = vmatpush3.bf16.msra.mxu0 %v5892_v5 }
 0xfe9   :  { %4749 = vmatprep.subr.bf16.mxu0 %v5893_v10 }
 0xfec   :  { %4750 = vmatpush3.bf16.msra.mxu0 %v5893_v10 }
 0xfed   :  { %4751 = vmatprep.subr.bf16.mxu0 %v5894_v15 }
 0xff0   :  { %4752 = vmatpush3.bf16.msra.mxu0 %v5894_v15 }
 0xff1   :  { %4753 = vmatprep.subr.bf16.mxu0 %v5895_v33 }
 0xff4   :  { %4754 = vmatpush3.bf16.msra.mxu0 %v5895_v33 }
 0xff7   :  { %4756 = vmatmul.mubr.bf16.vlgmr.msra.gmra.mrb[48].mxu0 %v4319_v50 }
 0xff8   :  { %4759 = vmatprep.mubr.bf16.mxu0 %v4320_v6 }
0x10aa   :  { %v4205_v44 = vpop.f32.mrb[46].mxu0  ;;  %v4276_v23 = vpop.f32.mrb[78].mxu1 }
0x10ab   :  { %v4281_v32 = vadd.f32 %v4205_v44, %v8600_v1  ;;  %v4283_v63 = vadd.f32 %v4276_v23, %v8601_v58  ;;  %v4207_v27 = vpop.f32.mrb[47].mxu0  ;;  %v4278_v48 = vpop.f32.mrb[79].mxu1 }
0x10ac   :  { %v4282_v30 = vadd.f32 %v4207_v27, %v8602_v13  ;;  %v4284_v52 = vadd.f32 %v4278_v48, %v8603_v19 }
0x10ad   :  { %v4715_v20 = vmul.f32 -1.442695, %v4281_v32 }
0x10ae   :  { %v4716_v54 = vmul.f32 -1.442695, %v4282_v30  ;;  %v4717_v45 = vmul.f32 -1.442695, %v4284_v52 }
0x10af   :  { %6136 = vpow2.f32 %v4715_v20 }
0x10b0   :  { %6138 = vpow2.f32 %v4716_v54 }
0x10b1   :  { %6140 = vpow2.f32 %v4717_v45 }
0x10b2   :  { %6142 = vtanh.f32 %v4283_v63 }
0x10b9   :  { %v6137_v25 = vpop.eup %6136 }
0x10ba   :  { %v6139_v37 = vpop.eup %6138  ;;  %v4288_v40 = vadd.f32 1.0, %v6137_v25 }
0x10bb   :  { %v4294_v61 = vadd.f32 1.0, %v6139_v37  ;;  %v6141_v2 = vpop.eup %6140 }
0x10bc   :  { %6144 = vrcp.f32 %v4288_v40  ;;  %v6143_v17 = vpop.eup %6142  ;;  %v4301_v42 = vadd.f32 1.0, %v6141_v2 }
0x10bd   :  { %6146 = vrcp.f32 %v4294_v61 }
0x10be   :  { %6148 = vrcp.f32 %v4301_v42 }
0x10c6   :  { %v6145_v22 = vpop.eup %6144 }
0x10c7   :  { %v6147_v7 = vpop.eup %6146  ;;  %v4305_v39 = vmul.f32 %v6145_v22, %v6143_v17 }
0x10c8   :  { %v4304_v62 = vmul.f32 %v6147_v7, %v8349_v57  ;;  %v6149_v14 = vpop.eup %6148 }
0x10ca   :  { %v4757_v0 = vpop.f32.mrb[48].mxu0  ;;  %v4306_v49 = vadd.f32 %v4305_v39, %v4304_v62 }
0x10cb   :  { %v8391_v8 = vadd.f32 %v4757_v0, %v4718_v43  ;;  %v4427_v46 = vpop.f32.mrb[49].mxu0 }
0x10cc   :  { %v4758_v31 = vpop.f32.mrb[50].mxu0  ;;  %6150 = vtanh.f32 %v4306_v49  ;;  %v8396_v21 = vadd.f32 %v4718_v43, %v4427_v46 }
0x10cd   :  { %4462 = vmax.xlane.f32.xlu0 %v8391_v8  ;;  %v4430_v26 = vpop.f32.mrb[51].mxu0  ;;  %v8400_v9 = vadd.f32 %v4758_v31, %v4718_v43 }
0x10ce   :  { %v8394_v16 = vadd.f32 %v4718_v43, %v4430_v26 }
0x10d0   :  { %4460 = vmax.xlane.f32.xlu1 %v8394_v16 }
0x10d1   :  { %4458 = vmax.xlane.f32.xlu0 %v8396_v21 }
0x10d5   :  { %4464 = vmax.xlane.f32.xlu0 %v8400_v9 }
0x10d6   :  { %v6151_v38 = vpop.eup %6150 }
0x10d7   :  { %v4308_v34 = vmul.f32 %v6151_v38, %v6149_v14 }
0x10d9   :  { %v4321_v56 = vpack.c.bf16 %v4308_v34, %v8352_v24 }
0x10db   :  { %4760 = vmatmul.mubr.bf16.gmra.mrb[52].mxu0 %v4321_v56 }
0x115a   :  { %v8404_v18 = vpop.xlane.xlu0 %4462 }
0x115b   :  { %v4476_v28 = vsub.f32 %v8391_v8, %v8404_v18 }
0x115d   :  { %v8408_v36 = vpop.xlane.xlu1 %4460  ;;  %v4486_v47 = vmul.f32 1.442695, %v4476_v28 }
0x115e   :  { %v8406_v12 = vpop.xlane.xlu0 %4458  ;;  %v4475_v59 = vsub.f32 %v8394_v16, %v8408_v36 }
0x115f   :  { %v4474_v53 = vsub.f32 %v8396_v21, %v8406_v12 }
0x1160   :  { %v4484_v3 = vmul.f32 1.442695, %v4475_v59 }
0x1161   :  { %v4482_v51 = vmul.f32 1.442695, %v4474_v53 }
0x1162   :  { %v8414_v29 = vpop.xlane.xlu0 %4464 }
0x1163   :  { %v4477_v60 = vsub.f32 %v8400_v9, %v8414_v29  ;;  %6152 = vpow2.f32 %v4482_v51 }
0x1164   :  { %6154 = vpow2.f32 %v4484_v3 }
0x1165   :  { %v4488_v35 = vmul.f32 1.442695, %v4477_v60  ;;  %6156 = vpow2.f32 %v4486_v47 }
0x1167   :  { %6158 = vpow2.f32 %v4488_v35 }
0x116d   :  { %v6153_v15 = vpop.eup %6152 }
0x116e   :  { %v6155_v33 = vpop.eup %6154 }
0x116f   :  { %v6157_v50 = vpop.eup %6156 }
0x1171   :  { %v6159_v6 = vpop.eup %6158 }
0x11ae   :  { %v4761_v57 = vpop.f32.mrb[52].mxu0 }
0x11af   :  { %v4443_v11 = vpop.f32.mrb[53].mxu0  ;;  %v8425_v5 = vadd.f32 %v4761_v57, %v4718_v43 }
0x11b0   :  { %v8420_v24 = vadd.f32 %v4718_v43, %v4443_v11  ;;  %v4762_v4 = vpop.f32.mrb[54].mxu0 }
0x11b1   :  { %v4446_v41 = vpop.f32.mrb[55].mxu0  ;;  %v8428_v10 = vadd.f32 %v4762_v4, %v4718_v43 }
0x11b2   :  { %v8422_v55 = vadd.f32 %v4718_v43, %v4446_v41  ;;  %4466 = vmax.xlane.f32.xlu1 %v8420_v24 }
0x11b4   :  { %4468 = vmax.xlane.f32.xlu0 %v8422_v55 }
0x11b6   :  { %4470 = vmax.xlane.f32.xlu1 %v8425_v5 }
0x11b8   :  { %4472 = vmax.xlane.f32.xlu0 %v8428_v10 }
0x11ba   :  { %4498 = vadd.xlane.f32.xlu1 %v6153_v15 }
0x11bc   :  { %4500 = vadd.xlane.f32.xlu0 %v6155_v33 }
0x11be   :  { %4502 = vadd.xlane.f32.xlu1 %v6157_v50 }
0x11c0   :  { %4504 = vadd.xlane.f32.xlu0 %v6159_v6 }
0x123f   :  { %v8432_v44 = vpop.xlane.xlu1 %4466 }
0x1240   :  { %v4478_v23 = vsub.f32 %v8420_v24, %v8432_v44 }
0x1241   :  { %v8436_v1 = vpop.xlane.xlu0 %4468 }
0x1242   :  { %v4490_v32 = vmul.f32 1.442695, %v4478_v23  ;;  %v4479_v58 = vsub.f32 %v8422_v55, %v8436_v1 }
0x1243   :  { %v8440_v63 = vpop.xlane.xlu1 %4470 }
0x1244   :  { %6160 = vpow2.f32 %v4490_v32  ;;  %v4492_v27 = vmul.f32 1.442695, %v4479_v58  ;;  %v4480_v48 = vsub.f32 %v8425_v5, %v8440_v63 }
0x1245   :  { %v8444_v13 = vpop.xlane.xlu0 %4472 }
0x1246   :  { %6162 = vpow2.f32 %v4492_v27  ;;  %v4494_v30 = vmul.f32 1.442695, %v4480_v48  ;;  %v4481_v19 = vsub.f32 %v8428_v10, %v8444_v13 }
0x1247   :  { %v4499_v52 = vpop.xlane.xlu1 %4498 }
0x1248   :  { %6164 = vpow2.f32 %v4494_v30  ;;  %v4496_v20 = vmul.f32 1.442695, %v4481_v19 }
0x1249   :  { %6166 = vlog2.f32 %v4499_v52  ;;  %v4501_v54 = vpop.xlane.xlu0 %4500 }
0x124a   :  { %6168 = vpow2.f32 %v4496_v20 }
0x124b   :  { %6170 = vlog2.f32 %v4501_v54  ;;  %v4503_v45 = vpop.xlane.xlu1 %4502 }
0x124c   :  { %6172 = vlog2.f32 %v4503_v45 }
0x124d   :  { %v4505_v25 = vpop.xlane.xlu0 %4504 }
0x124e   :  { %v6161_v37 = vpop.eup %6160  ;;  %6174 = vlog2.f32 %v4505_v25 }
0x124f   :  { %4506 = vadd.xlane.f32.xlu1 %v6161_v37 }
0x1250   :  { %v6163_v40 = vpop.eup %6162 }
0x1251   :  { %4508 = vadd.xlane.f32.xlu0 %v6163_v40 }
0x1252   :  { %v6165_v61 = vpop.eup %6164 }
0x1253   :  { %v6167_v2 = vpop.eup %6166  ;;  %4510 = vadd.xlane.f32.xlu1 %v6165_v61 }
0x1254   :  { %v6169_v17 = vpop.eup %6168  ;;  %v4515_v22 = vmul.f32 0.6931472, %v6167_v2 }
0x1255   :  { %v6171_v7 = vpop.eup %6170  ;;  %4512 = vadd.xlane.f32.xlu0 %v6169_v17 }
0x1256   :  { %v6173_v39 = vpop.eup %6172  ;;  %v4530_v42 = vadd.f32 %v4515_v22, %v8406_v12  ;;  %v4517_v62 = vmul.f32 0.6931472, %v6171_v7 }
0x1257   :  { %v4519_v43 = vmul.f32 0.6931472, %v6173_v39 }
0x1258   :  { %v6175_v0 = vpop.eup %6174  ;;  %v4538_v49 = vsub.f32 %v8396_v21, %v4530_v42  ;;  %v4531_v46 = vadd.f32 %v4517_v62, %v8408_v36 }
0x1259   :  { %v4532_v31 = vadd.f32 %v4519_v43, %v8404_v18  ;;  %v4521_v26 = vmul.f32 0.6931472, %v6175_v0 }
0x125a   :  { %4546 = vst [vmem:[%s8498_s10] sm:$0xff] %v4538_v49  ;;  %v4539_v14 = vsub.f32 %v8394_v16, %v4531_v46 }
0x125b   :  { %v4540_v38 = vsub.f32 %v8391_v8, %v4532_v31  ;;  %v4533_v34 = vadd.f32 %v4521_v26, %v8414_v29 }
0x125c   :  { %4547 = vst [vmem:[%s8498_s10 + $0x8] sm:$0xff] %v4539_v14 }
0x125d   :  { %4548 = vst [vmem:[%s8498_s10 + $0x10] sm:$0xff] %v4540_v38  ;;  %v4541_v21 = vsub.f32 %v8400_v9, %v4533_v34 }
0x125f   :  { %4549 = vst [vmem:[%s8498_s10 + $0x18] sm:$0xff] %v4541_v21 }
0x12dc   :  { %v4507_v56 = vpop.xlane.xlu1 %4506 }
0x12dd   :  { %6176 = vlog2.f32 %v4507_v56 }
0x12de   :  { %v4509_v16 = vpop.xlane.xlu0 %4508 }
0x12df   :  { %6178 = vlog2.f32 %v4509_v16 }
0x12e0   :  { %v4511_v8 = vpop.xlane.xlu1 %4510 }
0x12e1   :  { %6180 = vlog2.f32 %v4511_v8 }
0x12e2   :  { %v4513_v18 = vpop.xlane.xlu0 %4512 }
0x12e3   :  { %6182 = vlog2.f32 %v4513_v18 }
0x12e7   :  { %v6177_v12 = vpop.eup %6176 }
0x12e8   :  { %v4523_v36 = vmul.f32 0.6931472, %v6177_v12 }
0x12e9   :  { %v6179_v53 = vpop.eup %6178 }
0x12ea   :  { %v4534_v59 = vadd.f32 %v4523_v36, %v8432_v44  ;;  %v4525_v29 = vmul.f32 0.6931472, %v6179_v53 }
0x12eb   :  { %v6181_v28 = vpop.eup %6180 }
0x12ec   :  { %v4542_v9 = vsub.f32 %v8420_v24, %v4534_v59  ;;  %v4535_v51 = vadd.f32 %v4525_v29, %v8436_v1  ;;  %v4527_v3 = vmul.f32 0.6931472, %v6181_v28 }
0x12ed   :  { %v6183_v60 = vpop.eup %6182 }
0x12ee   :  { %4550 = vst [vmem:[%s8498_s10 + $0x20] sm:$0xff] %v4542_v9  ;;  %v4543_v57 = vsub.f32 %v8422_v55, %v4535_v51  ;;  %v4536_v47 = vadd.f32 %v4527_v3, %v8440_v63  ;;  %v4529_v11 = vmul.f32 0.6931472, %v6183_v60 }
0x12f0   :  { %4551 = vst [vmem:[%s8498_s10 + $0x28] sm:$0xff] %v4543_v57  ;;  %v4544_v4 = vsub.f32 %v8425_v5, %v4536_v47  ;;  %v4537_v24 = vadd.f32 %v4529_v11, %v8444_v13 }
0x12f2   :  { %4552 = vst [vmem:[%s8498_s10 + $0x30] sm:$0xff] %v4544_v4  ;;  %v4545_v35 = vsub.f32 %v8428_v10, %v4537_v24 }
0x12f4   :  { %4553 = vst [vmem:[%s8498_s10 + $0x38] sm:$0xff] %v4545_v35 }

</bundles_post_ra>
